<compile_context>
chip_gen: v5e
topology: v5e:2x2
jax: 0.10.0
libtpu: 0.0.40
codegen_flags: <defaults>
</compile_context>

<pallas_src>
import functools
import math

import jax
import jax.numpy as jnp
from jax.experimental import pallas as pl
from jax.experimental.pallas import tpu as pltpu


# ----------------------------------------------------------------------------
# Fused kernel: one (batch n, row-tile r) grid step computes TH output rows of
#   y = SiLU(BN2(conv2( SiLU(BN1(conv1(x))) ))) [+ x]
# ----------------------------------------------------------------------------
def _bottleneck_kernel(x_ref, w1_ref, s1_ref, b1_ref, w2_ref, s2_ref, b2_ref,
                       o_ref, xpad_ref, *, H, W, C1, Cm, C2, TH, add, cdt):
    r = pl.program_id(1)
    row0 = pl.multiple_of(r * TH, TH)          # first output row of this tile

    # ---- once per batch element: zero-padded copy of the input in VMEM -----
    # xpad[a, b] = x[a - 2, b - 1], zero outside.  (2 pad rows per side because
    # cv2's halo over cv1's halo reaches 2 input rows past the tile; 1 pad col
    # per side for the W halo.)  Replaces a wrapper-level jnp.pad -> removes a
    # full HBM round trip of the padded tensor.
    @pl.when(r == 0)
    def _fill_padded_input():
        xpad_ref[...] = jnp.zeros_like(xpad_ref)
        xpad_ref[pl.ds(2, H), pl.ds(1, W), :] = x_ref[0].astype(cdt)

    # Rows needed for output rows [row0, row0+TH):
    #   cv1 rows [row0-1, row0+TH+1) -> input rows [row0-2, row0+TH+2)
    #   which are xpad rows [row0, row0+TH+4).
    xin = xpad_ref[pl.ds(row0, TH + 4), :, :]                   # (TH+4, W+2, C1)

    # ---- cv1: 3x3 conv as ONE im2col matmul (K = 9*C1) ----------------------
    taps1 = [xin[dy:dy + TH + 2, dx:dx + W, :]
             for dy in range(3) for dx in range(3)]             # 9 x (TH+2, W, C1)
    p1 = jnp.concatenate(taps1, axis=-1).reshape((TH + 2) * W, 9 * C1)
    y1 = jnp.dot(p1, w1_ref[...], preferred_element_type=jnp.float32)
    y1 = y1 * s1_ref[...] + b1_ref[...]                         # folded BN1
    y1 = y1 * jax.nn.sigmoid(y1)                                # SiLU
    y1 = y1.reshape(TH + 2, W, Cm)

    # cv1 rows that fall outside the image must be ZERO padding for cv2
    # (not SiLU(bias)), so mask them out.
    grow = row0 - 1 + jax.lax.broadcasted_iota(jnp.int32, (TH + 2, W, Cm), 0)
    y1 = jnp.where((grow >= 0) & (grow < H), y1, 0.0).astype(cdt)

    # Zero-pad cv1 activations along W for cv2's halo; the intermediate stays
    # entirely on-chip (never written to HBM).
    zc1 = jnp.zeros((TH + 2, 1, Cm), cdt)
    mid = jnp.concatenate([zc1, y1, zc1], axis=1)               # (TH+2, W+2, Cm)

    # ---- cv2: 3x3 conv as ONE im2col matmul (K = 9*Cm) ----------------------
    taps2 = [mid[dy:dy + TH, dx:dx + W, :]
             for dy in range(3) for dx in range(3)]             # 9 x (TH, W, Cm)
    p2 = jnp.concatenate(taps2, axis=-1).reshape(TH * W, 9 * Cm)
    y2 = jnp.dot(p2, w2_ref[...], preferred_element_type=jnp.float32)
    y2 = y2 * s2_ref[...] + b2_ref[...]                         # folded BN2
    y2 = y2 * jax.nn.sigmoid(y2)                                # SiLU
    y2 = y2.reshape(1, TH, W, C2)

    if add:  # residual (shortcut and C1 == C2); read from the already-resident
             # input block, added in f32.
        y2 = y2 + x_ref[:, pl.ds(row0, TH), :, :].astype(jnp.float32)

    # TODO(synk): a (W*C2)-packed lane-dense output store would further cut
    # masked vst's at tiny channel counts; kept as (TH, W, C2) pending verified
    # minor-dim reshape support in Mosaic.
    o_ref[...] = y2.astype(o_ref.dtype)


# ----------------------------------------------------------------------------
# Wrappers
# ----------------------------------------------------------------------------
def _fold_bn(gamma, beta, mean, var, eps=1e-3):
    scale = gamma / jnp.sqrt(var + eps)
    bias = beta - mean * scale
    return scale.astype(jnp.float32), bias.astype(jnp.float32)


def bottleneck_forward_nhwc(x_nhwc, params, *, shortcut=True,
                            compute_dtype=jnp.float32, row_tile=8):
    """Native NHWC entry point (no boundary transposes)."""
    N, H, W, C1 = x_nhwc.shape
    Cm = params["w1"].shape[-1]
    C2 = params["w2"].shape[-1]
    add = bool(shortcut) and (C1 == C2)
    cdt = compute_dtype

    # Row-tile size: largest divisor of H not exceeding the request.
    TH = math.gcd(H, max(1, int(row_tile)))
    HT = H // TH

    s1, b1 = _fold_bn(params["bn1_gamma"], params["bn1_beta"],
                      params["bn1_mean"], params["bn1_var"])
    s2, b2 = _fold_bn(params["bn2_gamma"], params["bn2_beta"],
                      params["bn2_mean"], params["bn2_var"])

    # HWIO (3,3,Cin,Cout) -> (9*Cin, Cout); row-major matches the tap order
    # used inside the kernel. Kept in the compute dtype (no f32 up-cast).
    w1 = params["w1"].reshape(9 * C1, Cm).astype(cdt)
    w2 = params["w2"].reshape(9 * Cm, C2).astype(cdt)
    s1 = s1.reshape(1, Cm)
    b1 = b1.reshape(1, Cm)
    s2 = s2.reshape(1, C2)
    b2 = b2.reshape(1, C2)

    kernel = functools.partial(
        _bottleneck_kernel,
        H=H, W=W, C1=C1, Cm=Cm, C2=C2, TH=TH, add=add, cdt=cdt)

    return pl.pallas_call(
        kernel,
        out_shape=jax.ShapeDtypeStruct((N, H, W, C2), x_nhwc.dtype),
        grid_spec=pltpu.PrefetchScalarGridSpec(
            num_scalar_prefetch=0,
            grid=(N, HT),
            in_specs=[
                # full image, resident across the row-tile axis (DMA'd once per n)
                pl.BlockSpec((1, H, W, C1), lambda n, r: (n, 0, 0, 0)),
                pl.BlockSpec((9 * C1, Cm), lambda n, r: (0, 0)),
                pl.BlockSpec((1, Cm), lambda n, r: (0, 0)),
                pl.BlockSpec((1, Cm), lambda n, r: (0, 0)),
                pl.BlockSpec((9 * Cm, C2), lambda n, r: (0, 0)),
                pl.BlockSpec((1, C2), lambda n, r: (0, 0)),
                pl.BlockSpec((1, C2), lambda n, r: (0, 0)),
            ],
            out_specs=pl.BlockSpec((1, TH, W, C2), lambda n, r: (n, r, 0, 0)),
            scratch_shapes=[pltpu.VMEM((H + 4, W + 2, C1), cdt)],
        ),
        compiler_params=pltpu.CompilerParams(
            dimension_semantics=("parallel", "arbitrary")),
    )(x_nhwc, w1, s1, b1, w2, s2, b2)


def bottleneck_forward(x_nchw, params, *, shortcut=True,
                       compute_dtype=jnp.float32, row_tile=8):
    """PyTorch-convention wrapper (NCHW in/out). In an NHWC end-to-end model
    call bottleneck_forward_nhwc directly to avoid the boundary transposes."""
    x = jnp.transpose(x_nchw, (0, 2, 3, 1))
    y = bottleneck_forward_nhwc(x, params, shortcut=shortcut,
                                compute_dtype=compute_dtype, row_tile=row_tile)
    return jnp.transpose(y, (0, 3, 1, 2))


# ----------------------------------------------------------------------------
# Pure-JAX reference (for correctness check)
# ----------------------------------------------------------------------------
def _ref_forward(x_nchw, params, shortcut=True):
    def conv_bn_silu(x, w_hwio, gamma, beta, mean, var):
        w_oihw = jnp.transpose(w_hwio, (3, 2, 0, 1))
        y = jax.lax.conv_general_dilated(
            x, w_oihw, window_strides=(1, 1), padding=((1, 1), (1, 1)),
            dimension_numbers=("NCHW", "OIHW", "NCHW"))
        s, b = _fold_bn(gamma, beta, mean, var)
        y = y * s[None, :, None, None] + b[None, :, None, None]
        return y * jax.nn.sigmoid(y)

    c1 = x_nchw.shape[1]
    c2 = params["w2"].shape[-1]
    y = conv_bn_silu(x_nchw, params["w1"], params["bn1_gamma"],
                     params["bn1_beta"], params["bn1_mean"], params["bn1_var"])
    y = conv_bn_silu(y, params["w2"], params["bn2_gamma"],
                     params["bn2_beta"], params["bn2_mean"], params["bn2_var"])
    if shortcut and c1 == c2:
        y = x_nchw + y
    return y


# ----------------------------------------------------------------------------
# Main
# ----------------------------------------------------------------------------
if __name__ == "__main__":
    # Bottleneck(c1=4, c2=4, shortcut=True, k=(3,3), e=0.5) -> c_ = 2
    N, C1, H, W = 2, 4, 16, 16
    C2 = 4
    C_ = int(C2 * 0.5)

    key = jax.random.PRNGKey(0)
    k1, k2, k3, k4, k5 = jax.random.split(key, 5)

    x = jax.random.normal(k1, (N, C1, H, W), dtype=jnp.float32)

    params = {
        # conv weights in HWIO layout: (kH, kW, Cin, Cout)
        "w1": 0.1 * jax.random.normal(k2, (3, 3, C1, C_), dtype=jnp.float32),
        "w2": 0.1 * jax.random.normal(k3, (3, 3, C_, C2), dtype=jnp.float32),
        "bn1_gamma": 1.0 + 0.1 * jax.random.normal(k4, (C_,), dtype=jnp.float32),
        "bn1_beta": 0.05 * jnp.arange(C_, dtype=jnp.float32),
        "bn1_mean": 0.1 * jnp.arange(C_, dtype=jnp.float32),
        "bn1_var": jnp.ones((C_,), dtype=jnp.float32) * 1.5,
        "bn2_gamma": 1.0 + 0.1 * jax.random.normal(k5, (C2,), dtype=jnp.float32),
        "bn2_beta": 0.05 * jnp.arange(C2, dtype=jnp.float32),
        "bn2_mean": 0.1 * jnp.arange(C2, dtype=jnp.float32),
        "bn2_var": jnp.ones((C2,), dtype=jnp.float32) * 2.0,
    }

    ref = _ref_forward(x, params, shortcut=True)

    # f32 path (module semantics)
    out = jax.block_until_ready(bottleneck_forward(x, params, shortcut=True))
    assert out.shape == (N, C2, H, W)
    assert jnp.allclose(out, ref, atol=1e-3, rtol=1e-3), "f32 mismatch vs reference"

    # no-shortcut specialization
    out_ns = jax.block_until_ready(bottleneck_forward(x, params, shortcut=False))
    ref_ns = _ref_forward(x, params, shortcut=False)
    assert jnp.allclose(out_ns, ref_ns, atol=1e-3, rtol=1e-3), "no-add mismatch"

    # bf16 MXU path (f32 accumulation, f32 residual) -> looser tolerance
    out_bf16 = jax.block_until_ready(
        bottleneck_forward(x, params, shortcut=True, compute_dtype=jnp.bfloat16))
    assert jnp.allclose(out_bf16, ref, atol=5e-2, rtol=5e-2), "bf16 mismatch"

    print("KERNEL_OK")
</pallas_src>

<mosaic_0001>
module attributes {stable_mosaic.version = 11 : i64} {
  func.func @_bottleneck_kernel(%arg0: i32, %arg1: i32, %arg2: memref<1x16x16x4xf32, #tpu.memory_space<vmem>>, %arg3: memref<36x2xf32, #tpu.memory_space<vmem>>, %arg4: memref<1x2xf32, #tpu.memory_space<vmem>>, %arg5: memref<1x2xf32, #tpu.memory_space<vmem>>, %arg6: memref<18x4xf32, #tpu.memory_space<vmem>>, %arg7: memref<1x4xf32, #tpu.memory_space<vmem>>, %arg8: memref<1x4xf32, #tpu.memory_space<vmem>>, %arg9: memref<1x8x16x4xf32, #tpu.memory_space<vmem>>, %arg10: memref<20x18x4xf32, #tpu.memory_space<vmem>>) attributes {dimension_semantics = [#tpu.dimension_semantics<parallel>, #tpu.dimension_semantics<arbitrary>], iteration_bounds = array<i64: 2, 2>, scalar_prefetch = 0 : i64, scratch_operands = 1 : i64, tpu.core_type = #tpu.core_type<tc>, window_params = [{transform_indices = @transform_0, window_bounds = array<i64: 1, 16, 16, 4>}, {pipeline_mode = #tpu.pipeline_mode<synchronous>, transform_indices = @transform_1, window_bounds = array<i64: 36, 2>}, {pipeline_mode = #tpu.pipeline_mode<synchronous>, transform_indices = @transform_2, window_bounds = array<i64: 1, 2>}, {pipeline_mode = #tpu.pipeline_mode<synchronous>, transform_indices = @transform_3, window_bounds = array<i64: 1, 2>}, {pipeline_mode = #tpu.pipeline_mode<synchronous>, transform_indices = @transform_4, window_bounds = array<i64: 18, 4>}, {pipeline_mode = #tpu.pipeline_mode<synchronous>, transform_indices = @transform_5, window_bounds = array<i64: 1, 4>}, {pipeline_mode = #tpu.pipeline_mode<synchronous>, transform_indices = @transform_6, window_bounds = array<i64: 1, 4>}, {transform_indices = @transform_7, window_bounds = array<i64: 1, 8, 16, 4>}]} {
    %c8_i32 = arith.constant 8 : i32
    %0 = arith.muli %arg1, %c8_i32 : i32
    %1 = tpu.assume_multiple %0, 8 : i32
    %c0_i32 = arith.constant 0 : i32
    %2 = arith.cmpi eq, %arg1, %c0_i32 : i32
    %3 = arith.extui %2 : i1 to i32
    %c0_i32_0 = arith.constant 0 : i32
    %4 = arith.cmpi ne, %3, %c0_i32_0 : i32
    scf.if %4 {
      %cst_27 = arith.constant 0.000000e+00 : f32
      %76 = vector.broadcast %cst_27 : f32 to vector<20x18x4xf32>
      %c0_28 = arith.constant 0 : index
      %c0_29 = arith.constant 0 : index
      %c0_30 = arith.constant 0 : index
      %77 = vector.load %arg10[%c0_28, %c0_29, %c0_30] : memref<20x18x4xf32, #tpu.memory_space<vmem>>, vector<20x18x4xf32>
      tpu.vector_store %arg10[%c0_28, %c0_29, %c0_30], %76 {strides = array<i32>} : memref<20x18x4xf32, #tpu.memory_space<vmem>>, vector<20x18x4xf32>,
      %c0_31 = arith.constant 0 : index
      %c0_32 = arith.constant 0 : index
      %c0_33 = arith.constant 0 : index
      %c0_34 = arith.constant 0 : index
      %78 = vector.load %arg2[%c0_31, %c0_32, %c0_33, %c0_34] : memref<1x16x16x4xf32, #tpu.memory_space<vmem>>, vector<1x16x16x4xf32>
      %79 = vector.shape_cast %78 : vector<1x16x16x4xf32> to vector<16x16x4xf32>
      %c2 = arith.constant 2 : index
      %c1 = arith.constant 1 : index
      %c0_35 = arith.constant 0 : index
      %80 = vector.load %arg10[%c2, %c1, %c0_35] : memref<20x18x4xf32, #tpu.memory_space<vmem>>, vector<16x16x4xf32>
      tpu.vector_store %arg10[%c2, %c1, %c0_35], %79 {strides = array<i32>} : memref<20x18x4xf32, #tpu.memory_space<vmem>>, vector<16x16x4xf32>,
    } else {
    }
    %5 = arith.index_cast %1 : i32 to index
    %c0 = arith.constant 0 : index
    %c0_1 = arith.constant 0 : index
    %6 = vector.load %arg10[%5, %c0, %c0_1] : memref<20x18x4xf32, #tpu.memory_space<vmem>>, vector<12x18x4xf32>
    %7 = vector.extract_strided_slice %6 {offsets = [0, 0, 0], sizes = [10, 16, 4], strides = [1, 1, 1]} : vector<12x18x4xf32> to vector<10x16x4xf32>
    %8 = vector.extract_strided_slice %6 {offsets = [0, 1, 0], sizes = [10, 16, 4], strides = [1, 1, 1]} : vector<12x18x4xf32> to vector<10x16x4xf32>
    %9 = vector.extract_strided_slice %6 {offsets = [0, 2, 0], sizes = [10, 16, 4], strides = [1, 1, 1]} : vector<12x18x4xf32> to vector<10x16x4xf32>
    %10 = vector.extract_strided_slice %6 {offsets = [1, 0, 0], sizes = [10, 16, 4], strides = [1, 1, 1]} : vector<12x18x4xf32> to vector<10x16x4xf32>
    %11 = vector.extract_strided_slice %6 {offsets = [1, 1, 0], sizes = [10, 16, 4], strides = [1, 1, 1]} : vector<12x18x4xf32> to vector<10x16x4xf32>
    %12 = vector.extract_strided_slice %6 {offsets = [1, 2, 0], sizes = [10, 16, 4], strides = [1, 1, 1]} : vector<12x18x4xf32> to vector<10x16x4xf32>
    %13 = vector.extract_strided_slice %6 {offsets = [2, 0, 0], sizes = [10, 16, 4], strides = [1, 1, 1]} : vector<12x18x4xf32> to vector<10x16x4xf32>
    %14 = vector.extract_strided_slice %6 {offsets = [2, 1, 0], sizes = [10, 16, 4], strides = [1, 1, 1]} : vector<12x18x4xf32> to vector<10x16x4xf32>
    %15 = vector.extract_strided_slice %6 {offsets = [2, 2, 0], sizes = [10, 16, 4], strides = [1, 1, 1]} : vector<12x18x4xf32> to vector<10x16x4xf32>
    %16 = tpu.concatenate %7, %8, %9, %10, %11, %12, %13, %14, %15 in 2 : vector<10x16x4xf32>, vector<10x16x4xf32>, vector<10x16x4xf32>, vector<10x16x4xf32>, vector<10x16x4xf32>, vector<10x16x4xf32>, vector<10x16x4xf32>, vector<10x16x4xf32>, vector<10x16x4xf32> -> vector<10x16x36xf32>
    %17 = vector.shape_cast %16 : vector<10x16x36xf32> to vector<160x36xf32>
    %c0_2 = arith.constant 0 : index
    %c0_3 = arith.constant 0 : index
    %18 = vector.load %arg3[%c0_2, %c0_3] : memref<36x2xf32, #tpu.memory_space<vmem>>, vector<36x2xf32>
    %cst = arith.constant dense<0.000000e+00> : vector<160x2xf32>
    %19 = tpu.matmul %17, %18, %cst {dimension_numbers = #tpu.dot_dimension_numbers<[1], [0], [0], [1], [0, 0, 1, 1], [], []>} : vector<160x36xf32>, vector<36x2xf32>, vector<160x2xf32> -> vector<160x2xf32>
    %c0_4 = arith.constant 0 : index
    %c0_5 = arith.constant 0 : index
    %20 = vector.load %arg4[%c0_4, %c0_5] : memref<1x2xf32, #tpu.memory_space<vmem>>, vector<1x2xf32>
    %21 = vector.broadcast %20 : vector<1x2xf32> to vector<160x2xf32>
    %22 = arith.mulf %19, %21 : vector<160x2xf32>
    %c0_6 = arith.constant 0 : index
    %c0_7 = arith.constant 0 : index
    %23 = vector.load %arg5[%c0_6, %c0_7] : memref<1x2xf32, #tpu.memory_space<vmem>>, vector<1x2xf32>
    %24 = vector.broadcast %23 : vector<1x2xf32> to vector<160x2xf32>
    %25 = arith.addf %22, %24 : vector<160x2xf32>
    %26 = arith.negf %25 : vector<160x2xf32>
    %27 = math.exp %26 : vector<160x2xf32>
    %cst_8 = arith.constant 1.000000e+00 : f32
    %28 = vector.broadcast %cst_8 : f32 to vector<160x2xf32>
    %29 = arith.addf %28, %27 : vector<160x2xf32>
    %30 = arith.divf %28, %29 : vector<160x2xf32>
    %31 = arith.mulf %25, %30 : vector<160x2xf32>
    %32 = vector.shape_cast %31 : vector<160x2xf32> to vector<10x16x2xf32>
    %c1_i32 = arith.constant 1 : i32
    %33 = arith.subi %1, %c1_i32 : i32
    %34 = tpu.iota {dimensions = array<i32: 0>} : vector<10x16x2xi32>
    %35 = vector.broadcast %33 : i32 to vector<10x16x2xi32>
    %36 = arith.addi %35, %34 : vector<10x16x2xi32>
    %c0_i32_9 = arith.constant 0 : i32
    %37 = vector.broadcast %c0_i32_9 : i32 to vector<10x16x2xi32>
    %38 = arith.cmpi sge, %36, %37 : vector<10x16x2xi32>
    %c16_i32 = arith.constant 16 : i32
    %39 = vector.broadcast %c16_i32 : i32 to vector<10x16x2xi32>
    %40 = arith.cmpi slt, %36, %39 : vector<10x16x2xi32>
    %41 = arith.andi %38, %40 : vector<10x16x2xi1>
    %cst_10 = arith.constant 0.000000e+00 : f32
    %42 = vector.broadcast %cst_10 : f32 to vector<10x16x2xf32>
    %43 = arith.select %41, %32, %42 : vector<10x16x2xi1>, vector<10x16x2xf32>
    %cst_11 = arith.constant 0.000000e+00 : f32
    %44 = vector.broadcast %cst_11 : f32 to vector<10x1x2xf32>
    %45 = tpu.concatenate %44, %43, %44 in 1 : vector<10x1x2xf32>, vector<10x16x2xf32>, vector<10x1x2xf32> -> vector<10x18x2xf32>
    %46 = vector.extract_strided_slice %45 {offsets = [0, 0, 0], sizes = [8, 16, 2], strides = [1, 1, 1]} : vector<10x18x2xf32> to vector<8x16x2xf32>
    %47 = vector.extract_strided_slice %45 {offsets = [0, 1, 0], sizes = [8, 16, 2], strides = [1, 1, 1]} : vector<10x18x2xf32> to vector<8x16x2xf32>
    %48 = vector.extract_strided_slice %45 {offsets = [0, 2, 0], sizes = [8, 16, 2], strides = [1, 1, 1]} : vector<10x18x2xf32> to vector<8x16x2xf32>
    %49 = vector.extract_strided_slice %45 {offsets = [1, 0, 0], sizes = [8, 16, 2], strides = [1, 1, 1]} : vector<10x18x2xf32> to vector<8x16x2xf32>
    %50 = vector.extract_strided_slice %45 {offsets = [1, 1, 0], sizes = [8, 16, 2], strides = [1, 1, 1]} : vector<10x18x2xf32> to vector<8x16x2xf32>
    %51 = vector.extract_strided_slice %45 {offsets = [1, 2, 0], sizes = [8, 16, 2], strides = [1, 1, 1]} : vector<10x18x2xf32> to vector<8x16x2xf32>
    %52 = vector.extract_strided_slice %45 {offsets = [2, 0, 0], sizes = [8, 16, 2], strides = [1, 1, 1]} : vector<10x18x2xf32> to vector<8x16x2xf32>
    %53 = vector.extract_strided_slice %45 {offsets = [2, 1, 0], sizes = [8, 16, 2], strides = [1, 1, 1]} : vector<10x18x2xf32> to vector<8x16x2xf32>
    %54 = vector.extract_strided_slice %45 {offsets = [2, 2, 0], sizes = [8, 16, 2], strides = [1, 1, 1]} : vector<10x18x2xf32> to vector<8x16x2xf32>
    %55 = tpu.concatenate %46, %47, %48, %49, %50, %51, %52, %53, %54 in 2 : vector<8x16x2xf32>, vector<8x16x2xf32>, vector<8x16x2xf32>, vector<8x16x2xf32>, vector<8x16x2xf32>, vector<8x16x2xf32>, vector<8x16x2xf32>, vector<8x16x2xf32>, vector<8x16x2xf32> -> vector<8x16x18xf32>
    %56 = vector.shape_cast %55 : vector<8x16x18xf32> to vector<128x18xf32>
    %c0_12 = arith.constant 0 : index
    %c0_13 = arith.constant 0 : index
    %57 = vector.load %arg6[%c0_12, %c0_13] : memref<18x4xf32, #tpu.memory_space<vmem>>, vector<18x4xf32>
    %cst_14 = arith.constant dense<0.000000e+00> : vector<128x4xf32>
    %58 = tpu.matmul %56, %57, %cst_14 {dimension_numbers = #tpu.dot_dimension_numbers<[1], [0], [0], [1], [0, 0, 1, 1], [], []>} : vector<128x18xf32>, vector<18x4xf32>, vector<128x4xf32> -> vector<128x4xf32>
    %c0_15 = arith.constant 0 : index
    %c0_16 = arith.constant 0 : index
    %59 = vector.load %arg7[%c0_15, %c0_16] : memref<1x4xf32, #tpu.memory_space<vmem>>, vector<1x4xf32>
    %60 = vector.broadcast %59 : vector<1x4xf32> to vector<128x4xf32>
    %61 = arith.mulf %58, %60 : vector<128x4xf32>
    %c0_17 = arith.constant 0 : index
    %c0_18 = arith.constant 0 : index
    %62 = vector.load %arg8[%c0_17, %c0_18] : memref<1x4xf32, #tpu.memory_space<vmem>>, vector<1x4xf32>
    %63 = vector.broadcast %62 : vector<1x4xf32> to vector<128x4xf32>
    %64 = arith.addf %61, %63 : vector<128x4xf32>
    %65 = arith.negf %64 : vector<128x4xf32>
    %66 = math.exp %65 : vector<128x4xf32>
    %cst_19 = arith.constant 1.000000e+00 : f32
    %67 = vector.broadcast %cst_19 : f32 to vector<128x4xf32>
    %68 = arith.addf %67, %66 : vector<128x4xf32>
    %69 = arith.divf %67, %68 : vector<128x4xf32>
    %70 = arith.mulf %64, %69 : vector<128x4xf32>
    %71 = vector.shape_cast %70 : vector<128x4xf32> to vector<1x8x16x4xf32>
    %c0_20 = arith.constant 0 : index
    %72 = arith.index_cast %1 : i32 to index
    %c0_21 = arith.constant 0 : index
    %c0_22 = arith.constant 0 : index
    %73 = vector.load %arg2[%c0_20, %72, %c0_21, %c0_22] : memref<1x16x16x4xf32, #tpu.memory_space<vmem>>, vector<1x8x16x4xf32>
    %74 = arith.addf %71, %73 : vector<1x8x16x4xf32>
    %c0_23 = arith.constant 0 : index
    %c0_24 = arith.constant 0 : index
    %c0_25 = arith.constant 0 : index
    %c0_26 = arith.constant 0 : index
    %75 = vector.load %arg9[%c0_23, %c0_24, %c0_25, %c0_26] : memref<1x8x16x4xf32, #tpu.memory_space<vmem>>, vector<1x8x16x4xf32>
    tpu.vector_store %arg9[%c0_23, %c0_24, %c0_25, %c0_26], %74 {strides = array<i32>} : memref<1x8x16x4xf32, #tpu.memory_space<vmem>>, vector<1x8x16x4xf32>,
    return
  }
  func.func @transform_0(%arg0: i32, %arg1: i32) -> (i32, i32, i32, i32) {
    %c0_i32 = arith.constant 0 : i32
    %c0_i32_0 = arith.constant 0 : i32
    %c0_i32_1 = arith.constant 0 : i32
    %c0_i32_2 = arith.constant 0 : i32
    return %arg0, %c0_i32, %c0_i32_0, %c0_i32_1 : i32, i32, i32, i32
  }
  func.func @transform_1(%arg0: i32, %arg1: i32) -> (i32, i32) {
    %c0_i32 = arith.constant 0 : i32
    %c0_i32_0 = arith.constant 0 : i32
    %c0_i32_1 = arith.constant 0 : i32
    return %c0_i32, %c0_i32_0 : i32, i32
  }
  func.func @transform_2(%arg0: i32, %arg1: i32) -> (i32, i32) {
    %c0_i32 = arith.constant 0 : i32
    %c0_i32_0 = arith.constant 0 : i32
    %c0_i32_1 = arith.constant 0 : i32
    return %c0_i32, %c0_i32_0 : i32, i32
  }
  func.func @transform_3(%arg0: i32, %arg1: i32) -> (i32, i32) {
    %c0_i32 = arith.constant 0 : i32
    %c0_i32_0 = arith.constant 0 : i32
    %c0_i32_1 = arith.constant 0 : i32
    return %c0_i32, %c0_i32_0 : i32, i32
  }
  func.func @transform_4(%arg0: i32, %arg1: i32) -> (i32, i32) {
    %c0_i32 = arith.constant 0 : i32
    %c0_i32_0 = arith.constant 0 : i32
    %c0_i32_1 = arith.constant 0 : i32
    return %c0_i32, %c0_i32_0 : i32, i32
  }
  func.func @transform_5(%arg0: i32, %arg1: i32) -> (i32, i32) {
    %c0_i32 = arith.constant 0 : i32
    %c0_i32_0 = arith.constant 0 : i32
    %c0_i32_1 = arith.constant 0 : i32
    return %c0_i32, %c0_i32_0 : i32, i32
  }
  func.func @transform_6(%arg0: i32, %arg1: i32) -> (i32, i32) {
    %c0_i32 = arith.constant 0 : i32
    %c0_i32_0 = arith.constant 0 : i32
    %c0_i32_1 = arith.constant 0 : i32
    return %c0_i32, %c0_i32_0 : i32, i32
  }
  func.func @transform_7(%arg0: i32, %arg1: i32) -> (i32, i32, i32, i32) {
    %c0_i32 = arith.constant 0 : i32
    %c0_i32_0 = arith.constant 0 : i32
    %c0_i32_1 = arith.constant 0 : i32
    return %arg0, %arg1, %c0_i32, %c0_i32_0 : i32, i32, i32, i32
  }
}

</mosaic_0001>

<bundles_post_ra>
// kernel: tpu_custom_call.1
= control target key start
LH: loop header
LB: loop body
LE: loop exit
PB: predicated region body
PF: predicated region fallthrough
CT: control target
= control target key end

     0   :  { %s3712_s24 = smov 0   ;;  %s3714_s25 = smov 0   ;;  %s6545_s0 = inlined_call_operand.vmem [shape: f32[2,16,16,4], index: 0, kind: input, shape index: {}]   ;;  %s6546_s1 = inlined_call_operand.vmem [shape: f32[36,2], index: 1, kind: input, shape index: {}]   ;;  %s6547_s2 = inlined_call_operand.vmem [shape: f32[1,2], index: 2, kind: input, shape index: {}]   ;;  %s6548_s3 = inlined_call_operand.vmem [shape: f32[1,2], index: 3, kind: input, shape index: {}]   ;;  %s6549_s4 = inlined_call_operand.vmem [shape: f32[18,4], index: 4, kind: input, shape index: {}]   ;;  %s6550_s5 = inlined_call_operand.vmem [shape: f32[1,4], index: 5, kind: input, shape index: {}]   ;;  %s6551_s6 = inlined_call_operand.vmem [shape: f32[1,4], index: 6, kind: input, shape index: {}]   ;;  %s6552_s7 = inlined_call_operand.vmem [shape: f32[2,16,16,4], index: 7, kind: output, shape index: {}]  }
   0x1   :  { %s3716_s26 = smov 0   ;;  %s3718_s27 = smov 0  }
   0x2   :  { %s3720_s28 = smov 0  }
   0x3 LB: > { %s26_s29 = sadd.s32 1, %s3649_s26  ;;  %s29_s30 = sadd.s32 1, %s3653_s27  ;;  %s3657_s28 = sphi %s3720_s28, %s17_s28   ;;  %s3653_s27 = sphi %s3718_s27, %s6784_s27   ;;  %s3649_s26 = sphi %s3716_s26, %s6783_s26   ;;  %s3645_s25 = sphi %s3714_s25, %s6782_s25   ;;  %s3641_s24 = sphi %s3712_s24, %s6781_s24  }
   0x4   : > { %p27_p0 = scmp.ge.s32.totalorder %s26_s29, 2  ;;  %p3300_p1 = scmp.ge.s32.totalorder %s3657_s28, 1 }
   0x5   : > { %p251_p2 = scmp.lt.s32.totalorder %s3657_s28, 5 }
   0x6   : > { %s6786_s29 = smov (%p27_p0, %s26_s29), 0  ;;  %s6788_s30 = smov (!%p27_p0, %s29_s30), %s3653_s27 }
   0x7   : > { %p252_p3 = pnand %p3300_p1, %p251_p2  ;;  %p31_p4 = scmp.ge.s32.totalorder %s6788_s30, 2 }
   0x9   : > { %s6790_s30 = smov (%p31_p4, %s6788_s30), 0  ;;  %255 = sbr.rel (%p252_p3) target bundleno = 1406 (0x57e), region = 48 }
   0xe   : > { %p288_p5 = scmp.lt.s32.totalorder %s3645_s25, 1  ;;  %s3745_s8 = sshll.u32 %s3641_s24, 3 }
   0xf   : > { %p296_p6 = scmp.lt.s32.totalorder %s3745_s8, 15  ;;  %p3308_p7 = scmp.ne.s32.totalorder %s3641_s24, 0 }
  0x10   : > { %s6792_s25 = smov (!%p288_p5, %s3645_s25), 1 }
  0x11   : > { %s297_s9 = scalar_select %p296_p6, %s3745_s8, 15 }
  0x12   : > { %s3388_s10 = sshll.u32 %s6792_s25, 8  ;;  %s3305_s11 = sshll.u32 %s6792_s25, 5 }
  0x13   : > { %s3752_s14 = scalar_lea.vmem %s6545_s0, %s3388_s10  ;;  %s3304_s15 = sshll.u32 %s297_s9, 1 }
  0x14   : > { %s300_s16 = sadd.s32 %s3305_s11, %s3304_s15  ;;  %308 = sbr.rel (%p3308_p7) target bundleno = 118 (0x76), region = 52 }
  0x15   : > { %s3306_s17 = sshll.u32 %s300_s16, 3 }
  0x16   : > { %s3757_s20 = scalar_lea.vmem %s6552_s7, %s3306_s17 }
  0x19   : > { %vm309_vm0 = vcmask 31744   ;;  %v3659_v0 = vmov 0.0   ;;  %vm312_vm1 = vcmask 25600   ;;  %v371_v1 = vld [vmem:[%s3752_s14] sm:$0xff]  ;;  %v372_v2 = vld [vmem:[%s3752_s14 + $0x8] sm:$0xff]  ;;  %v373_v3 = vld [vmem:[%s3752_s14 + $0x10] sm:$0xff] }
  0x1a   : > { %317 = vst.msk [vmem:[#allocation2 + $0x30] sm:$0xff] %vm309_vm0, %v3659_v0  ;;  %v374_v4 = vld [vmem:[%s3752_s14 + $0x18] sm:$0xff]  ;;  %v375_v5 = vld [vmem:[%s3752_s14 + $0x20] sm:$0xff]  ;;  %v376_v6 = vld [vmem:[%s3752_s14 + $0x28] sm:$0xff] }
  0x1b   : > { %310 = vst.msk [vmem:[#allocation2] sm:$0xff] %vm309_vm0, %v3659_v0  ;;  %v377_v7 = vld [vmem:[%s3752_s14 + $0x30] sm:$0xff]  ;;  %v378_v8 = vld [vmem:[%s3752_s14 + $0x38] sm:$0xff]  ;;  %v379_v9 = vld [vmem:[%s3752_s14 + $0x40] sm:$0xff] }
  0x1c   : > { %311 = vst.msk [vmem:[#allocation2 + $0x8] sm:$0xff] %vm309_vm0, %v3659_v0  ;;  %v380_v10 = vld [vmem:[%s3752_s14 + $0x48] sm:$0xff]  ;;  %v381_v11 = vld [vmem:[%s3752_s14 + $0x50] sm:$0xff]  ;;  %v382_v12 = vld [vmem:[%s3752_s14 + $0x58] sm:$0xff] }
  0x1d   : > { %314 = vst.msk [vmem:[#allocation2 + $0x18] sm:$0xff] %vm309_vm0, %v3659_v0  ;;  %v383_v13 = vld [vmem:[%s3752_s14 + $0x60] sm:$0xff]  ;;  %v384_v14 = vld [vmem:[%s3752_s14 + $0x68] sm:$0xff]  ;;  %v385_v15 = vld [vmem:[%s3752_s14 + $0x70] sm:$0xff] }
  0x1e   : > { %315 = vst.msk [vmem:[#allocation2 + $0x20] sm:$0xff] %vm309_vm0, %v3659_v0  ;;  %v386_v16 = vld [vmem:[%s3752_s14 + $0x78] sm:$0xff]  ;;  %v387_v17 = vld [vmem:[%s3752_s14 + $0x80] sm:$0xff]  ;;  %v388_v18 = vld [vmem:[%s3752_s14 + $0x88] sm:$0xff] }
  0x1f   : > { %318 = vst.msk [vmem:[#allocation2 + $0x38] sm:$0xff] %vm309_vm0, %v3659_v0  ;;  %v389_v19 = vld [vmem:[%s3752_s14 + $0x90] sm:$0xff]  ;;  %v390_v20 = vld [vmem:[%s3752_s14 + $0x98] sm:$0xff]  ;;  %v391_v21 = vld [vmem:[%s3752_s14 + $0xa0] sm:$0xff] }
  0x20   : > { %320 = vst.msk [vmem:[#allocation2 + $0x48] sm:$0xff] %vm309_vm0, %v3659_v0  ;;  %v392_v22 = vld [vmem:[%s3752_s14 + $0xa8] sm:$0xff]  ;;  %v393_v23 = vld [vmem:[%s3752_s14 + $0xb0] sm:$0xff]  ;;  %v394_v24 = vld [vmem:[%s3752_s14 + $0xb8] sm:$0xff] }
  0x21   : > { %321 = vst.msk [vmem:[#allocation2 + $0x50] sm:$0xff] %vm309_vm0, %v3659_v0  ;;  %v395_v25 = vld [vmem:[%s3752_s14 + $0xc0] sm:$0xff]  ;;  %v396_v26 = vld [vmem:[%s3752_s14 + $0xc8] sm:$0xff]  ;;  %v397_v27 = vld [vmem:[%s3752_s14 + $0xd0] sm:$0xff] }
  0x22   : > { %323 = vst.msk [vmem:[#allocation2 + $0x60] sm:$0xff] %vm309_vm0, %v3659_v0  ;;  %v398_v28 = vld [vmem:[%s3752_s14 + $0xd8] sm:$0xff]  ;;  %v399_v29 = vld [vmem:[%s3752_s14 + $0xe0] sm:$0xff]  ;;  %v400_v30 = vld [vmem:[%s3752_s14 + $0xe8] sm:$0xff] }
  0x23   : > { %324 = vst.msk [vmem:[#allocation2 + $0x68] sm:$0xff] %vm309_vm0, %v3659_v0  ;;  %v401_v31 = vld [vmem:[%s3752_s14 + $0xf0] sm:$0xff]  ;;  %v402_v32 = vld [vmem:[%s3752_s14 + $0xf8] sm:$0xff] }
  0x24   : > { %326 = vst.msk [vmem:[#allocation2 + $0x78] sm:$0xff] %vm309_vm0, %v3659_v0 }
  0x25   : > { %327 = vst.msk [vmem:[#allocation2 + $0x80] sm:$0xff] %vm309_vm0, %v3659_v0 }
  0x26   : > { %329 = vst.msk [vmem:[#allocation2 + $0x90] sm:$0xff] %vm309_vm0, %v3659_v0 }
  0x27   : > { %330 = vst.msk [vmem:[#allocation2 + $0x98] sm:$0xff] %vm309_vm0, %v3659_v0 }
  0x28   : > { %332 = vst.msk [vmem:[#allocation2 + $0xa8] sm:$0xff] %vm309_vm0, %v3659_v0 }
  0x29   : > { %333 = vst.msk [vmem:[#allocation2 + $0xb0] sm:$0xff] %vm309_vm0, %v3659_v0 }
  0x2a   : > { %335 = vst.msk [vmem:[#allocation2 + $0xc0] sm:$0xff] %vm309_vm0, %v3659_v0 }
  0x2b   : > { %336 = vst.msk [vmem:[#allocation2 + $0xc8] sm:$0xff] %vm309_vm0, %v3659_v0 }
  0x2c   : > { %338 = vst.msk [vmem:[#allocation2 + $0xd8] sm:$0xff] %vm309_vm0, %v3659_v0 }
  0x2d   : > { %339 = vst.msk [vmem:[#allocation2 + $0xe0] sm:$0xff] %vm309_vm0, %v3659_v0 }
  0x2e   : > { %341 = vst.msk [vmem:[#allocation2 + $0xf0] sm:$0xff] %vm309_vm0, %v3659_v0 }
  0x2f   : > { %342 = vst.msk [vmem:[#allocation2 + $0xf8] sm:$0xff] %vm309_vm0, %v3659_v0 }
  0x30   : > { %344 = vst.msk [vmem:[#allocation2 + $0x108] sm:$0xff] %vm309_vm0, %v3659_v0 }
  0x31   : > { %345 = vst.msk [vmem:[#allocation2 + $0x110] sm:$0xff] %vm309_vm0, %v3659_v0 }
  0x32   : > { %347 = vst.msk [vmem:[#allocation2 + $0x120] sm:$0xff] %vm309_vm0, %v3659_v0 }
  0x33   : > { %348 = vst.msk [vmem:[#allocation2 + $0x128] sm:$0xff] %vm309_vm0, %v3659_v0 }
  0x34   : > { %350 = vst.msk [vmem:[#allocation2 + $0x138] sm:$0xff] %vm309_vm0, %v3659_v0 }
  0x35   : > { %351 = vst.msk [vmem:[#allocation2 + $0x140] sm:$0xff] %vm309_vm0, %v3659_v0 }
  0x36   : > { %353 = vst.msk [vmem:[#allocation2 + $0x150] sm:$0xff] %vm309_vm0, %v3659_v0 }
  0x37   : > { %354 = vst.msk [vmem:[#allocation2 + $0x158] sm:$0xff] %vm309_vm0, %v3659_v0 }
  0x38   : > { %356 = vst.msk [vmem:[#allocation2 + $0x168] sm:$0xff] %vm309_vm0, %v3659_v0 }
  0x39   : > { %357 = vst.msk [vmem:[#allocation2 + $0x170] sm:$0xff] %vm309_vm0, %v3659_v0 }
  0x3a   : > { %359 = vst.msk [vmem:[#allocation2 + $0x180] sm:$0xff] %vm309_vm0, %v3659_v0 }
  0x3b   : > { %360 = vst.msk [vmem:[#allocation2 + $0x188] sm:$0xff] %vm309_vm0, %v3659_v0 }
  0x3c   : > { %362 = vst.msk [vmem:[#allocation2 + $0x198] sm:$0xff] %vm309_vm0, %v3659_v0 }
  0x3d   : > { %363 = vst.msk [vmem:[#allocation2 + $0x1a0] sm:$0xff] %vm309_vm0, %v3659_v0 }
  0x3e   : > { %365 = vst.msk [vmem:[#allocation2 + $0x1b0] sm:$0xff] %vm309_vm0, %v3659_v0 }
  0x3f   : > { %366 = vst.msk [vmem:[#allocation2 + $0x1b8] sm:$0xff] %vm309_vm0, %v3659_v0 }
  0x40   : > { %368 = vst.msk [vmem:[#allocation2 + $0x1c8] sm:$0xff] %vm309_vm0, %v3659_v0 }
  0x41   : > { %369 = vst.msk [vmem:[#allocation2 + $0x1d0] sm:$0xff] %vm309_vm0, %v3659_v0 }
  0x42   : > { %319 = vst.msk [vmem:[#allocation2 + $0x40] sm:$0x3] %vm312_vm1, %v3659_v0 }
  0x43   : > { %313 = vst.msk [vmem:[#allocation2 + $0x10] sm:$0x3] %vm312_vm1, %v3659_v0 }
  0x44   : > { %316 = vst.msk [vmem:[#allocation2 + $0x28] sm:$0x3] %vm312_vm1, %v3659_v0 }
  0x45   : > { %322 = vst.msk [vmem:[#allocation2 + $0x58] sm:$0x3] %vm312_vm1, %v3659_v0 }
  0x46   : > { %325 = vst.msk [vmem:[#allocation2 + $0x70] sm:$0x3] %vm312_vm1, %v3659_v0 }
  0x47   : > { %328 = vst.msk [vmem:[#allocation2 + $0x88] sm:$0x3] %vm312_vm1, %v3659_v0 }
  0x48   : > { %331 = vst.msk [vmem:[#allocation2 + $0xa0] sm:$0x3] %vm312_vm1, %v3659_v0 }
  0x49   : > { %334 = vst.msk [vmem:[#allocation2 + $0xb8] sm:$0x3] %vm312_vm1, %v3659_v0 }
  0x4a   : > { %337 = vst.msk [vmem:[#allocation2 + $0xd0] sm:$0x3] %vm312_vm1, %v3659_v0 }
  0x4b   : > { %340 = vst.msk [vmem:[#allocation2 + $0xe8] sm:$0x3] %vm312_vm1, %v3659_v0 }
  0x4c   : > { %343 = vst.msk [vmem:[#allocation2 + $0x100] sm:$0x3] %vm312_vm1, %v3659_v0 }
  0x4d   : > { %346 = vst.msk [vmem:[#allocation2 + $0x118] sm:$0x3] %vm312_vm1, %v3659_v0 }
  0x4e   : > { %349 = vst.msk [vmem:[#allocation2 + $0x130] sm:$0x3] %vm312_vm1, %v3659_v0 }
  0x4f   : > { %352 = vst.msk [vmem:[#allocation2 + $0x148] sm:$0x3] %vm312_vm1, %v3659_v0 }
  0x50   : > { %355 = vst.msk [vmem:[#allocation2 + $0x160] sm:$0x3] %vm312_vm1, %v3659_v0 }
  0x51   : > { %358 = vst.msk [vmem:[#allocation2 + $0x178] sm:$0x3] %vm312_vm1, %v3659_v0 }
  0x52   : > { %361 = vst.msk [vmem:[#allocation2 + $0x190] sm:$0x3] %vm312_vm1, %v3659_v0 }
  0x53   : > { %364 = vst.msk [vmem:[#allocation2 + $0x1a8] sm:$0x3] %vm312_vm1, %v3659_v0 }
  0x54   : > { %367 = vst.msk [vmem:[#allocation2 + $0x1c0] sm:$0x3] %vm312_vm1, %v3659_v0 }
  0x55   : > { %370 = vst.msk [vmem:[#allocation2 + $0x1d8] sm:$0x3] %vm312_vm1, %v3659_v0 }
  0x56   : > { %404 = vst.msk [vmem:[#allocation2 + $0x31] sm:$0xff] %vm309_vm0, %v371_v1 }
  0x57   : > { %405 = vst.msk [vmem:[#allocation2 + $0x39] sm:$0xff] %vm309_vm0, %v372_v2 }
  0x58   : > { %406 = vst.msk [vmem:[#allocation2 + $0x49] sm:$0xff] %vm309_vm0, %v373_v3 }
  0x59   : > { %407 = vst.msk [vmem:[#allocation2 + $0x51] sm:$0xff] %vm309_vm0, %v374_v4 }
  0x5a   : > { %408 = vst.msk [vmem:[#allocation2 + $0x61] sm:$0xff] %vm309_vm0, %v375_v5 }
  0x5b   : > { %409 = vst.msk [vmem:[#allocation2 + $0x69] sm:$0xff] %vm309_vm0, %v376_v6 }
  0x5c   : > { %410 = vst.msk [vmem:[#allocation2 + $0x79] sm:$0xff] %vm309_vm0, %v377_v7 }
  0x5d   : > { %411 = vst.msk [vmem:[#allocation2 + $0x81] sm:$0xff] %vm309_vm0, %v378_v8 }
  0x5e   : > { %412 = vst.msk [vmem:[#allocation2 + $0x91] sm:$0xff] %vm309_vm0, %v379_v9 }
  0x5f   : > { %413 = vst.msk [vmem:[#allocation2 + $0x99] sm:$0xff] %vm309_vm0, %v380_v10 }
  0x60   : > { %414 = vst.msk [vmem:[#allocation2 + $0xa9] sm:$0xff] %vm309_vm0, %v381_v11 }
  0x61   : > { %415 = vst.msk [vmem:[#allocation2 + $0xb1] sm:$0xff] %vm309_vm0, %v382_v12 }
  0x62   : > { %416 = vst.msk [vmem:[#allocation2 + $0xc1] sm:$0xff] %vm309_vm0, %v383_v13 }
  0x63   : > { %417 = vst.msk [vmem:[#allocation2 + $0xc9] sm:$0xff] %vm309_vm0, %v384_v14 }
  0x64   : > { %418 = vst.msk [vmem:[#allocation2 + $0xd9] sm:$0xff] %vm309_vm0, %v385_v15 }
  0x65   : > { %419 = vst.msk [vmem:[#allocation2 + $0xe1] sm:$0xff] %vm309_vm0, %v386_v16 }
  0x66   : > { %420 = vst.msk [vmem:[#allocation2 + $0xf1] sm:$0xff] %vm309_vm0, %v387_v17 }
  0x67   : > { %421 = vst.msk [vmem:[#allocation2 + $0xf9] sm:$0xff] %vm309_vm0, %v388_v18 }
  0x68   : > { %422 = vst.msk [vmem:[#allocation2 + $0x109] sm:$0xff] %vm309_vm0, %v389_v19 }
  0x69   : > { %423 = vst.msk [vmem:[#allocation2 + $0x111] sm:$0xff] %vm309_vm0, %v390_v20 }
  0x6a   : > { %424 = vst.msk [vmem:[#allocation2 + $0x121] sm:$0xff] %vm309_vm0, %v391_v21 }
  0x6b   : > { %425 = vst.msk [vmem:[#allocation2 + $0x129] sm:$0xff] %vm309_vm0, %v392_v22 }
  0x6c   : > { %426 = vst.msk [vmem:[#allocation2 + $0x139] sm:$0xff] %vm309_vm0, %v393_v23 }
  0x6d   : > { %427 = vst.msk [vmem:[#allocation2 + $0x141] sm:$0xff] %vm309_vm0, %v394_v24 }
  0x6e   : > { %428 = vst.msk [vmem:[#allocation2 + $0x151] sm:$0xff] %vm309_vm0, %v395_v25 }
  0x6f   : > { %429 = vst.msk [vmem:[#allocation2 + $0x159] sm:$0xff] %vm309_vm0, %v396_v26 }
  0x70   : > { %430 = vst.msk [vmem:[#allocation2 + $0x169] sm:$0xff] %vm309_vm0, %v397_v27 }
  0x71   : > { %431 = vst.msk [vmem:[#allocation2 + $0x171] sm:$0xff] %vm309_vm0, %v398_v28 }
  0x72   : > { %432 = vst.msk [vmem:[#allocation2 + $0x181] sm:$0xff] %vm309_vm0, %v399_v29 }
  0x73   : > { %433 = vst.msk [vmem:[#allocation2 + $0x189] sm:$0xff] %vm309_vm0, %v400_v30 }
  0x74   : > { %434 = vst.msk [vmem:[#allocation2 + $0x199] sm:$0xff] %vm309_vm0, %v401_v31 }
  0x75   : > { %435 = vst.msk [vmem:[#allocation2 + $0x1a1] sm:$0xff] %vm309_vm0, %v402_v32 }
  0x76 PF: > { %s3309_s21 = smul.u32 192, %s3641_s24  ;;  %vm504_vm2 = vcmask 1046528   ;;  %s3660_s23 = smov 4   ;;  %vm615_vm3 = vcmask 1045504   ;;  %vm1346_vm4 = vcmask 1043456   ;;  %vm1112_vm5 = vcmask 31744  }
  0x77   : > { %s3661_s25 = smov 8   ;;  %s3662_s9 = smov 12   ;;  %vm1133_vm6 = vcmask 64512   ;;  %vm6556_vm7 = vcmask 97280   ;;  %vm1196_vm8 = vcmask 162816   ;;  %vm6555_vm9 = vcmask 130048  }
  0x78   : > { %s3945_s22 = scalar_lea.vmem [#allocation2], %s3309_s21  ;;  %s3663_s10 = smov 16   ;;  %vm1217_vm10 = vcmask 195584   ;;  %vm1259_vm11 = vcmask 261120   ;;  %vm1238_vm12 = vcmask 228352   ;;  %vm1285_vm13 = vcmask 293888  }
  0x79   : > { %s3664_s11 = smov 20   ;;  %s3665_s12 = smov 24  }
  0x7a   : > { %s3666_s13 = smov 32   ;;  %s3667_s15 = smov 28  }
  0x7b   : > { %s3351_s21 = sadd.s32 4294967295, %s3745_s8  ;;  %s3668_s8 = smov 2  }
  0x7c   : > { %v3948_v33 = vld [vmem:[%s3945_s22 + $0x30] sm:$0xff]  ;;  %v3951_v34 = vld [vmem:[%s3945_s22 + $0x38] sm:$0xff]  ;;  %v3959_v38 = vld [vmem:[%s3945_s22 + $0x20] sm:$0xff]  ;;  %s3670_s16 = smov 10  }
  0x7d   : > { %v3954_v35 = vld [vmem:[%s3945_s22 + $0x18] sm:$0xff]  ;;  %v515_v36 = vrot.slane %v3948_v33, 1  ;;  %v516_v37 = vrot.slane %v3951_v34, 1  ;;  %v3963_v40 = vld [vmem:[%s3945_s22] sm:$0xff]  ;;  %v3966_v41 = vld [vmem:[%s3945_s22 + $0x8] sm:$0xff]  ;;  %v511_v42 = vrot.slane %v3959_v38, 1 }
  0x7e   : > { %6557 = vst [vmem:[#allocation3_spill] sm:$0xff] %v3954_v35  ;;  %v510_v39 = vrot.slane %v3954_v35, 1  ;;  %v505_v43 = vrot.slane %v3963_v40, 1  ;;  %v506_v44 = vrot.slane %v3966_v41, 1  ;;  %v3972_v45 = vld [vmem:[%s3945_s22 + $0x40] sm:$0x3] }
  0x7f   : > { %6558 = vst [vmem:[#allocation4_spill] sm:$0xff] %v3966_v41  ;;  %v3975_v46 = vsel %vm504_vm2, %v515_v36, %v516_v37  ;;  %v3978_v47 = vld [vmem:[%s3945_s22 + $0x28] sm:$0x3]  ;;  %v3981_v48 = vld [vmem:[%s3945_s22 + $0x10] sm:$0x3]  ;;  %v518_v51 = vrot.slane %v3972_v45, 1 }
  0x80   : > { %563 = vrot.lane.b32.xlu2 %v3975_v46, %s3660_s23  ;;  %v3986_v49 = vsel %vm504_vm2, %v510_v39, %v511_v42  ;;  %v507_v50 = vsel %vm504_vm2, %v505_v43, %v506_v44  ;;  %v513_v52 = vrot.slane %v3978_v47, 1  ;;  %v508_v53 = vrot.slane %v3981_v48, 1  ;;  %v4003_v57 = vld [vmem:[%s3945_s22 + $0x60] sm:$0xff]  ;;  %v4006_v58 = vld [vmem:[%s3945_s22 + $0x68] sm:$0xff]  ;;  %v4009_v59 = vld [vmem:[%s3945_s22 + $0x50] sm:$0xff] }
  0x81   : > { %559 = vrot.lane.b32.xlu1 %v3986_v49, %s3660_s23  ;;  %555 = vrot.lane.b32.xlu0 %v507_v50, %s3660_s23  ;;  %v3996_v54 = vsel %vm504_vm2, %v516_v37, %v518_v51  ;;  %v4012_v60 = vld [vmem:[%s3945_s22 + $0x58] sm:$0x3]  ;;  %v4015_v61 = vld [vmem:[%s3945_s22 + $0x48] sm:$0xff]  ;;  %v525_v62 = vrot.slane %v4003_v57, 1  ;;  %v526_v63 = vrot.slane %v4006_v58, 1  ;;  %v521_v0 = vrot.slane %v4009_v59, 1 }
  0x82   : > { %v3999_v55 = vsel %vm504_vm2, %v511_v42, %v513_v52  ;;  %v509_v56 = vsel %vm504_vm2, %v506_v44, %v508_v53  ;;  %v523_v1 = vrot.slane %v4012_v60, 1  ;;  %v520_v2 = vrot.slane %v4015_v61, 1  ;;  %v4037_v6 = vld [vmem:[%s3945_s22 + $0x80] sm:$0xff]  ;;  %v4040_v7 = vld [vmem:[%s3945_s22 + $0x88] sm:$0x3]  ;;  %v4043_v8 = vld [vmem:[%s3945_s22 + $0x78] sm:$0xff] }
  0x83   : > { %v4028_v3 = vsel %vm504_vm2, %v525_v62, %v526_v63  ;;  %v4046_v9 = vld [vmem:[%s3945_s22 + $0x70] sm:$0x3]  ;;  %v531_v10 = vrot.slane %v4037_v6, 1  ;;  %v533_v11 = vrot.slane %v4040_v7, 1  ;;  %v530_v12 = vrot.slane %v4043_v8, 1  ;;  %v4068_v17 = vld [vmem:[%s3945_s22 + $0xa8] sm:$0xff] }
  0x84   : > { %v4031_v4 = vsel %vm504_vm2, %v521_v0, %v523_v1  ;;  %v4034_v5 = vsel %vm504_vm2, %v520_v2, %v521_v0  ;;  %v528_v13 = vrot.slane %v4046_v9, 1  ;;  %v4071_v18 = vld [vmem:[%s3945_s22 + $0xb0] sm:$0xff]  ;;  %v4074_v19 = vld [vmem:[%s3945_s22 + $0x98] sm:$0xff]  ;;  %v4077_v20 = vld [vmem:[%s3945_s22 + $0xa0] sm:$0x3]  ;;  %v540_v22 = vrot.slane %v4068_v17, 1 }
  0x85   : > { %v4059_v14 = vsel %vm504_vm2, %v531_v10, %v533_v11  ;;  %v4062_v15 = vsel %vm504_vm2, %v530_v12, %v531_v10  ;;  %v4080_v21 = vld [vmem:[%s3945_s22 + $0x90] sm:$0xff]  ;;  %v541_v23 = vrot.slane %v4071_v18, 1  ;;  %v536_v24 = vrot.slane %v4074_v19, 1  ;;  %v4103_v30 = vld [vmem:[%s3945_s22 + $0xc8] sm:$0xff]  ;;  %v4109_v32 = vld [vmem:[%s3945_s22 + $0xc0] sm:$0xff] }
  0x86   : > { %v4065_v16 = vsel %vm504_vm2, %v526_v63, %v528_v13  ;;  %v538_v25 = vrot.slane %v4077_v20, 1  ;;  %v535_v26 = vrot.slane %v4080_v21, 1  ;;  %v4106_v31 = vld [vmem:[%s3945_s22 + $0xd0] sm:$0x3]  ;;  %v4112_v36 = vld [vmem:[%s3945_s22 + $0xb8] sm:$0x3] }
  0x87   : > { %v4094_v27 = vsel %vm504_vm2, %v540_v22, %v541_v23  ;;  %v546_v37 = vrot.slane %v4103_v30, 1  ;;  %v548_v39 = vrot.slane %v4106_v31, 1  ;;  %v545_v42 = vrot.slane %v4109_v32, 1  ;;  %v4134_v52 = vld [vmem:[%s3945_s22 + $0xe0] sm:$0xff]  ;;  %v4137_v53 = vld [vmem:[%s3945_s22 + $0xe8] sm:$0x3] }
  0x88   : > { %565 = vrot.lane.b32.xlu2 %v3996_v54, %s3660_s23  ;;  %v4097_v28 = vsel %vm504_vm2, %v536_v24, %v538_v25  ;;  %v4100_v29 = vsel %vm504_vm2, %v535_v26, %v536_v24  ;;  %v543_v43 = vrot.slane %v4112_v36, 1  ;;  %v616_v62 = vrot.slane %v3963_v40, 2 }
  0x89   : > { %561 = vrot.lane.b32.xlu1 %v3999_v55, %s3660_s23  ;;  %557 = vrot.lane.b32.xlu0 %v509_v56, %s3660_s23  ;;  %v4125_v44 = vsel %vm504_vm2, %v546_v37, %v548_v39  ;;  %v4128_v50 = vsel %vm504_vm2, %v545_v42, %v546_v37  ;;  %v4140_v56 = vld [vmem:[%s3945_s22 + $0xd8] sm:$0xff]  ;;  %v617_v63 = vrot.slane %v3966_v41, 2  ;;  %v551_v0 = vrot.slane %v4134_v52, 1 }
  0x8a   : > { %v4131_v51 = vsel %vm504_vm2, %v541_v23, %v543_v43  ;;  %v553_v1 = vrot.slane %v4137_v53, 1  ;;  %v550_v2 = vrot.slane %v4140_v56, 1  ;;  %v622_v13 = vrot.slane %v3959_v38, 2 }
  0x8b   : > { %v618_v10 = vsel %vm615_vm3, %v616_v62, %v617_v63  ;;  %v624_v22 = vrot.slane %v3978_v47, 2  ;;  %v621_v23 = vrot.slane %v3954_v35, 2  ;;  %v619_v24 = vrot.slane %v3981_v48, 2 }
  0x8c   : > { %v4155_v11 = vsel %vm504_vm2, %v551_v0, %v553_v1  ;;  %v4158_v12 = vsel %vm504_vm2, %v550_v2, %v551_v0  ;;  %v631_v47 = vrot.slane %v4015_v61, 2  ;;  %v632_v48 = vrot.slane %v4009_v59, 2 }
  0x8d   : > { %v4170_v25 = vsel %vm615_vm3, %v622_v13, %v624_v22  ;;  %v4173_v26 = vsel %vm615_vm3, %v621_v23, %v622_v13  ;;  %v620_v37 = vsel %vm615_vm3, %v617_v63, %v619_v24  ;;  %v627_v39 = vrot.slane %v3951_v34, 2 }
  0x8e   : > { %v629_v42 = vrot.slane %v3972_v45, 2  ;;  %v626_v43 = vrot.slane %v3948_v33, 2  ;;  %v4187_v62 = vsel %vm615_vm3, %v631_v47, %v632_v48  ;;  %v637_v45 = vrot.slane %v4006_v58, 2 }
  0x8f   : > { %v639_v1 = vrot.slane %v4046_v9, 2  ;;  %v636_v2 = vrot.slane %v4003_v57, 2  ;;  %v647_v9 = vrot.slane %v4074_v19, 2  ;;  %v642_v24 = vrot.slane %v4037_v6, 2 }
  0x90   : > { %571 = vrot.lane.b32.xlu2 %v4028_v3, %s3660_s23  ;;  %v4190_v63 = vsel %vm615_vm3, %v627_v39, %v629_v42  ;;  %v4193_v0 = vsel %vm615_vm3, %v626_v43, %v627_v39  ;;  %v641_v47 = vrot.slane %v4043_v8, 2  ;;  %v654_v43 = vrot.slane %v4112_v36, 2 }
  0x91   : > { %569 = vrot.lane.b32.xlu1 %v4031_v4, %s3660_s23  ;;  %567 = vrot.lane.b32.xlu0 %v4034_v5, %s3660_s23  ;;  %v4206_v13 = vsel %vm615_vm3, %v637_v45, %v639_v1  ;;  %v4209_v22 = vsel %vm615_vm3, %v636_v2, %v637_v45  ;;  %v651_v45 = vrot.slane %v4068_v17, 2  ;;  %v649_v1 = vrot.slane %v4077_v20, 2 }
  0x92   : > { %v4232_v42 = vsel %vm615_vm3, %v641_v47, %v642_v24  ;;  %v661_v20 = vrot.slane %v4140_v56, 2  ;;  %v662_v36 = vrot.slane %v4134_v52, 2  ;;  %v656_v47 = vrot.slane %v4109_v32, 2 }
  0x98   : > { %577 = vrot.lane.b32.xlu2 %v4059_v14, %s3660_s23 }
  0x99   : > { %575 = vrot.lane.b32.xlu1 %v4062_v15, %s3660_s23  ;;  %573 = vrot.lane.b32.xlu0 %v4065_v16, %s3660_s23 }
  0xa0   : > { %583 = vrot.lane.b32.xlu2 %v4094_v27, %s3660_s23 }
  0xa1   : > { %581 = vrot.lane.b32.xlu1 %v4097_v28, %s3660_s23  ;;  %579 = vrot.lane.b32.xlu0 %v4100_v29, %s3660_s23 }
  0xa8   : > { %589 = vrot.lane.b32.xlu2 %v4125_v44, %s3660_s23 }
  0xa9   : > { %587 = vrot.lane.b32.xlu1 %v4128_v50, %s3660_s23  ;;  %585 = vrot.lane.b32.xlu0 %v4131_v51, %s3660_s23 }
  0xb0   : > { %666 = vrot.lane.b32.xlu2 %v618_v10, %s3661_s25  ;;  %v634_v10 = vrot.slane %v4012_v60, 2  ;;  %v646_v60 = vrot.slane %v4080_v21, 2 }
  0xb1   : > { %593 = vrot.lane.b32.xlu1 %v4155_v11, %s3660_s23  ;;  %591 = vrot.lane.b32.xlu0 %v4158_v12, %s3660_s23 }
  0xb2   : > { %v4212_v23 = vsel %vm615_vm3, %v632_v48, %v634_v10  ;;  %v4226_v48 = vsel %vm615_vm3, %v646_v60, %v647_v9  ;;  %v4251_v60 = vsel %vm615_vm3, %v647_v9, %v649_v1  ;;  %v659_v9 = vrot.slane %v4106_v31, 2 }
  0xb3   : > { %v664_v1 = vrot.slane %v4137_v53, 2 }
  0xb8   : > { %672 = vrot.lane.b32.xlu2 %v4170_v25, %s3661_s25 }
  0xb9   : > { %670 = vrot.lane.b32.xlu1 %v4173_v26, %s3661_s25  ;;  %668 = vrot.lane.b32.xlu0 %v620_v37, %s3661_s25  ;;  %v644_v37 = vrot.slane %v4040_v7, 2  ;;  %v652_v7 = vrot.slane %v4071_v18, 2 }
  0xbb   : > { %v4229_v39 = vsel %vm615_vm3, %v642_v24, %v644_v37  ;;  %v4245_v2 = vsel %vm615_vm3, %v652_v7, %v654_v43  ;;  %v4248_v10 = vsel %vm615_vm3, %v651_v45, %v652_v7  ;;  %v657_v37 = vrot.slane %v4103_v30, 2 }
  0xbc   : > { %v4267_v7 = vsel %vm615_vm3, %v661_v20, %v662_v36  ;;  %v4285_v20 = vsel %vm615_vm3, %v662_v36, %v664_v1 }
  0xbd   : > { %v4270_v43 = vsel %vm615_vm3, %v657_v37, %v659_v9  ;;  %v4273_v45 = vsel %vm615_vm3, %v656_v47, %v657_v37 }
  0xc0   : > { %678 = vrot.lane.b32.xlu2 %v4187_v62, %s3661_s25 }
  0xc1   : > { %676 = vrot.lane.b32.xlu1 %v4190_v63, %s3661_s25  ;;  %674 = vrot.lane.b32.xlu0 %v4193_v0, %s3661_s25 }
  0xc8   : > { %684 = vrot.lane.b32.xlu2 %v4206_v13, %s3661_s25 }
  0xc9   : > { %682 = vrot.lane.b32.xlu1 %v4209_v22, %s3661_s25  ;;  %680 = vrot.lane.b32.xlu0 %v4212_v23, %s3661_s25 }
  0xd0   : > { %690 = vrot.lane.b32.xlu2 %v4226_v48, %s3661_s25 }
  0xd1   : > { %688 = vrot.lane.b32.xlu1 %v4229_v39, %s3661_s25  ;;  %686 = vrot.lane.b32.xlu0 %v4232_v42, %s3661_s25 }
  0xd8   : > { %696 = vrot.lane.b32.xlu2 %v4245_v2, %s3661_s25 }
  0xd9   : > { %694 = vrot.lane.b32.xlu1 %v4248_v10, %s3661_s25  ;;  %692 = vrot.lane.b32.xlu0 %v4251_v60, %s3661_s25 }
  0xda   : > { %v4261_v24 = vpop.permute.xlu2 %563 }
  0xdb   : > { %6559 = vst [vmem:[#allocation5_spill] sm:$0xff] %v4261_v24 }
  0xe0   : > { %702 = vrot.lane.b32.xlu2 %v4267_v7, %s3661_s25 }
  0xe1   : > { %700 = vrot.lane.b32.xlu1 %v4270_v43, %s3661_s25  ;;  %698 = vrot.lane.b32.xlu0 %v4273_v45, %s3661_s25 }
  0xe2   : > { %v4281_v31 = vpop.permute.xlu2 %565 }
  0xe3   : > { %6560 = vst [vmem:[#allocation6_spill] sm:$0xff] %v4281_v31 }
  0xe8   : > { %730 = vrot.lane.b32.xlu2 %v3959_v38, %s3662_s9 }
  0xe9   : > { %728 = vrot.lane.b32.xlu1 %v3954_v35, %s3662_s9  ;;  %704 = vrot.lane.b32.xlu0 %v4285_v20, %s3661_s25  ;;  %v4356_v35 = vld [vmem:[%s3945_s22 + $0xf8] sm:$0xff] }
  0xea   : > { %v4293_v37 = vpop.permute.xlu2 %571 }
  0xeb   : > { %6561 = vst [vmem:[#allocation7_spill] sm:$0xff] %v4293_v37 }
  0xf0   : > { %736 = vrot.lane.b32.xlu2 %v4015_v61, %s3662_s9 }
  0xf1   : > { %734 = vrot.lane.b32.xlu1 %v3951_v34, %s3662_s9  ;;  %732 = vrot.lane.b32.xlu0 %v3948_v33, %s3662_s9 }
  0xf2   : > { %v4301_v53 = vpop.permute.xlu2 %577 }
  0xf3   : > { %6562 = vst [vmem:[#allocation8_spill] sm:$0xff] %v4301_v53  ;;  %v4303_v38 = vpop.permute.xlu1 %559  ;;  %v4305_v36 = vpop.permute.xlu0 %555 }
  0xf4   : > { %6563 = vst [vmem:[#allocation9_spill] sm:$0xff] %v4303_v38 }
  0xf8   : > { %742 = vrot.lane.b32.xlu2 %v4006_v58, %s3662_s9 }
  0xf9   : > { %740 = vrot.lane.b32.xlu1 %v4003_v57, %s3662_s9  ;;  %738 = vrot.lane.b32.xlu0 %v4009_v59, %s3662_s9 }
  0xfa   : > { %v4313_v9 = vpop.permute.xlu2 %583 }
  0xfb   : > { %6564 = vst [vmem:[#allocation10_spill] sm:$0xff] %v4313_v9  ;;  %v4315_v47 = vpop.permute.xlu1 %561  ;;  %v4317_v1 = vpop.permute.xlu0 %557 }
  0xfc   : > { %6565 = vst [vmem:[#allocation11_spill] sm:$0xff] %v4315_v47 }
  0xfd   : > { %6566 = vst [vmem:[#allocation12_spill] sm:$0xff] %v4317_v1 }
 0x100   : > { %748 = vrot.lane.b32.xlu2 %v4080_v21, %s3662_s9 }
 0x101   : > { %746 = vrot.lane.b32.xlu1 %v4037_v6, %s3662_s9  ;;  %744 = vrot.lane.b32.xlu0 %v4043_v8, %s3662_s9 }
 0x102   : > { %v4325_v37 = vpop.permute.xlu2 %589 }
 0x103   : > { %6567 = vst [vmem:[#allocation13_spill] sm:$0xff] %v4325_v37  ;;  %v4327_v31 = vpop.permute.xlu1 %569  ;;  %v4329_v9 = vpop.permute.xlu0 %567 }
 0x104   : > { %6568 = vst [vmem:[#allocation14_spill] sm:$0xff] %v4327_v31 }
 0x105   : > { %6569 = vst [vmem:[#allocation15_spill] sm:$0xff] %v4329_v9 }
 0x108   : > { %754 = vrot.lane.b32.xlu2 %v4071_v18, %s3662_s9 }
 0x109   : > { %752 = vrot.lane.b32.xlu1 %v4068_v17, %s3662_s9  ;;  %750 = vrot.lane.b32.xlu0 %v4074_v19, %s3662_s9 }
 0x10a   : > { %v4337_v24 = vpop.permute.xlu2 %666 }
 0x10b   : > { %v4339_v53 = vpop.permute.xlu1 %575  ;;  %v4341_v47 = vpop.permute.xlu0 %573 }
 0x10c   : > { %6570 = vst [vmem:[#allocation16_spill] sm:$0xff] %v4339_v53  ;;  %v4359_v53 = vld [vmem:[%s3945_s22 + $0xf0] sm:$0xff] }
 0x10d   : > { %6571 = vst [vmem:[#allocation17_spill] sm:$0xff] %v4341_v47 }
 0x110   : > { %760 = vrot.lane.b32.xlu2 %v4140_v56, %s3662_s9 }
 0x111   : > { %758 = vrot.lane.b32.xlu1 %v4103_v30, %s3662_s9  ;;  %756 = vrot.lane.b32.xlu0 %v4109_v32, %s3662_s9 }
 0x112   : > { %v4349_v37 = vpop.permute.xlu2 %672 }
 0x113   : > { %6572 = vst [vmem:[#allocation18_spill] sm:$0xff] %v4349_v37  ;;  %v4351_v31 = vpop.permute.xlu1 %581  ;;  %v4353_v9 = vpop.permute.xlu0 %579 }
 0x114   : > { %6573 = vst [vmem:[#allocation19_spill] sm:$0xff] %v4351_v31 }
 0x115   : > { %6574 = vst [vmem:[#allocation20_spill] sm:$0xff] %v4353_v9 }
 0x118   : > { %766 = vrot.lane.b32.xlu2 %v4356_v35, %s3662_s9 }
 0x119   : > { %764 = vrot.lane.b32.xlu1 %v4359_v53, %s3662_s9  ;;  %762 = vrot.lane.b32.xlu0 %v4134_v52, %s3662_s9 }
 0x11a   : > { %v4367_v38 = vpop.permute.xlu2 %678 }
 0x11b   : > { %6575 = vst [vmem:[#allocation21_spill] sm:$0xff] %v4367_v38  ;;  %v4369_v37 = vpop.permute.xlu1 %587  ;;  %v4371_v31 = vpop.permute.xlu0 %585 }
 0x11c   : > { %6576 = vst [vmem:[#allocation22_spill] sm:$0xff] %v4369_v37 }
 0x11d   : > { %6577 = vst [vmem:[#allocation23_spill] sm:$0xff] %v4371_v31 }
 0x120   : > { %798 = vrot.lane.b32.xlu2 %v3975_v46, %s3663_s10 }
 0x121   : > { %796 = vrot.lane.b32.xlu1 %v3999_v55, %s3663_s10  ;;  %794 = vrot.lane.b32.xlu0 %v3986_v49, %s3663_s10 }
 0x122   : > { %v4379_v9 = vpop.permute.xlu2 %684 }
 0x123   : > { %6578 = vst [vmem:[#allocation24_spill] sm:$0xff] %v4379_v9  ;;  %v4381_v47 = vpop.permute.xlu1 %593  ;;  %v4383_v41 = vpop.permute.xlu0 %591 }
 0x124   : > { %6579 = vst [vmem:[#allocation25_spill] sm:$0xff] %v4381_v47 }
 0x125   : > { %6580 = vst [vmem:[#allocation26_spill] sm:$0xff] %v4383_v41 }
 0x128   : > { %804 = vrot.lane.b32.xlu2 %v4031_v4, %s3663_s10 }
 0x129   : > { %802 = vrot.lane.b32.xlu1 %v4034_v5, %s3663_s10  ;;  %800 = vrot.lane.b32.xlu0 %v3996_v54, %s3663_s10 }
 0x12a   : > { %v4391_v37 = vpop.permute.xlu2 %690 }
 0x12b   : > { %6581 = vst [vmem:[#allocation27_spill] sm:$0xff] %v4391_v37  ;;  %v4393_v55 = vpop.permute.xlu1 %670  ;;  %v4395_v49 = vpop.permute.xlu0 %668 }
 0x12c   : > { %6582 = vst [vmem:[#allocation28_spill] sm:$0xff] %v4393_v55 }
 0x12d   : > { %6583 = vst [vmem:[#allocation29_spill] sm:$0xff] %v4395_v49 }
 0x130   : > { %810 = vrot.lane.b32.xlu2 %v4062_v15, %s3663_s10 }
 0x131   : > { %808 = vrot.lane.b32.xlu1 %v4065_v16, %s3663_s10  ;;  %806 = vrot.lane.b32.xlu0 %v4028_v3, %s3663_s10 }
 0x132   : > { %v4403_v47 = vpop.permute.xlu2 %696 }
 0x133   : > { %6584 = vst [vmem:[#allocation30_spill] sm:$0xff] %v4403_v47  ;;  %v4405_v41 = vpop.permute.xlu1 %676  ;;  %v4407_v31 = vpop.permute.xlu0 %674 }
 0x134   : > { %6585 = vst [vmem:[#allocation31_spill] sm:$0xff] %v4405_v41 }
 0x135   : > { %6586 = vst [vmem:[#allocation32_spill] sm:$0xff] %v4407_v31 }
 0x138   : > { %816 = vrot.lane.b32.xlu2 %v4097_v28, %s3663_s10 }
 0x139   : > { %814 = vrot.lane.b32.xlu1 %v4100_v29, %s3663_s10  ;;  %812 = vrot.lane.b32.xlu0 %v4059_v14, %s3663_s10 }
 0x13a   : > { %v4415_v38 = vpop.permute.xlu2 %702 }
 0x13b   : > { %6587 = vst [vmem:[#allocation33_spill] sm:$0xff] %v4415_v38  ;;  %v4417_v37 = vpop.permute.xlu1 %682  ;;  %v4419_v55 = vpop.permute.xlu0 %680  ;;  %v470_v38 = vld [vmem:[%s3945_s22 + $0x100] sm:$0x3] }
 0x13c   : > { %6588 = vst [vmem:[#allocation34_spill] sm:$0xff] %v4417_v37  ;;  %v792_v9 = vrot.slane %v470_v38, 1 }
 0x13d   : > { %6589 = vst [vmem:[#allocation35_spill] sm:$0xff] %v4419_v55  ;;  %v790_v55 = vrot.slane %v4356_v35, 1 }
 0x13f   : > { %v4449_v49 = vsel %vm504_vm2, %v790_v55, %v792_v9 }
 0x140   : > { %822 = vrot.lane.b32.xlu2 %v4128_v50, %s3663_s10 }
 0x141   : > { %820 = vrot.lane.b32.xlu1 %v4131_v51, %s3663_s10  ;;  %818 = vrot.lane.b32.xlu0 %v4094_v27, %s3663_s10 }
 0x142   : > { %v4427_v47 = vpop.permute.xlu2 %730 }
 0x143   : > { %6590 = vst [vmem:[#allocation36_spill] sm:$0xff] %v4427_v47  ;;  %v4429_v41 = vpop.permute.xlu1 %688  ;;  %v4431_v31 = vpop.permute.xlu0 %686  ;;  %v789_v47 = vrot.slane %v4359_v53, 1 }
 0x144   : > { %6591 = vst [vmem:[#allocation37_spill] sm:$0xff] %v4429_v41 }
 0x145   : > { %6592 = vst [vmem:[#allocation38_spill] sm:$0xff] %v4431_v31  ;;  %v4452_v1 = vsel %vm504_vm2, %v789_v47, %v790_v55 }
 0x148   : > { %828 = vrot.lane.b32.xlu2 %v4155_v11, %s3663_s10 }
 0x149   : > { %826 = vrot.lane.b32.xlu1 %v4158_v12, %s3663_s10  ;;  %824 = vrot.lane.b32.xlu0 %v4125_v44, %s3663_s10 }
 0x14a   : > { %v4440_v37 = vpop.permute.xlu2 %736 }
 0x14b   : > { %6593 = vst [vmem:[#allocation39_spill] sm:$0xff] %v4440_v37  ;;  %v4444_v41 = vpop.permute.xlu1 %694  ;;  %v4446_v31 = vpop.permute.xlu0 %692 }
 0x14c   : > { %6594 = vst [vmem:[#allocation40_spill] sm:$0xff] %v4444_v41 }
 0x14d   : > { %6595 = vst [vmem:[#allocation41_spill] sm:$0xff] %v4446_v31 }
 0x150   : > { %859 = vrot.lane.b32.xlu2 %v4173_v26, %s3664_s11 }
 0x151   : > { %832 = vrot.lane.b32.xlu1 %v4449_v49, %s3663_s10  ;;  %830 = vrot.lane.b32.xlu0 %v4452_v1, %s3663_s10 }
 0x152   : > { %v4460_v37 = vpop.permute.xlu2 %742 }
 0x153   : > { %6596 = vst [vmem:[#allocation42_spill] sm:$0xff] %v4460_v37  ;;  %v4462_v41 = vpop.permute.xlu1 %700  ;;  %v4464_v31 = vpop.permute.xlu0 %698 }
 0x154   : > { %6597 = vst [vmem:[#allocation43_spill] sm:$0xff] %v4462_v41 }
 0x155   : > { %6598 = vst [vmem:[#allocation44_spill] sm:$0xff] %v4464_v31 }
 0x158   : > { %865 = vrot.lane.b32.xlu2 %v4190_v63, %s3664_s11 }
 0x159   : > { %863 = vrot.lane.b32.xlu1 %v4193_v0, %s3664_s11  ;;  %861 = vrot.lane.b32.xlu0 %v4170_v25, %s3664_s11 }
 0x15a   : > { %v4472_v26 = vpop.permute.xlu2 %748 }
 0x15b   : > { %6599 = vst [vmem:[#allocation45_spill] sm:$0xff] %v4472_v26  ;;  %v4474_v9 = vpop.permute.xlu1 %728  ;;  %v4476_v47 = vpop.permute.xlu0 %704 }
 0x15c   : > { %6600 = vst [vmem:[#allocation46_spill] sm:$0xff] %v4474_v9  ;;  %v857_v9 = vrot.slane %v470_v38, 2 }
 0x15d   : > { %6601 = vst [vmem:[#allocation47_spill] sm:$0xff] %v4476_v47 }
 0x160   : > { %871 = vrot.lane.b32.xlu2 %v4209_v22, %s3664_s11 }
 0x161   : > { %869 = vrot.lane.b32.xlu1 %v4212_v23, %s3664_s11  ;;  %867 = vrot.lane.b32.xlu0 %v4187_v62, %s3664_s11 }
 0x162   : > { %v4484_v55 = vpop.permute.xlu2 %754 }
 0x163   : > { %6602 = vst [vmem:[#allocation48_spill] sm:$0xff] %v4484_v55  ;;  %v4486_v41 = vpop.permute.xlu1 %734  ;;  %v4488_v25 = vpop.permute.xlu0 %732 }
 0x164   : > { %6603 = vst [vmem:[#allocation49_spill] sm:$0xff] %v4486_v41 }
 0x165   : > { %6604 = vst [vmem:[#allocation50_spill] sm:$0xff] %v4488_v25 }
 0x168   : > { %877 = vrot.lane.b32.xlu2 %v4229_v39, %s3664_s11 }
 0x169   : > { %875 = vrot.lane.b32.xlu1 %v4232_v42, %s3664_s11  ;;  %873 = vrot.lane.b32.xlu0 %v4206_v13, %s3664_s11 }
 0x16a   : > { %v4496_v47 = vpop.permute.xlu2 %760 }
 0x16b   : > { %6605 = vst [vmem:[#allocation51_spill] sm:$0xff] %v4496_v47  ;;  %v4498_v31 = vpop.permute.xlu1 %740  ;;  %v4500_v37 = vpop.permute.xlu0 %738  ;;  %v854_v47 = vrot.slane %v4359_v53, 2 }
 0x16c   : > { %6606 = vst [vmem:[#allocation52_spill] sm:$0xff] %v4498_v31  ;;  %v855_v31 = vrot.slane %v4356_v35, 2 }
 0x16d   : > { %6607 = vst [vmem:[#allocation53_spill] sm:$0xff] %v4500_v37 }
 0x170   : > { %883 = vrot.lane.b32.xlu2 %v4248_v10, %s3664_s11 }
 0x171   : > { %881 = vrot.lane.b32.xlu1 %v4251_v60, %s3664_s11  ;;  %879 = vrot.lane.b32.xlu0 %v4226_v48, %s3664_s11 }
 0x172   : > { %v4508_v55 = vpop.permute.xlu2 %766 }
 0x173   : > { %6608 = vst [vmem:[#allocation54_spill] sm:$0xff] %v4508_v55  ;;  %v4510_v41 = vpop.permute.xlu1 %746  ;;  %v4512_v26 = vpop.permute.xlu0 %744 }
 0x174   : > { %6609 = vst [vmem:[#allocation55_spill] sm:$0xff] %v4510_v41 }
 0x175   : > { %6610 = vst [vmem:[#allocation56_spill] sm:$0xff] %v4512_v26  ;;  %v4529_v26 = vsel %vm615_vm3, %v854_v47, %v855_v31 }
 0x178   : > { %889 = vrot.lane.b32.xlu2 %v4270_v43, %s3664_s11 }
 0x179   : > { %887 = vrot.lane.b32.xlu1 %v4273_v45, %s3664_s11  ;;  %885 = vrot.lane.b32.xlu0 %v4245_v2, %s3664_s11 }
 0x17a   : > { %v4522_v37 = vpop.permute.xlu2 %798 }
 0x17b   : > { %6611 = vst [vmem:[#allocation57_spill] sm:$0xff] %v4522_v37  ;;  %v4524_v55 = vpop.permute.xlu1 %752  ;;  %v4526_v25 = vpop.permute.xlu0 %750 }
 0x17c   : > { %6612 = vst [vmem:[#allocation58_spill] sm:$0xff] %v4524_v55 }
 0x17d   : > { %6613 = vst [vmem:[#allocation59_spill] sm:$0xff] %v4526_v25  ;;  %v4544_v25 = vsel %vm615_vm3, %v855_v31, %v857_v9 }
 0x180   : > { %895 = vrot.lane.b32.xlu2 %v4529_v26, %s3664_s11 }
 0x181   : > { %893 = vrot.lane.b32.xlu1 %v4285_v20, %s3664_s11  ;;  %891 = vrot.lane.b32.xlu0 %v4267_v7, %s3664_s11 }
 0x182   : > { %v4537_v41 = vpop.permute.xlu2 %804 }
 0x183   : > { %v4539_v37 = vpop.permute.xlu1 %758  ;;  %v4541_v55 = vpop.permute.xlu0 %756 }
 0x184   : > { %6614 = vst [vmem:[#allocation60_spill] sm:$0xff] %v4539_v37 }
 0x188   : > { %923 = vrot.lane.b32.xlu2 %v3951_v34, %s3665_s12 }
 0x189   : > { %921 = vrot.lane.b32.xlu1 %v3948_v33, %s3665_s12  ;;  %897 = vrot.lane.b32.xlu0 %v4544_v25, %s3664_s11  ;;  %s3669_s11 = smov 6  }
 0x18a   : > { %v4552_v47 = vpop.permute.xlu2 %810 }
 0x18b   : > { %6615 = vst [vmem:[#allocation61_spill] sm:$0xff] %v4552_v47  ;;  %v4554_v38 = vpop.permute.xlu1 %764  ;;  %v4556_v37 = vpop.permute.xlu0 %762 }
 0x18c   : > { %6616 = vst [vmem:[#allocation62_spill] sm:$0xff] %v4554_v38 }
 0x18d   : > { %6617 = vst [vmem:[#allocation63_spill] sm:$0xff] %v4556_v37 }
 0x190   : > { %929 = vrot.lane.b32.xlu2 %v4003_v57, %s3665_s12 }
 0x191   : > { %927 = vrot.lane.b32.xlu1 %v4009_v59, %s3665_s12  ;;  %925 = vrot.lane.b32.xlu0 %v4015_v61, %s3665_s12 }
 0x192   : > { %v4564_v34 = vpop.permute.xlu2 %816 }
 0x193   : > { %v4566_v33 = vpop.permute.xlu1 %796  ;;  %v4568_v31 = vpop.permute.xlu0 %794 }
 0x198   : > { %935 = vrot.lane.b32.xlu2 %v4037_v6, %s3665_s12 }
 0x199   : > { %933 = vrot.lane.b32.xlu1 %v4043_v8, %s3665_s12  ;;  %931 = vrot.lane.b32.xlu0 %v4006_v58, %s3665_s12 }
 0x19a   : > { %v4576_v57 = vpop.permute.xlu2 %822 }
 0x19b   : > { %v4578_v59 = vpop.permute.xlu1 %802  ;;  %v4580_v61 = vpop.permute.xlu0 %800 }
 0x1a0   : > { %941 = vrot.lane.b32.xlu2 %v4068_v17, %s3665_s12 }
 0x1a1   : > { %939 = vrot.lane.b32.xlu1 %v4074_v19, %s3665_s12  ;;  %937 = vrot.lane.b32.xlu0 %v4080_v21, %s3665_s12 }
 0x1a2   : > { %v4588_v9 = vpop.permute.xlu2 %828 }
 0x1a3   : > { %6618 = vst [vmem:[#allocation64_spill] sm:$0xff] %v4588_v9  ;;  %v4590_v38 = vpop.permute.xlu1 %808  ;;  %v4592_v37 = vpop.permute.xlu0 %806  ;;  %v473_v9 = vld [vmem:[%s3945_s22 + $0x118] sm:$0x3] }
 0x1a8   : > { %947 = vrot.lane.b32.xlu2 %v4103_v30, %s3665_s12 }
 0x1a9   : > { %945 = vrot.lane.b32.xlu1 %v4109_v32, %s3665_s12  ;;  %943 = vrot.lane.b32.xlu0 %v4071_v18, %s3665_s12 }
 0x1aa   : > { %v4600_v17 = vpop.permute.xlu2 %859 }
 0x1ab   : > { %v4602_v19 = vpop.permute.xlu1 %814  ;;  %v4604_v47 = vpop.permute.xlu0 %812 }
 0x1b0   : > { %949 = vrot.lane.b32.xlu2 %v4140_v56, %s3665_s12 }
 0x1b1   : > { %1052 = vrot.lane.b32.xlu1 %v4193_v0, %s3666_s13  ;;  %987 = vrot.lane.b32.xlu0 %v3975_v46, %s3667_s15 }
 0x1b2   : > { %v4612_v30 = vpop.permute.xlu2 %865 }
 0x1b3   : > { %v4614_v18 = vpop.permute.xlu1 %820  ;;  %v4616_v32 = vpop.permute.xlu0 %818 }
 0x1b8   : > { %1005 = vrot.lane.b32.xlu2 %v4097_v28, %s3667_s15 }
 0x1b9   : > { %1054 = vrot.lane.b32.xlu1 %v4190_v63, %s3666_s13  ;;  %989 = vrot.lane.b32.xlu0 %v3996_v54, %s3667_s15 }
 0x1ba   : > { %v4624_v56 = vpop.permute.xlu2 %871 }
 0x1bb   : > { %v4626_v0 = vpop.permute.xlu1 %826  ;;  %v4628_v46 = vpop.permute.xlu0 %824 }
 0x1bc   : > { %6619 = vst [vmem:[#allocation65_spill] sm:$0xff] %v4626_v0 }
 0x1c0   : > { %1056 = vrot.lane.b32.xlu2 %v4187_v62, %s3666_s13 }
 0x1c1   : > { %991 = vrot.lane.b32.xlu1 %v4034_v5, %s3667_s15  ;;  %1070 = vrot.lane.b32.xlu0 %v4251_v60, %s3666_s13 }
 0x1c2   : > { %v4636_v28 = vpop.permute.xlu2 %877 }
 0x1c3   : > { %v4638_v63 = vpop.permute.xlu1 %832  ;;  %v4640_v54 = vpop.permute.xlu0 %830 }
 0x1c4   : > { %6620 = vst [vmem:[#allocation66_spill] sm:$0xff] %v4638_v63  ;;  %v1284_v63 = vld [vmem:[%s6546_s1 + $0x20] sm:$0xf] }
 0x1c5   : > { %6621 = vst [vmem:[#allocation67_spill] sm:$0xff] %v4640_v54  ;;  %3310 = vmatpush.msk.msra.mxu0 %vm1346_vm4, %v1284_v63  ;;  %3390 = vmatpush.msk.msra.mxu2 %vm1346_vm4, %v1284_v63 }
 0x1c6   : > { %3391 = vmatpush.msk.msra.mxu3 %vm1346_vm4, %v1284_v63 }
 0x1c8   : > { %993 = vrot.lane.b32.xlu2 %v4031_v4, %s3667_s15 }
 0x1c9   : > { %1072 = vrot.lane.b32.xlu1 %v4248_v10, %s3666_s13  ;;  %1007 = vrot.lane.b32.xlu0 %v4094_v27, %s3667_s15 }
 0x1ca   : > { %v4648_v62 = vpop.permute.xlu2 %883 }
 0x1cb   : > { %v4650_v5 = vpop.permute.xlu1 %863  ;;  %v4652_v60 = vpop.permute.xlu0 %861 }
 0x1d0   : > { %1074 = vrot.lane.b32.xlu2 %v4245_v2, %s3666_s13 }
 0x1d1   : > { %1009 = vrot.lane.b32.xlu1 %v4131_v51, %s3667_s15  ;;  %1058 = vrot.lane.b32.xlu0 %v4212_v23, %s3666_s13 }
 0x1d2   : > { %v4660_v4 = vpop.permute.xlu2 %889 }
 0x1d3   : > { %v4662_v10 = vpop.permute.xlu1 %869  ;;  %v4664_v27 = vpop.permute.xlu0 %867 }
 0x1d8   : > { %1011 = vrot.lane.b32.xlu2 %v4128_v50, %s3667_s15 }
 0x1d9   : > { %1060 = vrot.lane.b32.xlu1 %v4209_v22, %s3666_s13  ;;  %995 = vrot.lane.b32.xlu0 %v4028_v3, %s3667_s15 }
 0x1da   : > { %v4672_v2 = vpop.permute.xlu2 %895 }
 0x1db   : > { %6622 = vst [vmem:[#allocation68_spill] sm:$0xff] %v4672_v2  ;;  %v4674_v51 = vpop.permute.xlu1 %875  ;;  %v4676_v23 = vpop.permute.xlu0 %873  ;;  %v472_v2 = vld [vmem:[%s3945_s22 + $0x110] sm:$0xff] }
 0x1dc   : > { %6623 = vst [vmem:[#allocation69_spill] sm:$0xff] %v4674_v51 }
 0x1e0   : > { %1062 = vrot.lane.b32.xlu2 %v4206_v13, %s3666_s13 }
 0x1e1   : > { %997 = vrot.lane.b32.xlu1 %v4065_v16, %s3667_s15  ;;  %1076 = vrot.lane.b32.xlu0 %v4273_v45, %s3666_s13 }
 0x1e2   : > { %v4684_v50 = vpop.permute.xlu2 %923 }
 0x1e3   : > { %v4686_v22 = vpop.permute.xlu1 %881  ;;  %v4688_v3 = vpop.permute.xlu0 %879 }
 0x1e8   : > { %999 = vrot.lane.b32.xlu2 %v4062_v15, %s3667_s15 }
 0x1e9   : > { %1078 = vrot.lane.b32.xlu1 %v4270_v43, %s3666_s13  ;;  %1013 = vrot.lane.b32.xlu0 %v4125_v44, %s3667_s15 }
 0x1ea   : > { %v4696_v13 = vpop.permute.xlu2 %929 }
 0x1eb   : > { %v4698_v16 = vpop.permute.xlu1 %887  ;;  %v4700_v45 = vpop.permute.xlu0 %885 }
 0x1f0   : > { %1080 = vrot.lane.b32.xlu2 %v4267_v7, %s3666_s13 }
 0x1f1   : > { %1015 = vrot.lane.b32.xlu1 %v4158_v12, %s3667_s15  ;;  %1064 = vrot.lane.b32.xlu0 %v4232_v42, %s3666_s13 }
 0x1f2   : > { %v4708_v15 = vpop.permute.xlu2 %935 }
 0x1f3   : > { %v4710_v43 = vpop.permute.xlu1 %893  ;;  %v4712_v44 = vpop.permute.xlu0 %891 }
 0x1f4   : > { %6624 = vst [vmem:[#allocation70_spill] sm:$0xff] %v4710_v43 }
 0x1f5   : > { %6625 = vst [vmem:[#allocation71_spill] sm:$0xff] %v4712_v44 }
 0x1f8   : > { %951 = vrot.lane.b32.xlu2 %v4134_v52, %s3665_s12  ;;  %v1283_v52 = vld [vmem:[%s6546_s1 + $0x18] sm:$0xff] }
 0x1f9   : > { %1066 = vrot.lane.b32.xlu1 %v4229_v39, %s3666_s13  ;;  %1001 = vrot.lane.b32.xlu0 %v4059_v14, %s3667_s15  ;;  %v1282_v14 = vld [vmem:[%s6546_s1 + $0x10] sm:$0xff]  ;;  %v1281_v39 = vld [vmem:[%s6546_s1 + $0x8] sm:$0xff] }
 0x1fa   : > { %v4720_v7 = vpop.permute.xlu2 %941  ;;  %1362 = vmatpush.msra.mxu0 %v1283_v52  ;;  %3392 = vmatpush.msra.mxu2 %v1283_v52 }
 0x1fb   : > { %v4722_v12 = vpop.permute.xlu1 %921  ;;  %v4724_v42 = vpop.permute.xlu0 %897  ;;  %3393 = vmatpush.msra.mxu3 %v1283_v52 }
 0x1fc   : > { %6626 = vst [vmem:[#allocation72_spill] sm:$0xff] %v4724_v42  ;;  %1363 = vmatpush.msra.mxu0 %v1282_v14  ;;  %3394 = vmatpush.msra.mxu2 %v1282_v14 }
 0x1fd   : > { %3395 = vmatpush.msra.mxu3 %v1282_v14 }
 0x1fe   : > { %1364 = vmatpush.msra.mxu0 %v1281_v39  ;;  %3396 = vmatpush.msra.mxu2 %v1281_v39 }
 0x1ff   : > { %3397 = vmatpush.msra.mxu3 %v1281_v39  ;;  %v471_v39 = vld [vmem:[%s3945_s22 + $0x108] sm:$0xff] }
 0x200   : > { %953 = vrot.lane.b32.xlu2 %v4359_v53, %s3665_s12 }
 0x201   : > { %1082 = vrot.lane.b32.xlu1 %v4285_v20, %s3666_s13  ;;  %1017 = vrot.lane.b32.xlu0 %v4155_v11, %s3667_s15  ;;  %v1280_v11 = vld [vmem:[%s6546_s1] sm:$0xff] }
 0x202   : > { %v4748_v53 = vpop.permute.xlu2 %947  ;;  %1365 = vmatpush.msra.mxu0 %v1280_v11  ;;  %3398 = vmatpush.msra.mxu2 %v1280_v11 }
 0x203   : > { %v4744_v63 = vpop.permute.xlu1 %927  ;;  %v4746_v42 = vpop.permute.xlu0 %925  ;;  %3399 = vmatpush.msra.mxu3 %v1280_v11 }
 0x208   : > { %1003 = vrot.lane.b32.xlu2 %v4100_v29, %s3667_s15  ;;  %v982_v29 = vrot.slane %v471_v39, 1 }
 0x209   : > { %1084 = vrot.lane.b32.xlu1 %v4529_v26, %s3666_s13  ;;  %1019 = vrot.lane.b32.xlu0 %v4452_v1, %s3667_s15  ;;  %v983_v26 = vrot.slane %v472_v2, 1 }
 0x20a   : > { %v4763_v14 = vpop.permute.xlu2 %949 }
 0x20b   : > { %v4759_v20 = vpop.permute.xlu1 %933  ;;  %v4761_v52 = vpop.permute.xlu0 %931  ;;  %v984_v54 = vsel %vm504_vm2, %v982_v29, %v983_v26 }
 0x210   : > { %1021 = vrot.lane.b32.xlu2 %v4449_v49, %s3667_s15  ;;  %v1048_v49 = vrot.slane %v472_v2, 2 }
 0x211   : > { %955 = vrot.lane.b32.xlu1 %v4356_v35, %s3665_s12  ;;  %1068 = vrot.lane.b32.xlu0 %v4226_v48, %s3666_s13  ;;  %v985_v35 = vrot.slane %v473_v9, 1  ;;  %v1047_v48 = vrot.slane %v471_v39, 2 }
 0x212   : > { %v4778_v43 = vpop.permute.xlu2 %1005 }
 0x213   : > { %v4773_v1 = vpop.permute.xlu1 %939  ;;  %v4775_v11 = vpop.permute.xlu0 %937  ;;  %v986_v29 = vsel %vm504_vm2, %v983_v26, %v985_v35 }
 0x214   : > { %6627 = vst [vmem:[#allocation73_spill] sm:$0xff] %v4775_v11  ;;  %v1049_v11 = vsel %vm615_vm3, %v1047_v48, %v1048_v49 }
 0x218   : > { %1023 = vrot.lane.b32.xlu2 %v984_v54, %s3667_s15  ;;  %v1113_v54 = vsel %vm1112_vm5, %v3963_v40, %v4305_v36  ;;  %v1050_v36 = vrot.slane %v473_v9, 2  ;;  %v6631_v9 = vld [vmem:[#allocation29_spill] sm:$0xff] }
 0x219   : > { %957 = vrot.lane.b32.xlu1 %v471_v39, %s3665_s12  ;;  %1086 = vrot.lane.b32.xlu0 %v4544_v25, %s3666_s13  ;;  %v1134_v25 = vsel %vm1133_vm6, %v1113_v54, %v4337_v24  ;;  %v6628_v39 = vld [vmem:[#allocation46_spill] sm:$0xff] }
 0x21a   : > { %v1155_v0 = vsel %vm6556_vm7, %v1134_v25, %v6628_v39  ;;  %v1057_v24 = vpop.permute.xlu2 %1056 }
 0x21b   : > { %v4785_v51 = vpop.permute.xlu1 %945  ;;  %v4787_v44 = vpop.permute.xlu0 %943  ;;  %v1176_v26 = vsel %vm6555_vm9, %v1155_v0, %v4568_v31 }
 0x21c   : > { %v1197_v40 = vsel %vm1196_vm8, %v1176_v26, %v4600_v17  ;;  %v1051_v17 = vsel %vm615_vm3, %v1048_v49, %v1050_v36 }
 0x21d   : > { %v1218_v35 = vsel %vm1217_vm10, %v1197_v40, %v4722_v12  ;;  %v6632_v12 = vld [vmem:[#allocation36_spill] sm:$0xff] }
 0x220   : > { %1025 = vrot.lane.b32.xlu2 %v986_v29, %s3667_s15 }
 0x221   : > { %959 = vrot.lane.b32.xlu1 %v472_v2, %s3665_s12  ;;  %1088 = vrot.lane.b32.xlu0 %v1049_v11, %s3666_s13  ;;  %v6629_v2 = vld [vmem:[#allocation12_spill] sm:$0xff] }
 0x222   : > { %v6630_v11 = vld [vmem:[#allocation4_spill] sm:$0xff] }
 0x223   : > { %v1053_v48 = vpop.permute.xlu1 %1052  ;;  %v988_v29 = vpop.permute.xlu0 %987  ;;  %v1114_v54 = vsel %vm1112_vm5, %v6630_v11, %v6629_v2  ;;  %v6635_v11 = vld [vmem:[#allocation55_spill] sm:$0xff] }
 0x224   : > { %v1239_v31 = vsel %vm1238_vm12, %v1218_v35, %v988_v29  ;;  %v1135_v25 = vsel %vm1133_vm6, %v1114_v54, %v6631_v9  ;;  %v6633_v35 = vld [vmem:[#allocation17_spill] sm:$0xff]  ;;  %v994_v2 = vpop.permute.xlu2 %993  ;;  %v6637_v9 = vld [vmem:[#allocation3_spill] sm:$0xff] }
 0x225   : > { %v1260_v0 = vsel %vm1259_vm11, %v1239_v31, %v1053_v48  ;;  %v1156_v39 = vsel %vm6556_vm7, %v1135_v25, %v6632_v12  ;;  %v1122_v48 = vsel %vm1112_vm5, %v4006_v58, %v6633_v35  ;;  %v6634_v31 = vld [vmem:[#allocation24_spill] sm:$0xff] }
 0x226   : > { %3311 = vmatmul.msk.f32.vlgmr.msra.gmra.mxu0 %vm1285_vm13, %v1260_v0  ;;  %v1177_v26 = vsel %vm6555_vm9, %v1156_v39, %v4566_v33  ;;  %v1143_v0 = vsel %vm1133_vm6, %v1122_v48, %v6634_v31  ;;  %v6638_v25 = vld [vmem:[#allocation28_spill] sm:$0xff]  ;;  %v6640_v48 = vld [vmem:[#allocation57_spill] sm:$0xff] }
 0x227   : > { %v1198_v40 = vsel %vm1196_vm8, %v1177_v26, %v4652_v60  ;;  %v1164_v54 = vsel %vm6556_vm7, %v1143_v0, %v6635_v11  ;;  %v6639_v26 = vld [vmem:[#allocation50_spill] sm:$0xff]  ;;  %v6641_v11 = vld [vmem:[#allocation16_spill] sm:$0xff] }
 0x228   : > { %v1219_v49 = vsel %vm1217_vm10, %v1198_v40, %v4684_v50  ;;  %v1185_v50 = vsel %vm6555_vm9, %v1164_v54, %v4604_v47 }
 0x229   : > { %1090 = vrot.lane.b32.xlu0 %v1051_v17, %s3666_s13  ;;  %v6636_v17 = vld [vmem:[#allocation9_spill] sm:$0xff]  ;;  %v1206_v39 = vsel %vm1196_vm8, %v1185_v50, %v4636_v28 }
 0x22a   : > { %v1115_v58 = vsel %vm1112_vm5, %v6637_v9, %v6636_v17  ;;  %v1227_v35 = vsel %vm1217_vm10, %v1206_v39, %v4773_v1  ;;  %v6644_v39 = vld [vmem:[#allocation11_spill] sm:$0xff] }
 0x22b   : > { %v1055_v36 = vpop.permute.xlu1 %1054  ;;  %v990_v29 = vpop.permute.xlu0 %989  ;;  %v1136_v12 = vsel %vm1133_vm6, %v1115_v58, %v6638_v25 }
 0x22c   : > { %v1240_v33 = vsel %vm1238_vm12, %v1219_v49, %v990_v29  ;;  %v1157_v40 = vsel %vm6556_vm7, %v1136_v12, %v6639_v26  ;;  %v1248_v29 = vsel %vm1238_vm12, %v1227_v35, %v4778_v43  ;;  %v1075_v54 = vpop.permute.xlu2 %1074  ;;  %v3604_v12 = vld [vmem:[%s3945_s22 + $0x20] sm:$0xff]  ;;  %v6645_v35 = vld [vmem:[#allocation8_spill] sm:$0xff] }
 0x22d   : > { %v1261_v60 = vsel %vm1259_vm11, %v1240_v33, %v1055_v36  ;;  %v1178_v49 = vsel %vm6555_vm9, %v1157_v40, %v6640_v48  ;;  %v1116_v26 = vsel %vm1112_vm5, %v3604_v12, %v6644_v39  ;;  %v6646_v48 = vld [vmem:[#allocation18_spill] sm:$0xff] }
 0x22e   : > { %3312 = vmatmul.msk.f32.gmra.mxu0 %vm1285_vm13, %v1261_v60  ;;  %v1199_v47 = vsel %vm1196_vm8, %v1178_v49, %v4650_v5  ;;  %v1123_v5 = vsel %vm1112_vm5, %v4043_v8, %v6641_v11  ;;  %v6643_v60 = vld [vmem:[#allocation45_spill] sm:$0xff] }
 0x22f   : > { %v1220_v36 = vsel %vm1217_vm10, %v1199_v47, %v4746_v42  ;;  %v6642_v42 = vld [vmem:[#allocation38_spill] sm:$0xff]  ;;  %v6648_v47 = vld [vmem:[#allocation49_spill] sm:$0xff] }
 0x230   : > { %v1144_v43 = vsel %vm1133_vm6, %v1123_v5, %v6642_v42 }
 0x231   : > { %v1165_v17 = vsel %vm6556_vm7, %v1144_v43, %v6643_v60 }
 0x232   : > { %v1186_v9 = vsel %vm6555_vm9, %v1165_v17, %v4602_v19  ;;  %v1124_v19 = vsel %vm1112_vm5, %v4037_v6, %v6645_v35  ;;  %v6650_v17 = vld [vmem:[#allocation5_spill] sm:$0xff] }
 0x233   : > { %v992_v31 = vpop.permute.xlu1 %991  ;;  %v1071_v28 = vpop.permute.xlu0 %1070  ;;  %v1207_v58 = vsel %vm1196_vm8, %v1186_v9, %v4688_v3  ;;  %v1137_v3 = vsel %vm1133_vm6, %v1116_v26, %v6646_v48  ;;  %v6652_v9 = vld [vmem:[#allocation39_spill] sm:$0xff]  ;;  %v6653_v26 = vld [vmem:[#allocation20_spill] sm:$0xff]  ;;  %v6654_v48 = vld [vmem:[#allocation6_spill] sm:$0xff] }
 0x234   : > { %v1241_v0 = vsel %vm1238_vm12, %v1220_v36, %v992_v31  ;;  %v1269_v33 = vsel %vm1259_vm11, %v1248_v29, %v1071_v28  ;;  %v1158_v36 = vsel %vm6556_vm7, %v1137_v3, %v6648_v47  ;;  %v6649_v29 = vld [vmem:[#allocation59_spill] sm:$0xff] }
 0x235   : > { %3320 = vmatmul.msk.f32.vlgmr.msra.gmra.mxu2 %vm1285_vm13, %v1269_v33  ;;  %v1262_v1 = vsel %vm1259_vm11, %v1241_v0, %v1057_v24  ;;  %v1228_v24 = vsel %vm1217_vm10, %v1207_v58, %v4720_v7  ;;  %v6647_v7 = vld [vmem:[#allocation37_spill] sm:$0xff]  ;;  %v1179_v28 = vsel %vm6555_vm9, %v1158_v36, %v4580_v61  ;;  %v1012_v0 = vpop.permute.xlu2 %1011  ;;  %v6655_v3 = vld [vmem:[#allocation27_spill] sm:$0xff] }
 0x236   : > { %3313 = vmatmul.msk.f32.gmra.mxu0 %vm1285_vm13, %v1262_v1  ;;  %v1145_v49 = vsel %vm1133_vm6, %v1124_v19, %v6647_v7  ;;  %v1200_v33 = vsel %vm1196_vm8, %v1179_v28, %v4612_v30  ;;  %v3606_v19 = vld [vmem:[%s3945_s22 + $0x38] sm:$0xff]  ;;  %v6658_v36 = vld [vmem:[#allocation53_spill] sm:$0xff] }
 0x237   : > { %v1166_v31 = vsel %vm6556_vm7, %v1145_v49, %v6649_v29  ;;  %v1221_v11 = vsel %vm1217_vm10, %v1200_v33, %v4744_v63  ;;  %v6657_v49 = vld [vmem:[#allocation58_spill] sm:$0xff] }
 0x238   : > { %v1187_v6 = vsel %vm6555_vm9, %v1166_v31, %v4564_v34  ;;  %v1242_v42 = vsel %vm1238_vm12, %v1221_v11, %v994_v2 }
 0x239   : > { %v1208_v1 = vsel %vm1196_vm8, %v1187_v6, %v4686_v22  ;;  %v3605_v22 = vld [vmem:[%s3945_s22 + $0x30] sm:$0xff] }
 0x23a   : > { %v1229_v5 = vsel %vm1217_vm10, %v1208_v1, %v4787_v44  ;;  %v1117_v63 = vsel %vm1112_vm5, %v3605_v22, %v6650_v17  ;;  %v6651_v44 = vld [vmem:[#allocation32_spill] sm:$0xff] }
 0x23b   : > { %v1073_v50 = vpop.permute.xlu1 %1072  ;;  %v1008_v8 = vpop.permute.xlu0 %1007  ;;  %v1138_v2 = vsel %vm1133_vm6, %v1117_v63, %v6651_v44 }
 0x23c   : > { %v1249_v25 = vsel %vm1238_vm12, %v1228_v24, %v1008_v8  ;;  %v1159_v58 = vsel %vm6556_vm7, %v1138_v2, %v6652_v9  ;;  %v3608_v9 = vld [vmem:[%s3945_s22 + $0x48] sm:$0xff] }
 0x23d   : > { %v1270_v40 = vsel %vm1259_vm11, %v1249_v25, %v1073_v50  ;;  %v1180_v24 = vsel %vm6555_vm9, %v1159_v58, %v4578_v59  ;;  %v1063_v8 = vpop.permute.xlu2 %1062  ;;  %v1118_v59 = vsel %vm1112_vm5, %v3606_v19, %v6654_v48  ;;  %v6662_v58 = vld [vmem:[#allocation15_spill] sm:$0xff] }
 0x23e   : > { %3321 = vmatmul.msk.f32.gmra.mxu2 %vm1285_vm13, %v1270_v40  ;;  %v1201_v50 = vsel %vm1196_vm8, %v1180_v24, %v4664_v27  ;;  %v1125_v40 = vsel %vm1112_vm5, %v4080_v21, %v6653_v26  ;;  %v1119_v24 = vsel %vm1112_vm5, %v3608_v9, %v6662_v58  ;;  %v6666_v26 = vld [vmem:[#allocation52_spill] sm:$0xff]  ;;  %v6676_v9 = vld [vmem:[#allocation65_spill] sm:$0xff] }
 0x23f   : > { %v1146_v27 = vsel %vm1133_vm6, %v1125_v40, %v6655_v3 }
 0x240   : > { %v1167_v47 = vsel %vm6556_vm7, %v1146_v27, %v6657_v49 }
 0x241   : > { %v1188_v29 = vsel %vm6555_vm9, %v1167_v47, %v4616_v32  ;;  %v6667_v47 = vld [vmem:[#allocation14_spill] sm:$0xff] }
 0x242   : > { %v1209_v28 = vsel %vm1196_vm8, %v1188_v29, %v4648_v62 }
 0x243   : > { %v1010_v43 = vpop.permute.xlu1 %1009  ;;  %v1059_v61 = vpop.permute.xlu0 %1058  ;;  %v1230_v33 = vsel %vm1217_vm10, %v1209_v28, %v4785_v51  ;;  %v6659_v51 = vld [vmem:[#allocation19_spill] sm:$0xff] }
 0x244   : > { %v1250_v60 = vsel %vm1238_vm12, %v1229_v5, %v1010_v43  ;;  %v1263_v34 = vsel %vm1259_vm11, %v1242_v42, %v1059_v61  ;;  %v1251_v11 = vsel %vm1238_vm12, %v1230_v33, %v1012_v0 }
 0x245   : > { %3314 = vmatmul.msk.f32.gmra.mxu0 %vm1285_vm13, %v1263_v34  ;;  %v1271_v30 = vsel %vm1259_vm11, %v1250_v60, %v1075_v54  ;;  %v1222_v54 = vsel %vm1217_vm10, %v1201_v50, %v4696_v13  ;;  %v6656_v13 = vld [vmem:[#allocation31_spill] sm:$0xff]  ;;  %v1000_v32 = vpop.permute.xlu2 %999  ;;  %v6661_v60 = vld [vmem:[#allocation48_spill] sm:$0xff] }
 0x246   : > { %3322 = vmatmul.msk.f32.gmra.mxu2 %vm1285_vm13, %v1271_v30  ;;  %v1139_v7 = vsel %vm1133_vm6, %v1118_v59, %v6656_v13 }
 0x247   : > { %v1160_v21 = vsel %vm6556_vm7, %v1139_v7, %v6658_v36 }
 0x248   : > { %v1181_v31 = vsel %vm6555_vm9, %v1160_v21, %v4537_v41  ;;  %v6669_v21 = vld [vmem:[#allocation42_spill] sm:$0xff] }
 0x249   : > { %v1202_v6 = vsel %vm1196_vm8, %v1181_v31, %v4662_v10  ;;  %v3607_v10 = vld [vmem:[%s3945_s22 + $0x98] sm:$0xff] }
 0x24a   : > { %v1223_v1 = vsel %vm1217_vm10, %v1202_v6, %v4761_v52  ;;  %v1126_v61 = vsel %vm1112_vm5, %v3607_v10, %v6659_v51  ;;  %v6660_v52 = vld [vmem:[#allocation41_spill] sm:$0xff] }
 0x24b   : > { %v1061_v25 = vpop.permute.xlu1 %1060  ;;  %v996_v12 = vpop.permute.xlu0 %995  ;;  %v1147_v0 = vsel %vm1133_vm6, %v1126_v61, %v6660_v52 }
 0x24c   : > { %v1243_v39 = vsel %vm1238_vm12, %v1222_v54, %v996_v12  ;;  %v1168_v34 = vsel %vm6556_vm7, %v1147_v0, %v6661_v60  ;;  %v6663_v54 = vld [vmem:[#allocation10_spill] sm:$0xff] }
 0x24d   : > { %v1264_v35 = vsel %vm1259_vm11, %v1243_v39, %v1061_v25  ;;  %v1189_v30 = vsel %vm6555_vm9, %v1168_v34, %v4614_v18  ;;  %v6664_v25 = vld [vmem:[#allocation21_spill] sm:$0xff]  ;;  %v1081_v12 = vpop.permute.xlu2 %1080 }
 0x24e   : > { %3315 = vmatmul.msk.f32.gmra.mxu0 %vm1285_vm13, %v1264_v35  ;;  %v1210_v22 = vsel %vm1196_vm8, %v1189_v30, %v4700_v45  ;;  %v1140_v45 = vsel %vm1133_vm6, %v1119_v24, %v6664_v25  ;;  %v6677_v24 = vld [vmem:[#allocation71_spill] sm:$0xff] }
 0x24f   : > { %v1231_v17 = vsel %vm1217_vm10, %v1210_v22, %v4748_v53  ;;  %v6665_v53 = vld [vmem:[#allocation40_spill] sm:$0xff]  ;;  %v1161_v40 = vsel %vm6556_vm7, %v1140_v45, %v6666_v26  ;;  %v3612_v22 = vld [vmem:[%s3945_s22 + $0xc0] sm:$0xff] }
 0x250   : > { %v1182_v19 = vsel %vm6555_vm9, %v1161_v40, %v4592_v37  ;;  %v6679_v40 = vld [vmem:[#allocation34_spill] sm:$0xff] }
 0x251   : > { %v1203_v59 = vsel %vm1196_vm8, %v1182_v19, %v4624_v56  ;;  %v6680_v19 = vld [vmem:[#allocation56_spill] sm:$0xff] }
 0x252   : > { %v1224_v27 = vsel %vm1217_vm10, %v1203_v59, %v4759_v20  ;;  %v6681_v59 = vld [vmem:[#allocation61_spill] sm:$0xff] }
 0x253   : > { %v998_v5 = vpop.permute.xlu1 %997  ;;  %v1077_v42 = vpop.permute.xlu0 %1076 }
 0x254   : > { %v1244_v41 = vsel %vm1238_vm12, %v1223_v1, %v998_v5  ;;  %v1272_v43 = vsel %vm1259_vm11, %v1251_v11, %v1077_v42 }
 0x255   : > { %3323 = vmatmul.msk.f32.gmra.mxu2 %vm1285_vm13, %v1272_v43  ;;  %v1265_v62 = vsel %vm1259_vm11, %v1244_v41, %v1063_v8  ;;  %v3609_v8 = vld [vmem:[%s3945_s22 + $0xa8] sm:$0xff]  ;;  %v952_v31 = vpop.permute.xlu2 %951  ;;  %v6670_v41 = vld [vmem:[#allocation23_spill] sm:$0xff] }
 0x256   : > { %3316 = vmatmul.msk.f32.gmra.mxu0 %vm1285_vm13, %v1265_v62  ;;  %v1127_v18 = vsel %vm1112_vm5, %v3609_v8, %v6663_v54 }
 0x257   : > { %v1148_v39 = vsel %vm1133_vm6, %v1127_v18, %v6665_v53  ;;  %v6678_v53 = vld [vmem:[#allocation7_spill] sm:$0xff] }
 0x258   : > { %v1169_v35 = vsel %vm6556_vm7, %v1148_v39, %v4541_v55  ;;  %v1245_v55 = vsel %vm1238_vm12, %v1224_v27, %v1000_v32  ;;  %v3611_v32 = vld [vmem:[%s3945_s22 + $0xb0] sm:$0xff] }
 0x259   : > { %v1190_v48 = vsel %vm6555_vm9, %v1169_v35, %v4576_v57  ;;  %v1128_v43 = vsel %vm1112_vm5, %v3611_v32, %v6670_v41  ;;  %v6682_v27 = vld [vmem:[#allocation69_spill] sm:$0xff] }
 0x25a   : > { %v1211_v3 = vsel %vm1196_vm8, %v1190_v48, %v4698_v16  ;;  %v3610_v16 = vld [vmem:[%s3945_s22 + $0x50] sm:$0xff] }
 0x25b   : > { %v1079_v63 = vpop.permute.xlu1 %1078  ;;  %v1014_v44 = vpop.permute.xlu0 %1013  ;;  %v1232_v13 = vsel %vm1217_vm10, %v1211_v3, %v4763_v14  ;;  %v1120_v20 = vsel %vm1112_vm5, %v3610_v16, %v6667_v47  ;;  %v6668_v14 = vld [vmem:[#allocation35_spill] sm:$0xff] }
 0x25c   : > { %v1252_v2 = vsel %vm1238_vm12, %v1231_v17, %v1014_v44  ;;  %v1141_v36 = vsel %vm1133_vm6, %v1120_v20, %v6668_v14  ;;  %v6673_v17 = vld [vmem:[#allocation22_spill] sm:$0xff]  ;;  %v6685_v20 = vld [vmem:[#allocation43_spill] sm:$0xff] }
 0x25d   : > { %v1273_v50 = vsel %vm1259_vm11, %v1252_v2, %v1079_v63  ;;  %v1162_v29 = vsel %vm6556_vm7, %v1141_v36, %v6669_v21  ;;  %v954_v61 = vpop.permute.xlu2 %953  ;;  %v1129_v63 = vsel %vm1112_vm5, %v3612_v22, %v6673_v17  ;;  %v3616_v22 = vld [vmem:[%s3945_s22 + $0xe0] sm:$0xff]  ;;  %v6694_v17 = vld [vmem:[#allocation25_spill] sm:$0xff] }
 0x25e   : > { %3324 = vmatmul.msk.f32.gmra.mxu2 %vm1285_vm13, %v1273_v50  ;;  %v1183_v28 = vsel %vm6555_vm9, %v1162_v29, %v4590_v38  ;;  %v6671_v38 = vld [vmem:[#allocation30_spill] sm:$0xff]  ;;  %v6686_v29 = vld [vmem:[#allocation63_spill] sm:$0xff] }
 0x25f   : > { %v1204_v6 = vsel %vm1196_vm8, %v1183_v28, %v4676_v23  ;;  %v1149_v62 = vsel %vm1133_vm6, %v1128_v43, %v6671_v38  ;;  %v6672_v23 = vld [vmem:[#allocation60_spill] sm:$0xff] }
 0x260   : > { %v1225_v33 = vsel %vm1217_vm10, %v1204_v6, %v4708_v15  ;;  %v1170_v10 = vsel %vm6556_vm7, %v1149_v62, %v6672_v23  ;;  %v6687_v28 = vld [vmem:[#allocation64_spill] sm:$0xff]  ;;  %v6690_v62 = vld [vmem:[#allocation33_spill] sm:$0xff] }
 0x261   : > { %v1191_v15 = vsel %vm6555_vm9, %v1170_v10, %v4628_v46  ;;  %v6674_v46 = vld [vmem:[#allocation44_spill] sm:$0xff] }
 0x262   : > { %v1212_v51 = vsel %vm1196_vm8, %v1191_v15, %v4660_v4  ;;  %v1150_v44 = vsel %vm1133_vm6, %v1129_v63, %v6674_v46  ;;  %v6675_v4 = vld [vmem:[#allocation51_spill] sm:$0xff]  ;;  %v6691_v15 = vld [vmem:[#allocation62_spill] sm:$0xff]  ;;  %v1132_v63 = vsel %vm1112_vm5, %v3616_v22, %v6694_v17 }
 0x263   : > { %v1016_v7 = vpop.permute.xlu1 %1015  ;;  %v1065_v49 = vpop.permute.xlu0 %1064  ;;  %v1233_v52 = vsel %vm1217_vm10, %v1212_v51, %v952_v31  ;;  %v1171_v2 = vsel %vm6556_vm7, %v1150_v44, %v6675_v4  ;;  %v6695_v4 = vld [vmem:[#allocation47_spill] sm:$0xff] }
 0x264   : > { %v1253_v37 = vsel %vm1238_vm12, %v1232_v13, %v1016_v7  ;;  %v1266_v57 = vsel %vm1259_vm11, %v1245_v55, %v1065_v49  ;;  %v1192_v58 = vsel %vm6555_vm9, %v1171_v2, %v6676_v9  ;;  %v6683_v55 = vld [vmem:[#allocation73_spill] sm:$0xff]  ;;  %v3614_v49 = vld [vmem:[%s3945_s22 + $0xc8] sm:$0xff]  ;;  %v1153_v2 = vsel %vm1133_vm6, %v1132_v63, %v6695_v4 }
 0x265   : > { %3317 = vmatmul.msk.f32.gmra.mxu0 %vm1285_vm13, %v1266_v57  ;;  %v1274_v56 = vsel %vm1259_vm11, %v1253_v37, %v1081_v12  ;;  %v1213_v50 = vsel %vm1196_vm8, %v1192_v58, %v6677_v24  ;;  %v1004_v25 = vpop.permute.xlu2 %1003  ;;  %v3613_v12 = vld [vmem:[%s3945_s22 + $0x60] sm:$0xff]  ;;  %v6684_v37 = vld [vmem:[#allocation13_spill] sm:$0xff]  ;;  %v6696_v58 = vld [vmem:[#allocation54_spill] sm:$0xff] }
 0x266   : > { %3325 = vmatmul.msk.f32.gmra.mxu2 %vm1285_vm13, %v1274_v56  ;;  %v1234_v8 = vsel %vm1217_vm10, %v1213_v50, %v954_v61  ;;  %v1121_v39 = vsel %vm1112_vm5, %v3613_v12, %v6678_v53  ;;  %v1130_v57 = vsel %vm1112_vm5, %v3614_v49, %v6684_v37  ;;  %v6692_v61 = vld [vmem:[#allocation67_spill] sm:$0xff]  ;;  %v1174_v24 = vsel %vm6556_vm7, %v1153_v2, %v6696_v58 }
 0x267   : > { %v1142_v35 = vsel %vm1133_vm6, %v1121_v39, %v6679_v40  ;;  %v1151_v14 = vsel %vm1133_vm6, %v1130_v57, %v6685_v20  ;;  %v5115_v40 = vld [vmem:[%s6547_s2] ss:$0 sm:$0xff] }
 0x268   : > { %v1163_v48 = vsel %vm6556_vm7, %v1142_v35, %v6680_v19  ;;  %v1172_v31 = vsel %vm6556_vm7, %v1151_v14, %v6686_v29  ;;  %v5120_v35 = vld [vmem:[%s6548_s3] ss:$0 sm:$0xff] }
 0x269   : > { %v1184_v3 = vsel %vm6555_vm9, %v1163_v48, %v6681_v59  ;;  %v1193_v6 = vsel %vm6555_vm9, %v1172_v31, %v6687_v28 }
 0x26a   : > { %v1205_v13 = vsel %vm1196_vm8, %v1184_v3, %v6682_v27 }
 0x26b   : > { %v1067_v1 = vpop.permute.xlu1 %1066  ;;  %v1002_v11 = vpop.permute.xlu0 %1001  ;;  %v1226_v7 = vsel %vm1217_vm10, %v1205_v13, %v6683_v55 }
 0x26c   : > { %v1246_v5 = vsel %vm1238_vm12, %v1225_v33, %v1002_v11  ;;  %v1247_v56 = vsel %vm1238_vm12, %v1226_v7, %v1004_v25  ;;  %v6688_v33 = vld [vmem:[#allocation70_spill] sm:$0xff] }
 0x26d   : > { %v1267_v42 = vsel %vm1259_vm11, %v1246_v5, %v1067_v1  ;;  %v1022_v36 = vpop.permute.xlu2 %1021  ;;  %v1214_v1 = vsel %vm1196_vm8, %v1193_v6, %v6688_v33  ;;  %v3615_v5 = vld [vmem:[%s3945_s22 + $0xd8] sm:$0xff] }
 0x26e   : > { %3318 = vmatmul.msk.f32.gmra.mxu0 %vm1285_vm13, %v1267_v42  ;;  %v6689_v42 = vld [vmem:[#allocation26_spill] sm:$0xff] }
 0x26f   : > { %v1131_v32 = vsel %vm1112_vm5, %v3615_v5, %v6689_v42 }
 0x270   : > { %v1152_v23 = vsel %vm1133_vm6, %v1131_v32, %v6690_v62 }
 0x271   : > { %v1173_v51 = vsel %vm6556_vm7, %v1152_v23, %v6691_v15 }
 0x273   : > { %v1083_v0 = vpop.permute.xlu1 %1082  ;;  %v1018_v60 = vpop.permute.xlu0 %1017 }
 0x274   : > { %v1254_v34 = vsel %vm1238_vm12, %v1233_v52, %v1018_v60  ;;  %v1194_v52 = vsel %vm6555_vm9, %v1173_v51, %v6692_v61  ;;  %v6693_v60 = vld [vmem:[#allocation68_spill] sm:$0xff] }
 0x275   : > { %v1275_v30 = vsel %vm1259_vm11, %v1254_v34, %v1083_v0  ;;  %v1024_v0 = vpop.permute.xlu2 %1023  ;;  %v1215_v34 = vsel %vm1196_vm8, %v1194_v52, %v6693_v60 }
 0x276   : > { %3326 = vmatmul.msk.f32.gmra.mxu2 %vm1285_vm13, %v1275_v30 }
 0x27b   : > { %v1085_v54 = vpop.permute.xlu1 %1084  ;;  %v1020_v18 = vpop.permute.xlu0 %1019 }
 0x27c   : > { %v1255_v45 = vsel %vm1238_vm12, %v1234_v8, %v1020_v18  ;;  %v6697_v8 = vld [vmem:[#allocation66_spill] sm:$0xff]  ;;  %v6698_v18 = vld [vmem:[#allocation72_spill] sm:$0xff] }
 0x27d   : > { %v1276_v26 = vsel %vm1259_vm11, %v1255_v45, %v1085_v54  ;;  %v1195_v54 = vsel %vm6555_vm9, %v1174_v24, %v6697_v8  ;;  %v1026_v12 = vpop.permute.xlu2 %1025 }
 0x27e   : > { %3327 = vmatmul.msk.f32.gmra.mxu2 %vm1285_vm13, %v1276_v26  ;;  %v1216_v25 = vsel %vm1196_vm8, %v1195_v54, %v6698_v18 }
 0x283   : > { %v956_v16 = vpop.permute.xlu1 %955  ;;  %v1069_v47 = vpop.permute.xlu0 %1068 }
 0x284   : > { %v1268_v21 = vsel %vm1259_vm11, %v1247_v56, %v1069_v47  ;;  %v1235_v11 = vsel %vm1217_vm10, %v1214_v1, %v956_v16 }
 0x285   : > { %3319 = vmatmul.msk.f32.gmra.mxu0 %vm1285_vm13, %v1268_v21  ;;  %v1256_v41 = vsel %vm1238_vm12, %v1235_v11, %v1022_v36 }
 0x28b   : > { %v958_v43 = vpop.permute.xlu1 %957  ;;  %v1087_v38 = vpop.permute.xlu0 %1086 }
 0x28c   : > { %v1277_v10 = vsel %vm1259_vm11, %v1256_v41, %v1087_v38  ;;  %v1236_v30 = vsel %vm1217_vm10, %v1215_v34, %v958_v43  ;;  %v5132_v38 = vstv %s3351_s21 }
 0x28d   : > { %3328 = vmatmul.msk.f32.gmra.mxu2 %vm1285_vm13, %v1277_v10  ;;  %v1257_v46 = vsel %vm1238_vm12, %v1236_v30, %v1024_v0 }
 0x293   : > { %v1089_v44 = vpop.permute.xlu0 %1088  ;;  %v960_v50 = vpop.permute.xlu1 %959 }
 0x294   : > { %v1278_v9 = vsel %vm1259_vm11, %v1257_v46, %v1089_v44  ;;  %v1237_v45 = vsel %vm1217_vm10, %v1216_v25, %v960_v50  ;;  %vm1886_vm10 = vcmp.ge.s32.totalorder %v5132_v38, 0 }
 0x295   : > { %3329 = vmatmul.msk.f32.vlgmr.msra.gmra.mxu3 %vm1285_vm13, %v1278_v9  ;;  %v1258_v53 = vsel %vm1238_vm12, %v1237_v45, %v1026_v12 }
 0x29b   : > { %v1091_v39 = vpop.permute.xlu0 %1090 }
 0x29c   : > { %v1279_v26 = vsel %vm1259_vm11, %v1258_v53, %v1091_v39  ;;  %vm1896_vm11 = vcmp.lt.s32.totalorder %v5132_v38, 16 }
 0x29d   : > { %3330 = vmatmul.msk.f32.gmra.mxu3 %vm1285_vm13, %v1279_v26 }
 0x2a3   : > { %v1367_v19 = vpop.f32.mrf.mxu0 }
 0x2a4   : > { %v1431_v48 = vmul.f32 %v5115_v40, %v1367_v19 }
 0x2a6   : > { %v1455_v59 = vadd.f32 %v5120_v35, %v1431_v48 }
 0x2a8   : > { %v3331_v3 = vmul.f32 -1.442695, %v1455_v59 }
 0x2aa   : > { %3460 = vpow2.f32 %v3331_v3 }
 0x2ab   : > { %v1370_v27 = vpop.f32.mrf.mxu0 }
 0x2ac   : > { %v1432_v13 = vmul.f32 %v5115_v40, %v1370_v27 }
 0x2ae   : > { %v1456_v55 = vadd.f32 %v5120_v35, %v1432_v13 }
 0x2b0   : > { %v3461_v7 = vpop.eup %3460  ;;  %v3332_v49 = vmul.f32 -1.442695, %v1456_v55 }
 0x2b1   : > { %v1535_v37 = vadd.f32 1.0, %v3461_v7 }
 0x2b2   : > { %3462 = vpow2.f32 %v3332_v49 }
 0x2b3   : > { %3464 = vrcp.f32 %v1535_v37  ;;  %v1373_v57 = vpop.f32.mrf.mxu0  ;;  %v1566_v1 = vand.u32 2147483648, %v1535_v37  ;;  %vm1560_vm15 = vweird.f32 %v1535_v37  ;;  %v1564_v42 = vand.u32 2147483647, %v1535_v37 }
 0x2b4   : > { %v1433_v56 = vmul.f32 %v5115_v40, %v1373_v57 }
 0x2b5   : > { %v1567_v10 = vor.u32 1.1754944e-38, %v1566_v1  ;;  %vm1565_vm4 = vcmp.eq.f32.partialorder %v1564_v42, 8.507059e+37 }
 0x2b6   : > { %v5128_v16 = vadd.f32 %v5120_v35, %v1433_v56 }
 0x2b8   : > { %v3463_v47 = vpop.eup %3462  ;;  %v3333_v21 = vmul.f32 -1.442695, %v5128_v16  ;;  %v1394_v31 = vpop.f32.mrf.mxu2 }
 0x2b9   : > { %v3465_v20 = vpop.eup %3464  ;;  %v1536_v14 = vadd.f32 1.0, %v3463_v47  ;;  %v1440_v26 = vmul.f32 %v5115_v40, %v1394_v31 }
 0x2ba   : > { %v1556_v36 = vmul.f32 %v3465_v20, %v1535_v37  ;;  %vm1561_vm14 = vweird.f32 %v3465_v20 }
 0x2bb   : > { %3466 = vrcp.f32 %v1536_v14  ;;  %vm1562_vm0 = vmor %vm1560_vm15, %vm1561_vm14  ;;  %v1581_v62 = vand.u32 2147483648, %v1536_v14  ;;  %v1579_v51 = vand.u32 2147483647, %v1536_v14  ;;  %vm1575_vm8 = vweird.f32 %v1536_v14 }
 0x2bc   : > { %v1557_v29 = vsub.f32 1.0, %v1556_v36  ;;  %3468 = vpow2.f32 %v3333_v21  ;;  %vm1906_vm14 = vmand %vm1886_vm10, %vm1896_vm11  ;;  %vm1956_vm15 = vcmask 1040384   ;;  %v5171_v37 = vadd.f32 %v5120_v35, %v1440_v26 }
 0x2bd   : > { %v1582_v30 = vor.u32 1.1754944e-38, %v1581_v62  ;;  %vm1580_vm13 = vcmp.eq.f32.partialorder %v1579_v51, 8.507059e+37 }
 0x2be   : > { %v1558_v28 = vmul.f32 %v3465_v20, %v1557_v29 }
 0x2c0   : > { %v1559_v33 = vadd.f32 %v3465_v20, %v1558_v28 }
 0x2c1   : > { %v3467_v6 = vpop.eup %3466  ;;  %v1397_v61 = vpop.f32.mrf.mxu2 }
 0x2c2   : > { %v1571_v11 = vmul.f32 %v3467_v6, %v1536_v14  ;;  %v1376_v5 = vpop.f32.mrf.mxu0  ;;  %v3469_v41 = vpop.eup %3468  ;;  %v1563_v43 = vsel %vm1562_vm0, %v3465_v20, %v1559_v33  ;;  %vm1576_vm1 = vweird.f32 %v3467_v6  ;;  %v1441_v27 = vmul.f32 %v5115_v40, %v1397_v61 }
 0x2c3   : > { %v1434_v23 = vmul.f32 %v5115_v40, %v1376_v5  ;;  %v1568_v52 = vsel %vm1565_vm4, %v1567_v10, %v1563_v43  ;;  %v5135_v60 = vadd.f32 1.0, %v3469_v41  ;;  %vm1577_vm12 = vmor %vm1575_vm8, %vm1576_vm1 }
 0x2c4   : > { %v1572_v32 = vsub.f32 1.0, %v1571_v11  ;;  %v1855_v17 = vmul.f32 %v1568_v52, %v1455_v59  ;;  %v5175_v20 = vadd.f32 %v5120_v35, %v1441_v27 }
 0x2c5   : > { %v5138_v34 = vadd.f32 %v5120_v35, %v1434_v23  ;;  %3470 = vrcp.f32 %v5135_v60  ;;  %vm1590_vm8 = vweird.f32 %v5135_v60  ;;  %v1594_v52 = vand.u32 2147483647, %v5135_v60 }
 0x2c6   : > { %v1573_v15 = vmul.f32 %v3467_v6, %v1572_v32  ;;  %v1916_v24 = vsel %vm1906_vm14, %v1855_v17, 0.0  ;;  %v3341_v11 = vmul.f32 -1.442695, %v5175_v20  ;;  %v1596_v32 = vand.u32 2147483648, %v5135_v60 }
 0x2c7   : > { %v3334_v46 = vmul.f32 -1.442695, %v5138_v34  ;;  %v1957_v25 = vrot.slane %v1916_v24, 7 }
 0x2c8   : > { %v1574_v0 = vadd.f32 %v3467_v6, %v1573_v15  ;;  %v1597_v24 = vor.u32 1.1754944e-38, %v1596_v32 }
 0x2c9   : > { %3472 = vpow2.f32 %v3334_v46  ;;  %v1400_v54 = vpop.f32.mrf.mxu2  ;;  %v5160_v59 = vsel %vm1956_vm15, 0.0, %v1957_v25 }
 0x2ca   : > { %v1578_v22 = vsel %vm1577_vm12, %v3467_v6, %v1574_v0  ;;  %v2051_v57 = vrot.slane %v5160_v59, 1  ;;  %v1442_v36 = vmul.f32 %v5115_v40, %v1400_v54  ;;  %v3340_v6 = vmul.f32 -1.442695, %v5171_v37 }
 0x2cb   : > { %v1583_v63 = vsel %vm1580_vm13, %v1582_v30, %v1578_v22  ;;  %v1379_v44 = vpop.f32.mrf.mxu0  ;;  %v5149_v18 = vpop.eup %3470  ;;  %v1877_v22 = vadd.s32 1, %v5132_v38  ;;  %vm1595_vm13 = vcmp.eq.f32.partialorder %v1594_v52, 8.507059e+37 }
 0x2cc   : > { %v1856_v4 = vmul.f32 %v1583_v63, %v1456_v55  ;;  %v1435_v2 = vmul.f32 %v5115_v40, %v1379_v44  ;;  %v1586_v3 = vmul.f32 %v5149_v18, %v5135_v60  ;;  %v5190_v42 = vadd.f32 %v5120_v35, %v1442_v36 }
 0x2cd   : > { %vm1591_vm1 = vweird.f32 %v5149_v18 }
 0x2ce   : > { %v1917_v9 = vsel %vm1906_vm14, %v1856_v4, 0.0  ;;  %v5146_v58 = vadd.f32 %v5120_v35, %v1435_v2  ;;  %v1587_v47 = vsub.f32 1.0, %v1586_v3  ;;  %v3342_v15 = vmul.f32 -1.442695, %v5190_v42  ;;  %vm5202_vm11 = vmor %vm1590_vm8, %vm1591_vm1 }
 0x2cf   : > { %v1958_v50 = vrot.slane %v1917_v9, 7  ;;  %v3473_v45 = vpop.eup %3472  ;;  %vm1887_vm14 = vcmp.ge.s32.totalorder %v1877_v22, 0 }
 0x2d0   : > { %v3335_v8 = vmul.f32 -1.442695, %v5146_v58  ;;  %v1538_v39 = vadd.f32 1.0, %v3473_v45  ;;  %v1588_v1 = vmul.f32 %v5149_v18, %v1587_v47 }
 0x2d1   : > { %v5152_v53 = vsel %vm1956_vm15, %v1958_v50, 0.0  ;;  %v5157_v48 = vsel %vm1956_vm15, %v1957_v25, %v1958_v50 }
 0x2d2   : > { %3474 = vpow2.f32 %v3335_v8  ;;  %v2054_v13 = vrot.slane %v5152_v53, 1  ;;  %v2052_v7 = vrot.slane %v5157_v48, 1  ;;  %v1589_v43 = vadd.f32 %v5149_v18, %v1588_v1 }
 0x2d3   : > { %v1382_v12 = vpop.f32.mrf.mxu0  ;;  %3476 = vrcp.f32 %v1538_v39  ;;  %v1611_v62 = vand.u32 2147483648, %v1538_v39  ;;  %vm1605_vm4 = vweird.f32 %v1538_v39  ;;  %v1609_v10 = vand.u32 2147483647, %v1538_v39 }
 0x2d4   : > { %v1436_v19 = vmul.f32 %v5115_v40, %v1382_v12  ;;  %v2055_v21 = vsel %vm504_vm2, %v2052_v7, %v2054_v13  ;;  %v2053_v29 = vsel %vm504_vm2, %v2051_v57, %v2052_v7  ;;  %v1593_v60 = vsel %vm5202_vm11, %v5149_v18, %v1589_v43 }
 0x2d5   : > { %2093 = vrot.lane.b32.xlu2 %v2055_v21, %s3668_s8  ;;  %2091 = vrot.lane.b32.xlu1 %v2053_v29, %s3668_s8  ;;  %v1612_v4 = vor.u32 1.1754944e-38, %v1611_v62  ;;  %vm1610_vm12 = vcmp.eq.f32.partialorder %v1609_v10, 8.507059e+37  ;;  %v1598_v12 = vsel %vm1595_vm13, %v1597_v24, %v1593_v60 }
 0x2d6   : > { %v5167_v55 = vadd.f32 %v5120_v35, %v1436_v19  ;;  %v1857_v7 = vmul.f32 %v1598_v12, %v5128_v16 }
 0x2d8   : > { %v3475_v49 = vpop.eup %3474  ;;  %v1403_v56 = vpop.f32.mrf.mxu2  ;;  %v3336_v28 = vmul.f32 -1.442695, %v5167_v55 }
 0x2d9   : > { %v5177_v14 = vadd.f32 1.0, %v3475_v49  ;;  %v3477_v31 = vpop.eup %3476  ;;  %v1443_v18 = vmul.f32 %v5115_v40, %v1403_v56 }
 0x2da   : > { %v1601_v33 = vmul.f32 %v3477_v31, %v1538_v39  ;;  %vm1606_vm0 = vweird.f32 %v3477_v31 }
 0x2db   : > { %3478 = vrcp.f32 %v5177_v14  ;;  %vm5198_vm10 = vmor %vm1605_vm4, %vm1606_vm0  ;;  %vm1897_vm0 = vcmp.lt.s32.totalorder %v1877_v22, 16  ;;  %v1626_v57 = vand.u32 2147483648, %v5177_v14  ;;  %vm1620_vm8 = vweird.f32 %v5177_v14 }
 0x2dc   : > { %v1602_v5 = vsub.f32 1.0, %v1601_v33  ;;  %3480 = vpow2.f32 %v3336_v28  ;;  %vm5233_vm4 = vmand %vm1887_vm14, %vm1897_vm0  ;;  %v5240_v36 = vadd.f32 %v5120_v35, %v1443_v18 }
 0x2dd   : > { %3482 = vpow2.f32 %v3340_v6  ;;  %v1918_v33 = vsel %vm5233_vm4, %v1857_v7, 0.0 }
 0x2de   : > { %v1603_v41 = vmul.f32 %v3477_v31, %v1602_v5  ;;  %3484 = vpow2.f32 %v3341_v11  ;;  %v1627_v11 = vor.u32 1.1754944e-38, %v1626_v57  ;;  %v3343_v32 = vmul.f32 -1.442695, %v5240_v36 }
 0x2df   : > { %3486 = vpow2.f32 %v3342_v15  ;;  %v1960_v62 = vrot.slane %v1918_v33, 7 }
 0x2e0   : > { %v1604_v23 = vadd.f32 %v3477_v31, %v1603_v41 }
 0x2e1   : > { %v1406_v51 = vpop.f32.mrf.mxu2  ;;  %v3479_v61 = vpop.eup %3478 }
 0x2e2   : > { %v1608_v17 = vsel %vm5198_vm10, %v3477_v31, %v1604_v23  ;;  %v1616_v63 = vmul.f32 %v3479_v61, %v5177_v14  ;;  %v1385_v46 = vpop.f32.mrf.mxu0  ;;  %v3481_v44 = vpop.eup %3480  ;;  %v1444_v2 = vmul.f32 %v5115_v40, %v1406_v51  ;;  %vm1621_vm1 = vweird.f32 %v3479_v61 }
 0x2e3   : > { %v3483_v9 = vpop.eup %3482  ;;  %v1613_v54 = vsel %vm1610_vm12, %v1612_v4, %v1608_v17  ;;  %v5214_v25 = vadd.f32 1.0, %v3481_v44  ;;  %v1437_v45 = vmul.f32 %v5115_v40, %v1385_v46  ;;  %vm5243_vm10 = vmor %vm1620_vm8, %vm1621_vm1 }
 0x2e4   : > { %v1617_v50 = vsub.f32 1.0, %v1616_v63  ;;  %v3485_v8 = vpop.eup %3484  ;;  %v5218_v26 = vadd.f32 1.0, %v3483_v9  ;;  %v5222_v19 = vadd.f32 %v5120_v35, %v1444_v2  ;;  %v1858_v3 = vmul.f32 %v1613_v54, %v5138_v34 }
 0x2e5   : > { %3488 = vrcp.f32 %v5214_v25  ;;  %v5226_v13 = vadd.f32 %v5120_v35, %v1437_v45  ;;  %v5229_v49 = vadd.f32 1.0, %v3485_v8  ;;  %v3487_v56 = vpop.eup %3486  ;;  %v1624_v34 = vand.u32 2147483647, %v5177_v14 }
 0x2e6   : > { %v1618_v39 = vmul.f32 %v3479_v61, %v1617_v50  ;;  %3490 = vrcp.f32 %v5218_v26  ;;  %v3344_v21 = vmul.f32 -1.442695, %v5222_v19  ;;  %v1919_v31 = vsel %vm5233_vm4, %v1858_v3, 0.0 }
 0x2e7   : > { %v3337_v29 = vmul.f32 -1.442695, %v5226_v13  ;;  %v1878_v14 = vadd.s32 2, %v5132_v38  ;;  %3492 = vrcp.f32 %v5229_v49  ;;  %v5257_v1 = vadd.f32 1.0, %v3487_v56 }
 0x2e8   : > { %v1619_v27 = vadd.f32 %v3479_v61, %v1618_v39  ;;  %vm1625_vm11 = vcmp.eq.f32.partialorder %v1624_v34, 8.507059e+37  ;;  %v1961_v41 = vrot.slane %v1919_v31, 7  ;;  %v1639_v15 = vand.u32 2147483647, %v5214_v25 }
 0x2e9   : > { %3494 = vpow2.f32 %v3337_v29  ;;  %vm1888_vm12 = vcmp.ge.s32.totalorder %v1878_v14, 0  ;;  %vm1898_vm13 = vcmp.lt.s32.totalorder %v1878_v14, 16  ;;  %v1641_v51 = vand.u32 2147483648, %v5214_v25 }
 0x2ea   : > { %v1623_v28 = vsel %vm5243_vm10, %v3479_v61, %v1619_v27  ;;  %3496 = vpow2.f32 %v3344_v21  ;;  %v1409_v61 = vpop.f32.mrf.mxu2  ;;  %v5270_v17 = vsel %vm1956_vm15, %v1960_v62, %v1961_v41  ;;  %v5273_v63 = vsel %vm1956_vm15, %v1961_v41, 0.0  ;;  %vm5277_vm0 = vmand %vm1888_vm12, %vm1898_vm13 }
 0x2eb   : > { %v3489_v6 = vpop.eup %3488  ;;  %v1628_v43 = vsel %vm1625_vm11, %v1627_v11, %v1623_v28  ;;  %3498 = vrcp.f32 %v5257_v1  ;;  %v1388_v30 = vpop.f32.mrf.mxu0  ;;  %vm1635_vm1 = vweird.f32 %v5214_v25  ;;  %vm1640_vm8 = vcmp.eq.f32.partialorder %v1639_v15, 8.507059e+37 }
 0x2ec   : > { %v1631_v5 = vmul.f32 %v3489_v6, %v5214_v25  ;;  %v5261_v10 = vpop.eup %3490  ;;  %v1859_v52 = vmul.f32 %v1628_v43, %v5146_v58  ;;  %vm1636_vm14 = vweird.f32 %v3489_v6  ;;  %3500 = vpow2.f32 %v3343_v32 }
 0x2ed   : > { %v5267_v22 = vpop.eup %3492  ;;  %v5282_v58 = vsel %vm1956_vm15, 0.0, %v1960_v62  ;;  %v1691_v60 = vmul.f32 %v5261_v10, %v5218_v26  ;;  %vm1637_vm4 = vmor %vm1635_vm1, %vm1636_vm14  ;;  %v1642_v9 = vor.u32 1.1754944e-38, %v1641_v51  ;;  %v1438_v50 = vmul.f32 %v5115_v40, %v1388_v30 }
 0x2ee   : > { %v1632_v23 = vsub.f32 1.0, %v1631_v5  ;;  %v1920_v8 = vsel %vm5277_vm0, %v1859_v52, 0.0  ;;  %v2057_v45 = vrot.slane %v5270_v17, 1  ;;  %v2059_v12 = vrot.slane %v5273_v63, 1 }
 0x2ef   : > { %v3495_v44 = vpop.eup %3494  ;;  %v1706_v25 = vmul.f32 %v5267_v22, %v5229_v49  ;;  %v1445_v3 = vmul.f32 %v5115_v40, %v1409_v61  ;;  %v2056_v56 = vrot.slane %v5282_v58, 1  ;;  %v1692_v47 = vsub.f32 1.0, %v1691_v60 }
 0x2f0   : > { %v1633_v0 = vmul.f32 %v3489_v6, %v1632_v23  ;;  %v3497_v2 = vpop.eup %3496  ;;  %v5287_v24 = vadd.f32 1.0, %v3495_v44  ;;  %v5305_v34 = vadd.s32 4, %v5132_v38  ;;  %v1963_v16 = vrot.slane %v1920_v8, 7 }
 0x2f1   : > { %v5294_v39 = vpop.eup %3498  ;;  %v5300_v57 = vadd.f32 1.0, %v3497_v2  ;;  %v5308_v21 = vadd.f32 %v5120_v35, %v1438_v50  ;;  %v5315_v28 = vsel %vm504_vm2, %v2057_v45, %v2059_v12  ;;  %v5318_v14 = vsel %vm504_vm2, %v2056_v56, %v2057_v45 }
 0x2f2   : > { %v1634_v4 = vadd.f32 %v3489_v6, %v1633_v0  ;;  %v3501_v27 = vpop.eup %3500  ;;  %3502 = vrcp.f32 %v5287_v24  ;;  %v1721_v31 = vmul.f32 %v5294_v39, %v5257_v1  ;;  %v5324_v5 = vadd.f32 %v5120_v35, %v1445_v3  ;;  %2097 = vrot.lane.b32.xlu1 %v5315_v28, %s3668_s8  ;;  %2095 = vrot.lane.b32.xlu0 %v5318_v14, %s3668_s8 }
 0x2f3   : > { %v5321_v11 = vadd.f32 1.0, %v3501_v27  ;;  %v1707_v32 = vsub.f32 1.0, %v1706_v25  ;;  %3504 = vrcp.f32 %v5300_v57  ;;  %v3338_v41 = vmul.f32 -1.442695, %v5308_v21 }
 0x2f4   : > { %v1638_v54 = vsel %vm1637_vm4, %v3489_v6, %v1634_v4  ;;  %v1699_v6 = vand.u32 2147483647, %v5218_v26  ;;  %v1693_v62 = vmul.f32 %v5261_v10, %v1692_v47  ;;  %v1701_v23 = vand.u32 2147483648, %v5218_v26 }
 0x2f5   : > { %v1643_v18 = vsel %vm1640_vm8, %v1642_v9, %v1638_v54  ;;  %v5336_v15 = vsel %vm1956_vm15, 0.0, %v1963_v16  ;;  %v1722_v52 = vsub.f32 1.0, %v1721_v31  ;;  %3506 = vpow2.f32 %v3338_v41 }
 0x2f6   : > { %v1860_v7 = vmul.f32 %v1643_v18, %v5167_v55  ;;  %3508 = vrcp.f32 %v5321_v11  ;;  %v3345_v60 = vmul.f32 -1.442695, %v5324_v5  ;;  %vm1695_vm10 = vweird.f32 %v5218_v26 }
 0x2f7   : > { %v1708_v4 = vmul.f32 %v5267_v22, %v1707_v32  ;;  %v5357_v2 = vadd.s32 5, %v5132_v38  ;;  %v2061_v9 = vrot.slane %v5336_v15, 1  ;;  %vm1696_vm11 = vweird.f32 %v5261_v10 }
 0x2f8   : > { %v1921_v55 = vsel %vm5277_vm0, %v1860_v7, 0.0  ;;  %v5341_v61 = vpop.eup %3502  ;;  %vm5361_vm12 = vcmp.eq.f32.partialorder %v1699_v6, 8.507059e+37  ;;  %v1716_v8 = vand.u32 2147483648, %v5229_v49  ;;  %v1694_v12 = vadd.f32 %v5261_v10, %v1693_v62  ;;  %vm5389_vm14 = vmor %vm1695_vm10, %vm1696_vm11 }
 0x2f9   : > { %v1412_v29 = vpop.f32.mrf.mxu2  ;;  %v1964_v33 = vrot.slane %v1921_v55, 7  ;;  %v1646_v44 = vmul.f32 %v5341_v61, %v5287_v24  ;;  %v5366_v45 = vpop.eup %3504  ;;  %v1702_v7 = vor.u32 1.1754944e-38, %v1701_v23  ;;  %vm1711_vm13 = vweird.f32 %v5267_v22 }
 0x2fa   : > { %v1446_v43 = vmul.f32 %v5115_v40, %v1412_v29  ;;  %v1723_v56 = vmul.f32 %v5294_v39, %v1722_v52  ;;  %3510 = vpow2.f32 %v3345_v60  ;;  %vm1710_vm0 = vweird.f32 %v5229_v49 }
 0x2fb   : > { %v5339_v51 = vsel %vm1956_vm15, %v1963_v16, %v1964_v33  ;;  %v5348_v46 = vsel %vm1956_vm15, %v1964_v33, 0.0  ;;  %v1647_v54 = vsub.f32 1.0, %v1646_v44  ;;  %v3507_v47 = vpop.eup %3506  ;;  %v1709_v16 = vadd.f32 %v5267_v22, %v1708_v4  ;;  %vm5410_vm10 = vmor %vm1710_vm0, %vm1711_vm13 }
 0x2fc   : > { %v5344_v0 = vadd.f32 %v5120_v35, %v1446_v43  ;;  %v2062_v30 = vrot.slane %v5339_v51, 1  ;;  %v2064_v18 = vrot.slane %v5348_v46, 1  ;;  %v5383_v55 = vpop.eup %3508  ;;  %vm1891_vm1 = vcmp.ge.s32.totalorder %v5357_v2, 0 }
 0x2fd   : > { %v1648_v29 = vmul.f32 %v5341_v61, %v1647_v54  ;;  %vm1901_vm4 = vcmp.lt.s32.totalorder %v5357_v2, 16  ;;  %v1751_v33 = vmul.f32 %v5366_v45, %v5300_v57  ;;  %v5398_v32 = vadd.f32 1.0, %v3507_v47 }
 0x2fe   : > { %v3346_v25 = vmul.f32 -1.442695, %v5344_v0  ;;  %v5372_v3 = vsel %vm504_vm2, %v2061_v9, %v2062_v30  ;;  %v5381_v31 = vsel %vm504_vm2, %v2062_v30, %v2064_v18  ;;  %v1698_v41 = vsel %vm5389_vm14, %v5261_v10, %v1694_v12 }
 0x2ff   : > { %2099 = vrot.lane.b32.xlu2 %v5372_v3, %s3668_s8  ;;  %2101 = vrot.lane.b32.xlu0 %v5381_v31, %s3668_s8  ;;  %v1714_v43 = vand.u32 2147483647, %v5229_v49  ;;  %v1717_v62 = vor.u32 1.1754944e-38, %v1716_v8  ;;  %vm1725_vm8 = vweird.f32 %v5257_v1  ;;  %v1724_v52 = vadd.f32 %v5294_v39, %v1723_v56 }
 0x300   : > { %3512 = vpow2.f32 %v3346_v25  ;;  %vm1726_vm11 = vweird.f32 %v5294_v39  ;;  %v1713_v49 = vsel %vm5410_vm10, %v5267_v22, %v1709_v16  ;;  %v1736_v10 = vmul.f32 %v5383_v55, %v5321_v11  ;;  %v3511_v44 = vpop.eup %3510 }
 0x301   : > { %3514 = vrcp.f32 %v5398_v32  ;;  %v1649_v30 = vadd.f32 %v5341_v61, %v1648_v29  ;;  %vm1651_vm13 = vweird.f32 %v5341_v61  ;;  %v1731_v60 = vand.u32 2147483648, %v5257_v1  ;;  %vm5438_vm0 = vmor %vm1725_vm8, %vm1726_vm11 }
 0x302   : > { %v1391_v27 = vpop.f32.mrf.mxu0  ;;  %v1752_v4 = vsub.f32 1.0, %v1751_v33  ;;  %v1656_v9 = vand.u32 2147483648, %v5287_v24  ;;  %v5432_v22 = vsel %vm5361_vm12, %v1702_v7, %v1698_v41  ;;  %vm1715_vm14 = vcmp.eq.f32.partialorder %v1714_v43, 8.507059e+37  ;;  %vm5480_vm11 = vmand %vm1891_vm1, %vm1901_vm4 }
 0x303   : > { %v1439_v26 = vmul.f32 %v5115_v40, %v1391_v27  ;;  %v1729_v40 = vand.u32 2147483647, %v5257_v1  ;;  %vm1650_vm10 = vweird.f32 %v5287_v24  ;;  %v1654_v25 = vand.u32 2147483647, %v5287_v24 }
 0x304   : > { %v1728_v50 = vsel %vm5438_vm0, %v5294_v39, %v1724_v52  ;;  %vm5453_vm9 = vmor %vm1650_vm10, %vm1651_vm13  ;;  %v1879_v27 = vadd.s32 3, %v5132_v38  ;;  %v1737_v7 = vsub.f32 1.0, %v1736_v10  ;;  %v1732_v16 = vor.u32 1.1754944e-38, %v1731_v60 }
 0x305   : > { %v5428_v8 = vadd.f32 %v5120_v35, %v1439_v26  ;;  %v1718_v35 = vsel %vm1715_vm14, %v1717_v62, %v1713_v49  ;;  %vm5447_vm12 = vcmp.eq.f32.partialorder %v1729_v40, 8.507059e+37  ;;  %v1653_v24 = vsel %vm5453_vm9, %v5341_v61, %v1649_v30 }
 0x306   : > { %v3513_v54 = vpop.eup %3512  ;;  %v1753_v29 = vmul.f32 %v5366_v45, %v1752_v4  ;;  %v1657_v6 = vor.u32 1.1754944e-38, %v1656_v9  ;;  %v5465_v33 = vadd.f32 1.0, %v3511_v44  ;;  %v5468_v26 = vmul.f32 %v1718_v35, %v5175_v20 }
 0x307   : > { %v5461_v56 = vadd.f32 1.0, %v3513_v54  ;;  %v3339_v39 = vmul.f32 -1.442695, %v5428_v8  ;;  %v3515_v47 = vpop.eup %3514  ;;  %v5471_v41 = vadd.s32 6, %v5132_v38  ;;  %vm1655_vm8 = vcmp.eq.f32.partialorder %v1654_v25, 8.507059e+37 }
 0x308   : > { %v1661_v61 = vmul.f32 %v3515_v47, %v5398_v32  ;;  %v1733_v43 = vsel %vm5447_vm12, %v1732_v16, %v1728_v50  ;;  %v1658_v62 = vsel %vm1655_vm8, %v1657_v6, %v1653_v24  ;;  %vm1889_vm9 = vcmp.ge.s32.totalorder %v1879_v27, 0 }
 0x309   : > { %3516 = vpow2.f32 %v3339_v39  ;;  %v1738_v20 = vmul.f32 %v5383_v55, %v1737_v7  ;;  %vm1899_vm13 = vcmp.lt.s32.totalorder %v1879_v27, 16  ;;  %v1754_v40 = vadd.f32 %v5366_v45, %v1753_v29 }
 0x30a   : > { %v1662_v52 = vsub.f32 1.0, %v1661_v61  ;;  %3518 = vrcp.f32 %v5461_v56  ;;  %vm1756_vm14 = vweird.f32 %v5366_v45  ;;  %v1671_v49 = vand.u32 2147483648, %v5398_v32  ;;  %vm5502_vm12 = vmand %vm1889_vm9, %vm1899_vm13 }
 0x30b   : > { %3520 = vrcp.f32 %v5465_v33  ;;  %vm1890_vm0 = vcmp.ge.s32.totalorder %v5305_v34, 0  ;;  %vm1900_vm1 = vcmp.lt.s32.totalorder %v5305_v34, 16  ;;  %v1861_v2 = vmul.f32 %v1658_v62, %v5226_v13 }
 0x30c   : > { %v1663_v10 = vmul.f32 %v3515_v47, %v1662_v52  ;;  %vm1666_vm4 = vweird.f32 %v3515_v47  ;;  %v1669_v30 = vand.u32 2147483647, %v5398_v32  ;;  %v1926_v44 = vsel %vm5480_vm11, %v5468_v26, 0.0 }
 0x30d   : > { %v1866_v60 = vmul.f32 %v1733_v43, %v5190_v42  ;;  %vm1755_vm10 = vweird.f32 %v5300_v57  ;;  %v1761_v4 = vand.u32 2147483648, %v5300_v57  ;;  %v1746_v13 = vand.u32 2147483648, %v5321_v11 }
 0x30e   : > { %vm5509_vm8 = vmor %vm1755_vm10, %vm1756_vm14  ;;  %v1759_v42 = vand.u32 2147483647, %v5300_v57  ;;  %v1664_v12 = vadd.f32 %v3515_v47, %v1663_v10  ;;  %vm1665_vm7 = vweird.f32 %v5398_v32  ;;  %v1739_v35 = vadd.f32 %v5383_v55, %v1738_v20 }
 0x30f   : > { %v3517_v25 = vpop.eup %3516  ;;  %vm1741_vm9 = vweird.f32 %v5383_v55  ;;  %v1758_v50 = vsel %vm5509_vm8, %v5366_v45, %v1754_v40  ;;  %vm1667_vm13 = vmor %vm1665_vm7, %vm1666_vm4  ;;  %v1672_v18 = vor.u32 1.1754944e-38, %v1671_v49  ;;  %v1922_v57 = vsel %vm5502_vm12, %v1861_v2, 0.0 }
 0x310   : > { %v5521_v1 = vpop.eup %3518  ;;  %v1668_v27 = vsel %vm1667_vm13, %v3515_v47, %v1664_v12  ;;  %vm1670_vm14 = vcmp.eq.f32.partialorder %v1669_v30, 8.507059e+37  ;;  %v5525_v32 = vadd.f32 1.0, %v3517_v25  ;;  %vm1740_vm10 = vweird.f32 %v5321_v11  ;;  %vm5561_vm13 = vmand %vm1890_vm0, %vm1900_vm1 }
 0x311   : > { %v5527_v7 = vpop.eup %3520  ;;  %v1744_v24 = vand.u32 2147483647, %v5321_v11  ;;  %v1762_v39 = vor.u32 1.1754944e-38, %v1761_v4  ;;  %v1673_v45 = vsel %vm1670_vm14, %v1672_v18, %v1668_v27  ;;  %v1927_v16 = vsel %vm5480_vm11, %v1866_v60, 0.0  ;;  %vm5535_vm7 = vmor %vm1740_vm10, %vm1741_vm9 }
 0x312   : > { %vm1760_vm4 = vcmp.eq.f32.partialorder %v1759_v42, 8.507059e+37  ;;  %v1862_v47 = vmul.f32 %v1673_v45, %v5308_v21  ;;  %3522 = vrcp.f32 %v5525_v32  ;;  %v1743_v11 = vsel %vm5535_vm7, %v5383_v55, %v1739_v35 }
 0x313   : > { %v1763_v6 = vsel %vm1760_vm4, %v1762_v39, %v1758_v50  ;;  %v1966_v26 = vrot.slane %v1922_v57, 7  ;;  %v1781_v61 = vmul.f32 %v5521_v1, %v5461_v56  ;;  %v1864_v43 = vmul.f32 %v5432_v22, %v5171_v37 }
 0x314   : > { %v1747_v62 = vor.u32 1.1754944e-38, %v1746_v13  ;;  %v1766_v23 = vmul.f32 %v5527_v7, %v5465_v33  ;;  %v1923_v21 = vsel %vm5502_vm12, %v1862_v47, 0.0  ;;  %vm1745_vm11 = vcmp.eq.f32.partialorder %v1744_v24, 8.507059e+37 }
 0x315   : > { %vm1892_vm8 = vcmp.ge.s32.totalorder %v5471_v41, 0  ;;  %vm1902_vm9 = vcmp.lt.s32.totalorder %v5471_v41, 16  ;;  %v1967_v55 = vrot.slane %v1923_v21, 7  ;;  %v1972_v20 = vrot.slane %v1926_v44, 7 }
 0x316   : > { %v5554_v52 = vrot.slane %v1927_v16, 7  ;;  %v1748_v40 = vsel %vm1745_vm11, %v1747_v62, %v1743_v11  ;;  %v1868_v49 = vmul.f32 %v1763_v6, %v5222_v19  ;;  %v5566_v22 = vsel %vm1956_vm15, 0.0, %v1966_v26  ;;  %vm5587_vm0 = vmand %vm1892_vm8, %vm1902_vm9 }
 0x317   : > { %v5569_v2 = vsel %vm1956_vm15, %v1966_v26, %v1967_v55  ;;  %v5572_v10 = vsel %vm1956_vm15, %v1967_v55, 0.0  ;;  %v1782_v30 = vsub.f32 1.0, %v1781_v61  ;;  %v1767_v19 = vsub.f32 1.0, %v1766_v23 }
 0x318   : > { %v3523_v44 = vpop.eup %3522  ;;  %v2067_v60 = vrot.slane %v5569_v2, 1  ;;  %v2069_v4 = vrot.slane %v5572_v10, 1  ;;  %v1925_v9 = vsel %vm5561_vm13, %v1864_v43, 0.0  ;;  %v5580_v13 = vsel %vm1956_vm15, 0.0, %v1972_v20 }
 0x319   : > { %v1676_v34 = vmul.f32 %v3523_v44, %v5525_v32  ;;  %v1867_v54 = vmul.f32 %v1748_v40, %v5240_v36  ;;  %v2066_v12 = vrot.slane %v5566_v22, 1  ;;  %v5594_v25 = vsel %vm1956_vm15, %v1972_v20, %v5554_v52 }
 0x31a   : > { %v1929_v35 = vsel %vm5587_vm0, %v1868_v49, 0.0  ;;  %v1783_v50 = vmul.f32 %v5521_v1, %v1782_v30  ;;  %v1768_v18 = vmul.f32 %v5527_v7, %v1767_v19  ;;  %v1686_v41 = vand.u32 2147483648, %v5525_v32 }
 0x31b   : > { %v1677_v36 = vsub.f32 1.0, %v1676_v34  ;;  %v5602_v57 = vsel %vm504_vm2, %v2067_v60, %v2069_v4  ;;  %v5605_v27 = vsel %vm504_vm2, %v2066_v12, %v2067_v60  ;;  %v1970_v24 = vrot.slane %v1925_v9, 7 }
 0x31c   : > { %vm1681_vm1 = vweird.f32 %v3523_v44  ;;  %v1684_v45 = vand.u32 2147483647, %v5525_v32  ;;  %2105 = vrot.lane.b32.xlu2 %v5602_v57, %s3668_s8  ;;  %2103 = vrot.lane.b32.xlu1 %v5605_v27, %s3668_s8  ;;  %v1928_v16 = vsel %vm5587_vm0, %v1867_v54, 0.0  ;;  %v1976_v29 = vrot.slane %v1929_v35, 7 }
 0x31d   : > { %v1678_v39 = vmul.f32 %v3523_v44, %v1677_v36  ;;  %v2076_v47 = vrot.slane %v5580_v13, 1  ;;  %v2077_v11 = vrot.slane %v5594_v25, 1  ;;  %v1784_v6 = vadd.f32 %v5521_v1, %v1783_v50 }
 0x31e   : > { %vm1786_vm12 = vweird.f32 %v5521_v1  ;;  %vm1680_vm14 = vweird.f32 %v5525_v32  ;;  %v1769_v61 = vadd.f32 %v5527_v7, %v1768_v18  ;;  %vm1771_vm10 = vweird.f32 %v5527_v7 }
 0x31f   : > { %v1679_v26 = vadd.f32 %v3523_v44, %v1678_v39  ;;  %v1791_v43 = vand.u32 2147483648, %v5461_v56  ;;  %vm1682_vm7 = vmor %vm1680_vm14, %vm1681_vm1  ;;  %v1687_v62 = vor.u32 1.1754944e-38, %v1686_v41  ;;  %vm1785_vm4 = vweird.f32 %v5461_v56 }
 0x320   : > { %v1789_v23 = vand.u32 2147483647, %v5461_v56  ;;  %vm1685_vm11 = vcmp.eq.f32.partialorder %v1684_v45, 8.507059e+37  ;;  %v1975_v55 = vrot.slane %v1928_v16, 7  ;;  %v1776_v20 = vand.u32 2147483648, %v5465_v33  ;;  %vm5629_vm8 = vmor %vm1785_vm4, %vm1786_vm12 }
 0x321   : > { %v1683_v21 = vsel %vm1682_vm7, %v3523_v44, %v1679_v26  ;;  %v1883_v32 = vadd.s32 7, %v5132_v38  ;;  %vm1770_vm9 = vweird.f32 %v5465_v33  ;;  %v1774_v30 = vand.u32 2147483647, %v5465_v33 }
 0x322   : > { %v1688_v49 = vsel %vm1685_vm11, %v1687_v62, %v1683_v21  ;;  %v1788_v56 = vsel %vm5629_vm8, %v5521_v1, %v1784_v6  ;;  %v5640_v19 = vsel %vm1956_vm15, %v1975_v55, %v1976_v29  ;;  %vm5644_vm0 = vmor %vm1770_vm9, %vm1771_vm10  ;;  %v1792_v34 = vor.u32 1.1754944e-38, %v1791_v43 }
 0x323   : > { %v1863_v44 = vmul.f32 %v1688_v49, %v5428_v8  ;;  %v5651_v33 = vsel %vm504_vm2, %v2076_v47, %v2077_v11  ;;  %v5654_v4 = vsel %vm1956_vm15, %v1976_v29, 0.0  ;;  %v1773_v8 = vsel %vm5644_vm0, %v5527_v7, %v1769_v61 }
 0x324   : > { %vm1790_vm1 = vcmp.eq.f32.partialorder %v1789_v23, 8.507059e+37  ;;  %2111 = vrot.lane.b32.xlu2 %v5651_v33, %s3668_s8  ;;  %v5664_v9 = vsel %vm1956_vm15, %v1970_v24, 0.0  ;;  %v1777_v54 = vor.u32 1.1754944e-38, %v1776_v20  ;;  %vm1775_vm12 = vcmp.eq.f32.partialorder %v1774_v30, 8.507059e+37 }
 0x325   : > { %v1924_v1 = vsel %vm5561_vm13, %v1863_v44, 0.0  ;;  %v1793_v42 = vsel %vm1790_vm1, %v1792_v34, %v1788_v56  ;;  %vm1893_vm14 = vcmp.ge.s32.totalorder %v1883_v32, 0  ;;  %v2082_v35 = vrot.slane %v5640_v19, 1 }
 0x326   : > { %v1969_v12 = vrot.slane %v1924_v1, 7  ;;  %v1778_v50 = vsel %vm1775_vm12, %v1777_v54, %v1773_v8  ;;  %v2084_v36 = vrot.slane %v5654_v4, 1  ;;  %vm1903_vm13 = vcmp.lt.s32.totalorder %v1883_v32, 16 }
 0x327   : > { %v1870_v18 = vmul.f32 %v1793_v42, %v5344_v0  ;;  %v2074_v39 = vrot.slane %v5664_v9, 1  ;;  %v1869_v16 = vmul.f32 %v1778_v50, %v5324_v5  ;;  %vm1913_vm10 = vmand %vm1893_vm14, %vm1903_vm13  ;;  %v5694_v5 = vsel %vm1956_vm15, %v5554_v52, 0.0 }
 0x328   : > { %v5668_v7 = vsel %vm1956_vm15, %v1969_v12, %v1970_v24  ;;  %v5671_v37 = vsel %vm1956_vm15, 0.0, %v1969_v12  ;;  %v5683_v24 = vsel %vm504_vm2, %v2082_v35, %v2084_v36  ;;  %v5697_v6 = vsel %vm1956_vm15, 0.0, %v1975_v55 }
 0x329   : > { %v2072_v41 = vrot.slane %v5668_v7, 1  ;;  %v2071_v45 = vrot.slane %v5671_v37, 1  ;;  %v1931_v47 = vsel %vm1913_vm10, %v1870_v18, 0.0  ;;  %v1930_v26 = vsel %vm1913_vm10, %v1869_v16, 0.0 }
 0x32a   : > { %v1979_v61 = vrot.slane %v1931_v47, 7  ;;  %v2140_v43 = vrot.slane %v5157_v48, 2  ;;  %v2081_v62 = vrot.slane %v5697_v6, 1  ;;  %v2079_v23 = vrot.slane %v5694_v5, 1 }
 0x32b   : > { %v5680_v29 = vsel %vm504_vm2, %v2072_v41, %v2074_v39  ;;  %v5690_v0 = vsel %vm504_vm2, %v2071_v45, %v2072_v41  ;;  %v1978_v21 = vrot.slane %v1930_v26, 7  ;;  %v2139_v20 = vrot.slane %v5160_v59, 2 }
 0x32c   : > { %2109 = vrot.lane.b32.xlu1 %v5680_v29, %s3668_s8  ;;  %2117 = vrot.lane.b32.xlu2 %v5683_v24, %s3668_s8  ;;  %v5706_v52 = vsel %vm504_vm2, %v2081_v62, %v2082_v35  ;;  %v2032_v32 = vsel %vm1956_vm15, %v1979_v61, 0.0  ;;  %v5719_v49 = vsel %vm504_vm2, %v2077_v11, %v2079_v23  ;;  %v2145_v60 = vrot.slane %v5270_v17, 2 }
 0x32d   : > { %2107 = vrot.lane.b32.xlu0 %v5690_v0, %s3668_s8  ;;  %v5709_v55 = vsel %vm1956_vm15, %v1978_v21, %v1979_v61  ;;  %v2141_v40 = vsel %vm615_vm3, %v2139_v20, %v2140_v43  ;;  %v2089_v56 = vrot.slane %v2032_v32, 1  ;;  %v5725_v44 = vsel %vm1956_vm15, 0.0, %v1978_v21 }
 0x32e   : > { %v2087_v30 = vrot.slane %v5709_v55, 1  ;;  %v2147_v34 = vrot.slane %v5273_v63, 2  ;;  %v2086_v1 = vrot.slane %v5725_v44, 1  ;;  %v2155_v63 = vrot.slane %v5569_v2, 2 }
 0x32f   : > { %v2144_v42 = vrot.slane %v5282_v58, 2  ;;  %v2142_v12 = vrot.slane %v5152_v53, 2  ;;  %v2154_v35 = vrot.slane %v5566_v22, 2  ;;  %v2150_v41 = vrot.slane %v5339_v51, 2 }
 0x330   : > { %v5730_v8 = vsel %vm504_vm2, %v2087_v30, %v2089_v56  ;;  %v5734_v11 = vsel %vm615_vm3, %v2145_v60, %v2147_v34  ;;  %v5741_v54 = vsel %vm504_vm2, %v2086_v1, %v2087_v30  ;;  %v2152_v53 = vrot.slane %v5348_v46, 2 }
 0x331   : > { %v2146_v50 = vsel %vm615_vm3, %v2144_v42, %v2145_v60  ;;  %v5751_v36 = vsel %vm615_vm3, %v2154_v35, %v2155_v63  ;;  %v2143_v18 = vsel %vm615_vm3, %v2140_v43, %v2142_v12  ;;  %v2160_v39 = vrot.slane %v5668_v7, 2  ;;  %v5827_v35 = vpop.permute.xlu2 %2093 }
 0x332   : > { %v2162_v45 = vrot.slane %v5664_v9, 2  ;;  %v5763_v16 = vsel %vm615_vm3, %v2150_v41, %v2152_v53  ;;  %v2149_v47 = vrot.slane %v5336_v15, 2  ;;  %v2159_v9 = vrot.slane %v5671_v37, 2 }
 0x333   : > { %v2170_v61 = vrot.slane %v5640_v19, 2  ;;  %v2157_v43 = vrot.slane %v5572_v10, 2  ;;  %v2169_v62 = vrot.slane %v5697_v6, 2  ;;  %v2165_v10 = vrot.slane %v5594_v25, 2 }
 0x334   : > { %2115 = vrot.lane.b32.xlu1 %v5706_v52, %s3668_s8  ;;  %2179 = vrot.lane.b32.xlu2 %v2141_v40, %s3660_s23  ;;  %v5767_v26 = vsel %vm615_vm3, %v2160_v39, %v2162_v45  ;;  %v2151_v46 = vsel %vm615_vm3, %v2149_v47, %v2150_v41  ;;  %v5780_v23 = vsel %vm615_vm3, %v2159_v9, %v2160_v39  ;;  %v2167_v40 = vrot.slane %v5694_v5, 2  ;;  %v1415_v39 = vpop.f32.mrf.mxu2 }
 0x335   : > { %2113 = vrot.lane.b32.xlu0 %v5719_v49, %s3668_s8  ;;  %v5783_v21 = vsel %vm615_vm3, %v2169_v62, %v2170_v61  ;;  %v5790_v20 = vsel %vm615_vm3, %v2155_v63, %v2157_v43  ;;  %v2175_v30 = vrot.slane %v5709_v55, 2  ;;  %v2177_v56 = vrot.slane %v2032_v32, 2 }
 0x336   : > { %v5798_v60 = vsel %vm615_vm3, %v2165_v10, %v2167_v40  ;;  %v2164_v34 = vrot.slane %v5580_v13, 2  ;;  %v2174_v5 = vrot.slane %v5725_v44, 2  ;;  %v2172_v32 = vrot.slane %v5654_v4, 2 }
 0x337   : > { %v5802_v1 = vsel %vm615_vm3, %v2175_v30, %v2177_v56  ;;  %vm2539_vm7 = vcmask 15360   ;;  %vm2723_vm8 = vcmask 1041408  }
 0x338   : > { %v5809_v63 = vsel %vm615_vm3, %v2164_v34, %v2165_v10  ;;  %v5816_v42 = vsel %vm615_vm3, %v2174_v5, %v2175_v30  ;;  %v5823_v12 = vsel %vm615_vm3, %v2170_v61, %v2172_v32  ;;  %v5902_v34 = vld [vmem:[%s6548_s3] ss:$0 sm:$0xff] }
 0x33c   : > { %2121 = vrot.lane.b32.xlu1 %v5730_v8, %s3668_s8  ;;  %2185 = vrot.lane.b32.xlu2 %v5734_v11, %s3660_s23 }
 0x33d   : > { %2119 = vrot.lane.b32.xlu0 %v5741_v54, %s3668_s8 }
 0x344   : > { %2183 = vrot.lane.b32.xlu1 %v2146_v50, %s3660_s23  ;;  %2191 = vrot.lane.b32.xlu2 %v5751_v36, %s3660_s23 }
 0x345   : > { %2181 = vrot.lane.b32.xlu0 %v2143_v18, %s3660_s23 }
 0x34c   : > { %2189 = vrot.lane.b32.xlu1 %v5763_v16, %s3660_s23  ;;  %2197 = vrot.lane.b32.xlu2 %v5767_v26, %s3660_s23 }
 0x34d   : > { %2187 = vrot.lane.b32.xlu0 %v2151_v46, %s3660_s23 }
 0x354   : > { %2195 = vrot.lane.b32.xlu1 %v5780_v23, %s3660_s23  ;;  %2203 = vrot.lane.b32.xlu2 %v5783_v21, %s3660_s23 }
 0x355   : > { %2193 = vrot.lane.b32.xlu0 %v5790_v20, %s3660_s23 }
 0x359   : > { %v5834_v4 = vpop.permute.xlu2 %2099 }
 0x35c   : > { %2201 = vrot.lane.b32.xlu1 %v5798_v60, %s3660_s23  ;;  %2209 = vrot.lane.b32.xlu2 %v5802_v1, %s3660_s23 }
 0x35d   : > { %2199 = vrot.lane.b32.xlu0 %v5809_v63, %s3660_s23 }
 0x364   : > { %2207 = vrot.lane.b32.xlu1 %v5816_v42, %s3660_s23  ;;  %2232 = vrot.lane.b32.xlu2 %v5336_v15, %s3669_s11 }
 0x365   : > { %2205 = vrot.lane.b32.xlu0 %v5823_v12, %s3660_s23  ;;  %s3671_s23 = smov 14  }
 0x36c   : > { %2230 = vrot.lane.b32.xlu1 %v5270_v17, %s3669_s11  ;;  %2335 = vrot.lane.b32.xlu2 %v2146_v50, %s3670_s16 }
 0x36d   : > { %2228 = vrot.lane.b32.xlu0 %v5282_v58, %s3669_s11 }
 0x374   : > { %2282 = vrot.lane.b32.xlu1 %v5318_v14, %s3661_s25  ;;  %2491 = vrot.lane.b32.xlu2 %v2151_v46, %s3663_s10  ;;  %v5855_v14 = vpop.permute.xlu1 %2091 }
 0x375   : > { %2234 = vrot.lane.b32.xlu0 %v5339_v51, %s3669_s11 }
 0x376   : > { %v5841_v18 = vpop.permute.xlu2 %2105 }
 0x37c   : > { %2438 = vrot.lane.b32.xlu1 %v5372_v3, %s3671_s23  ;;  %2386 = vrot.lane.b32.xlu2 %v5339_v51, %s3662_s9  ;;  %v2098_v53 = vpop.permute.xlu1 %2097 }
 0x37d   : > { %2384 = vrot.lane.b32.xlu0 %v5336_v15, %s3662_s9  ;;  %v2543_v45 = vsel %vm2539_vm7, %v5270_v17, %v2098_v53 }
 0x37e   : > { %v5849_v50 = vpop.permute.xlu2 %2111 }
 0x384   : > { %2337 = vrot.lane.b32.xlu1 %v5734_v11, %s3670_s16  ;;  %2286 = vrot.lane.b32.xlu2 %v5372_v3, %s3661_s25  ;;  %v2096_v3 = vpop.permute.xlu0 %2095 }
 0x385   : > { %2284 = vrot.lane.b32.xlu0 %v5315_v28, %s3661_s25 }
 0x386   : > { %v5859_v41 = vpop.permute.xlu2 %2117 }
 0x38c   : > { %2493 = vrot.lane.b32.xlu1 %v5763_v16, %s3663_s10  ;;  %2442 = vrot.lane.b32.xlu2 %v5605_v27, %s3671_s23  ;;  %v2102_v9 = vpop.permute.xlu0 %2101 }
 0x38d   : > { %2440 = vrot.lane.b32.xlu0 %v5381_v31, %s3671_s23 }
 0x38e   : > { %v5867_v11 = vpop.permute.xlu2 %2179  ;;  %v2104_v28 = vpop.permute.xlu1 %2103 }
 0x38f   : > { %v2546_v62 = vsel %vm2539_vm7, %v5566_v22, %v2104_v28 }
 0x394   : > { %2388 = vrot.lane.b32.xlu1 %v5566_v22, %s3662_s9  ;;  %2248 = vrot.lane.b32.xlu2 %v5697_v6, %s3669_s11 }
 0x395   : > { %2339 = vrot.lane.b32.xlu0 %v2151_v46, %s3670_s16  ;;  %v1418_v46 = vpop.f32.mrf.mxu2 }
 0x396   : > { %v2186_v47 = vpop.permute.xlu2 %2185 }
 0x397   : > { %v5877_v61 = vsel %vm1112_vm5, %v2543_v45, %v2186_v47 }
 0x39c   : > { %2288 = vrot.lane.b32.xlu1 %v5381_v31, %s3661_s25  ;;  %2390 = vrot.lane.b32.xlu2 %v5569_v2, %s3662_s9  ;;  %v5893_v31 = vld [vmem:[%s6547_s2] ss:$0 sm:$0xff] }
 0x39d   : > { %2495 = vrot.lane.b32.xlu0 %v5751_v36, %s3663_s10  ;;  %v1447_v30 = vmul.f32 %v5893_v31, %v1415_v39  ;;  %v1448_v56 = vmul.f32 %v5893_v31, %v1418_v46 }
 0x39e   : > { %v2110_v43 = vpop.permute.xlu1 %2109  ;;  %v2192_v17 = vpop.permute.xlu2 %2191 }
 0x39f   : > { %v5888_v10 = vsel %vm1112_vm5, %v2546_v62, %v2192_v17  ;;  %v2108_v40 = vpop.permute.xlu0 %2107  ;;  %v5905_v5 = vadd.f32 %v5902_v34, %v1447_v30  ;;  %v2549_v32 = vsel %vm2539_vm7, %v5668_v7, %v2110_v43  ;;  %v5912_v53 = vadd.f32 %v5902_v34, %v1448_v56 }
 0x3a0   : > { %6737 = vst [vmem:[#allocation46_spill] sm:$0xff] %v5888_v10 }
 0x3a1   : > { %v3347_v46 = vmul.f32 -1.442695, %v5905_v5  ;;  %v3348_v62 = vmul.f32 -1.442695, %v5912_v53 }
 0x3a3   : > { %3524 = vpow2.f32 %v3347_v46 }
 0x3a4   : > { %2302 = vrot.lane.b32.xlu1 %v5706_v52, %s3661_s25  ;;  %2404 = vrot.lane.b32.xlu2 %v5725_v44, %s3662_s9  ;;  %3526 = vpow2.f32 %v3348_v62  ;;  %v2542_v62 = vsel %vm2539_vm7, %v5282_v58, %v2096_v3 }
 0x3a5   : > { %2341 = vrot.lane.b32.xlu0 %v5763_v16, %s3670_s16 }
 0x3a6   : > { %v2116_v28 = vpop.permute.xlu1 %2115  ;;  %v2198_v39 = vpop.permute.xlu2 %2197 }
 0x3a7   : > { %v5917_v45 = vsel %vm1112_vm5, %v2549_v32, %v2198_v39  ;;  %v2114_v47 = vpop.permute.xlu0 %2113  ;;  %v2552_v16 = vsel %vm2539_vm7, %v5697_v6, %v2116_v28 }
 0x3a8   : > { %6738 = vst [vmem:[#allocation12_spill] sm:$0xff] %v5917_v45 }
 0x3a9   : > { %v3525_v32 = vpop.eup %3524 }
 0x3aa   : > { %v3527_v39 = vpop.eup %3526  ;;  %v5940_v46 = vadd.f32 1.0, %v3525_v32 }
 0x3ac   : > { %2444 = vrot.lane.b32.xlu1 %v5602_v57, %s3671_s23  ;;  %2511 = vrot.lane.b32.xlu2 %v5816_v42, %s3663_s10  ;;  %3528 = vrcp.f32 %v5940_v46  ;;  %vm1800_vm9 = vweird.f32 %v5940_v46 }
 0x3ad   : > { %2355 = vrot.lane.b32.xlu0 %v5783_v21, %s3670_s16 }
 0x3ae   : > { %v2122_v43 = vpop.permute.xlu1 %2121  ;;  %v2204_v17 = vpop.permute.xlu2 %2203 }
 0x3af   : > { %v5930_v30 = vsel %vm1112_vm5, %v2552_v16, %v2204_v17  ;;  %v5932_v56 = vpop.permute.xlu0 %2119  ;;  %v2555_v28 = vsel %vm2539_vm7, %v5709_v55, %v2122_v43  ;;  %v5946_v17 = vadd.f32 1.0, %v3527_v39 }
 0x3b0   : > { %6739 = vst [vmem:[#allocation4_spill] sm:$0xff] %v5930_v30  ;;  %v2541_v30 = vsel %vm2539_vm7, %v5157_v48, %v5827_v35  ;;  %v2545_v48 = vsel %vm2539_vm7, %v5339_v51, %v2102_v9  ;;  %v2548_v9 = vsel %vm2539_vm7, %v5671_v37, %v2108_v40 }
 0x3b1   : > { %3530 = vrcp.f32 %v5946_v17  ;;  %vm1815_vm1 = vweird.f32 %v5946_v17 }
 0x3b4   : > { %2458 = vrot.lane.b32.xlu1 %v5741_v54, %s3671_s23  ;;  %2250 = vrot.lane.b32.xlu2 %v5640_v19, %s3669_s11 }
 0x3b5   : > { %2497 = vrot.lane.b32.xlu0 %v5790_v20, %s3663_s10 }
 0x3b6   : > { %v2184_v16 = vpop.permute.xlu1 %2183  ;;  %v2210_v45 = vpop.permute.xlu2 %2209 }
 0x3b7   : > { %v5949_v10 = vsel %vm1112_vm5, %v2542_v62, %v2184_v16  ;;  %v5955_v43 = vsel %vm1112_vm5, %v2555_v28, %v2210_v45  ;;  %v2182_v32 = vpop.permute.xlu0 %2181 }
 0x3b8   : > { %6740 = vst [vmem:[#allocation29_spill] sm:$0xff] %v5955_v43  ;;  %v5958_v58 = vsel %vm1112_vm5, %v2541_v30, %v2182_v32  ;;  %v3529_v30 = vpop.eup %3528 }
 0x3b9   : > { %v3531_v28 = vpop.eup %3530  ;;  %v1796_v51 = vmul.f32 %v3529_v30, %v5940_v46  ;;  %vm1801_vm4 = vweird.f32 %v3529_v30 }
 0x3ba   : > { %vm1816_vm11 = vweird.f32 %v3531_v28  ;;  %vm1802_vm0 = vmor %vm1800_vm9, %vm1801_vm4  ;;  %vm2638_vm9 = vcmask 113664  }
 0x3bb   : > { %vm6032_vm12 = vmor %vm1815_vm1, %vm1816_vm11  ;;  %vm2674_vm1 = vcmask 146432  }
 0x3bc   : > { %2290 = vrot.lane.b32.xlu1 %v5605_v27, %s3661_s25  ;;  %2392 = vrot.lane.b32.xlu2 %v5671_v37, %s3662_s9  ;;  %v2544_v27 = vsel %vm2539_vm7, %v5336_v15, %v5834_v4  ;;  %v1797_v4 = vsub.f32 1.0, %v1796_v51 }
 0x3bd   : > { %2236 = vrot.lane.b32.xlu0 %v5566_v22, %s3669_s11  ;;  %v1811_v22 = vmul.f32 %v3531_v28, %v5946_v17 }
 0x3be   : > { %v2190_v35 = vpop.permute.xlu1 %2189  ;;  %v5970_v3 = vpop.permute.xlu2 %2232  ;;  %v1798_v40 = vmul.f32 %v3529_v30, %v1797_v4 }
 0x3bf   : > { %v5973_v45 = vsel %vm1112_vm5, %v2545_v48, %v2190_v35  ;;  %v2188_v39 = vpop.permute.xlu0 %2187  ;;  %v1812_v48 = vsub.f32 1.0, %v1811_v22  ;;  %v2547_v35 = vsel %vm2539_vm7, %v5569_v2, %v5841_v18  ;;  %v1806_v22 = vand.u32 2147483648, %v5940_v46 }
 0x3c0   : > { %v5979_v62 = vsel %vm1112_vm5, %v2544_v27, %v2188_v39  ;;  %v1799_v18 = vadd.f32 %v3529_v30, %v1798_v40  ;;  %v1821_v40 = vand.u32 2147483648, %v5946_v17 }
 0x3c1   : > { %v1813_v43 = vmul.f32 %v3531_v28, %v1812_v48  ;;  %v2550_v48 = vsel %vm2539_vm7, %v5580_v13, %v5849_v50  ;;  %v1819_v50 = vand.u32 2147483647, %v5946_v17  ;;  %v2672_v17 = vld [vmem:[%s6549_s4 + $0x8] sm:$0xff] }
 0x3c3   : > { %v1814_v4 = vadd.f32 %v3531_v28, %v1813_v43  ;;  %v1803_v43 = vsel %vm1802_vm0, %v3529_v30, %v1799_v18  ;;  %vm1820_vm13 = vcmp.eq.f32.partialorder %v1819_v50, 8.507059e+37  ;;  %v2554_v18 = vsel %vm2539_vm7, %v5725_v44, %v5932_v56 }
 0x3c4   : > { %2304 = vrot.lane.b32.xlu1 %v5683_v24, %s3661_s25  ;;  %2406 = vrot.lane.b32.xlu2 %v5709_v55, %s3662_s9  ;;  %vm6744_vm0 = vcmask 97280  }
 0x3c5   : > { %2343 = vrot.lane.b32.xlu0 %v5751_v36, %s3670_s16  ;;  %v2551_v36 = vsel %vm2539_vm7, %v5594_v25, %v2114_v47 }
 0x3c6   : > { %v2196_v15 = vpop.permute.xlu1 %2195  ;;  %v5991_v16 = vpop.permute.xlu2 %2335 }
 0x3c7   : > { %v5994_v32 = vsel %vm1112_vm5, %v2548_v9, %v2196_v15  ;;  %v2194_v27 = vpop.permute.xlu0 %2193 }
 0x3c8   : > { %6741 = vst [vmem:[#allocation36_spill] sm:$0xff] %v5994_v32  ;;  %v6000_v39 = vsel %vm1112_vm5, %v2547_v35, %v2194_v27  ;;  %v2673_v35 = vld [vmem:[%s6549_s4 + $0x10] sm:$0x3]  ;;  %v1804_v27 = vand.u32 2147483647, %v5940_v46  ;;  %v1884_v46 = vadd.s32 8, %v5132_v38 }
 0x3c9   : > { %3352 = vmatpush.msk.msra.mxu1 %vm2723_vm8, %v2673_v35  ;;  %3400 = vmatpush.msk.msrb.mxu3 %vm2723_vm8, %v2673_v35  ;;  %v1807_v32 = vor.u32 1.1754944e-38, %v1806_v22  ;;  %v1421_v35 = vpop.f32.mrf.mxu3  ;;  %vm2572_vm8 = vcmask 48128  }
 0x3ca   : > { %vm1805_vm14 = vcmp.eq.f32.partialorder %v1804_v27, 8.507059e+37  ;;  %vm1894_vm10 = vcmp.ge.s32.totalorder %v1884_v46, 0  ;;  %vm1904_vm4 = vcmp.lt.s32.totalorder %v1884_v46, 16 }
 0x3cb   : > { %v1808_v30 = vsel %vm1805_vm14, %v1807_v32, %v1803_v43  ;;  %2741 = vmatpush.msra.mxu1 %v2672_v17  ;;  %v2671_v32 = vld [vmem:[%s6549_s4] sm:$0xff]  ;;  %3401 = vmatpush.msrb.mxu3 %v2672_v17  ;;  %vm1914_vm11 = vmand %vm1894_vm10, %vm1904_vm4 }
 0x3cc   : > { %2446 = vrot.lane.b32.xlu1 %v5690_v0, %s3671_s23  ;;  %2513 = vrot.lane.b32.xlu2 %v5802_v1, %s3663_s10  ;;  %vm6746_vm14 = vmmov %vm6744_vm0 }
 0x3cd   : > { %2357 = vrot.lane.b32.xlu0 %v5823_v12, %s3670_s16  ;;  %2742 = vmatpush.msra.mxu1 %v2671_v32  ;;  %vm6748_vm10 = vmmov %vm6744_vm0 }
 0x3ce   : > { %v2202_v51 = vpop.permute.xlu1 %2201  ;;  %v6011_v9 = vpop.permute.xlu2 %2491  ;;  %3402 = vmatpush.msrb.mxu3 %v2671_v32 }
 0x3cf   : > { %v6014_v15 = vsel %vm1112_vm5, %v2551_v36, %v2202_v51  ;;  %v2200_v47 = vpop.permute.xlu0 %2199 }
 0x3d0   : > { %v6026_v36 = vsel %vm1112_vm5, %v2550_v48, %v2200_v47  ;;  %v1818_v48 = vsel %vm6032_vm12, %v3531_v28, %v1814_v4  ;;  %v1822_v47 = vor.u32 1.1754944e-38, %v1821_v40  ;;  %v1871_v40 = vmul.f32 %v1808_v30, %v5905_v5 }
 0x3d1   : > { %v1424_v5 = vpop.f32.mrf.mxu3  ;;  %vm6745_vm12 = vcmask 130048  }
 0x3d2   : > { %v1823_v22 = vsel %vm1820_vm13, %v1822_v47, %v1818_v48  ;;  %v1932_v51 = vsel %vm1914_vm11, %v1871_v40, 0.0  ;;  %v2540_v40 = vsel %vm2539_vm7, %v5160_v59, %v5855_v14  ;;  %vm6747_vm13 = vmmov %vm6745_vm12 }
 0x3d3   : > { %v1872_v43 = vmul.f32 %v1823_v22, %v5912_v53  ;;  %v1981_v47 = vrot.slane %v1932_v51, 7  ;;  %v1449_v53 = vmul.f32 %v5893_v31, %v1421_v35 }
 0x3d4   : > { %2460 = vrot.lane.b32.xlu1 %v5730_v8, %s3671_s23  ;;  %2252 = vrot.lane.b32.xlu2 %v5725_v44, %s3669_s11  ;;  %v2553_v44 = vsel %vm2539_vm7, %v5640_v19, %v5859_v41  ;;  %vm2605_vm7 = vcmask 80896  }
 0x3d5   : > { %2499 = vrot.lane.b32.xlu0 %v5780_v23, %s3663_s10  ;;  %v1933_v46 = vsel %vm1914_vm11, %v1872_v43, 0.0 }
 0x3d6   : > { %v2208_v28 = vpop.permute.xlu1 %2207  ;;  %v6051_v4 = vpop.permute.xlu2 %2386  ;;  %v6075_v30 = vrot.slane %v1933_v46, 7 }
 0x3d7   : > { %v6054_v27 = vsel %vm1112_vm5, %v2554_v18, %v2208_v28  ;;  %v2206_v56 = vpop.permute.xlu0 %2205  ;;  %v6080_v18 = vsel %vm1956_vm15, 0.0, %v1981_v47 }
 0x3d8   : > { %v6064_v50 = vsel %vm1112_vm5, %v2553_v44, %v2206_v56  ;;  %v6091_v28 = vsel %vm1956_vm15, %v1981_v47, %v6075_v30 }
 0x3d9   : > { %v2278_v46 = vrot.slane %v6091_v28, 1 }
 0x3dc   : > { %2292 = vrot.lane.b32.xlu1 %v5602_v57, %s3661_s25  ;;  %2394 = vrot.lane.b32.xlu2 %v5668_v7, %s3662_s9  ;;  %v1450_v57 = vmul.f32 %v5893_v31, %v1424_v5 }
 0x3dd   : > { %2238 = vrot.lane.b32.xlu0 %v5569_v2, %s3669_s11  ;;  %v6085_v2 = vadd.f32 %v5902_v34, %v1449_v53 }
 0x3de   : > { %v2231_v41 = vpop.permute.xlu1 %2230  ;;  %v6073_v48 = vpop.permute.xlu2 %2286  ;;  %v6094_v35 = vadd.f32 %v5902_v34, %v1450_v57  ;;  %v2330_v34 = vrot.slane %v6080_v18, 2 }
 0x3df   : > { %v2229_v17 = vpop.permute.xlu0 %2228  ;;  %v3349_v44 = vmul.f32 -1.442695, %v6085_v2 }
 0x3e0   : > { %v3350_v56 = vmul.f32 -1.442695, %v6094_v35 }
 0x3e1   : > { %3532 = vpow2.f32 %v3349_v44 }
 0x3e2   : > { %3534 = vpow2.f32 %v3350_v56 }
 0x3e4   : > { %2306 = vrot.lane.b32.xlu1 %v5741_v54, %s3661_s25  ;;  %2408 = vrot.lane.b32.xlu2 %v6080_v18, %s3662_s9  ;;  %v2331_v54 = vrot.slane %v6091_v28, 2 }
 0x3e5   : > { %2345 = vrot.lane.b32.xlu0 %v5790_v20, %s3670_s16  ;;  %v2556_v20 = vsel %vm1112_vm5, %v2540_v40, %v5867_v11 }
 0x3e6   : > { %v2283_v31 = vpop.permute.xlu1 %2282  ;;  %v6098_v22 = vpop.permute.xlu2 %2442  ;;  %v2573_v43 = vsel %vm2572_vm8, %v2556_v20, %v2229_v17  ;;  %v6115_v51 = vsel %vm615_vm3, %v2330_v34, %v2331_v54  ;;  %v2277_v17 = vrot.slane %v6080_v18, 1 }
 0x3e7   : > { %v6101_v32 = vpop.permute.xlu0 %2234  ;;  %v2589_v59 = vsel %vm1133_vm6, %v2573_v43, %v2283_v31  ;;  %v3533_v31 = vpop.eup %3532  ;;  %v2574_v43 = vsel %vm2572_vm8, %v5958_v58, %v2231_v41 }
 0x3e8   : > { %v2606_v5 = vsel %vm2605_vm7, %v2589_v59, %v5991_v16  ;;  %v6137_v44 = vsel %vm504_vm2, %v2277_v17, %v2278_v46  ;;  %v3535_v56 = vpop.eup %3534  ;;  %v6144_v16 = vadd.f32 1.0, %v3533_v31 }
 0x3e9   : > { %v6148_v40 = vadd.f32 1.0, %v3535_v56 }
 0x3ea   : > { %3536 = vrcp.f32 %v6144_v16 }
 0x3eb   : > { %3538 = vrcp.f32 %v6148_v40 }
 0x3ec   : > { %2448 = vrot.lane.b32.xlu1 %v5680_v29, %s3671_s23  ;;  %2515 = vrot.lane.b32.xlu2 %v6115_v51, %s3663_s10 }
 0x3ed   : > { %2359 = vrot.lane.b32.xlu0 %v5816_v42, %s3670_s16 }
 0x3ee   : > { %v2439_v14 = vpop.permute.xlu1 %2438  ;;  %v6124_v11 = vpop.permute.xlu2 %2248 }
 0x3ef   : > { %v2385_v47 = vpop.permute.xlu0 %2384 }
 0x3f0   : > { %v2622_v53 = vsel %vm6744_vm0, %v2606_v5, %v2385_v47  ;;  %v3537_v58 = vpop.eup %3536  ;;  %vm1830_vm0 = vweird.f32 %v6144_v16 }
 0x3f1   : > { %v2639_v57 = vsel %vm2638_vm9, %v2622_v53, %v2439_v14  ;;  %v3539_v17 = vpop.eup %3538  ;;  %vm1831_vm4 = vweird.f32 %v3537_v58 }
 0x3f2   : > { %v2655_v42 = vsel %vm6745_vm12, %v2639_v57, %v6011_v9  ;;  %v1826_v57 = vmul.f32 %v3537_v58, %v6144_v16  ;;  %v1841_v31 = vmul.f32 %v3539_v17, %v6148_v40  ;;  %vm1846_vm11 = vweird.f32 %v3539_v17 }
 0x3f3   : > { %3353 = vmatmul.msk.f32.vlgmr.msra.gmra.mxu1 %vm2674_vm1, %v2655_v42 }
 0x3f4   : > { %2462 = vrot.lane.b32.xlu1 %v6137_v44, %s3671_s23  ;;  %2254 = vrot.lane.b32.xlu2 %v5709_v55, %s3669_s11  ;;  %v1827_v42 = vsub.f32 1.0, %v1826_v57 }
 0x3f5   : > { %2501 = vrot.lane.b32.xlu0 %v5767_v26, %s3663_s10 }
 0x3f6   : > { %v2338_v9 = vpop.permute.xlu1 %2337  ;;  %v6150_v34 = vpop.permute.xlu2 %2390 }
 0x3f7   : > { %v2285_v20 = vpop.permute.xlu0 %2284 }
 0x3f8   : > { %v2590_v59 = vsel %vm1133_vm6, %v2574_v43, %v2285_v20  ;;  %v2575_v20 = vsel %vm2572_vm8, %v5949_v10, %v5970_v3 }
 0x3f9   : > { %v2607_v55 = vsel %vm2605_vm7, %v2590_v59, %v2338_v9  ;;  %v1842_v9 = vsub.f32 1.0, %v1841_v31  ;;  %v1834_v31 = vand.u32 2147483647, %v6144_v16 }
 0x3fa   : > { %v2623_v41 = vsel %vm6746_vm14, %v2607_v55, %v6051_v4  ;;  %v1828_v55 = vmul.f32 %v3537_v58, %v1827_v42  ;;  %vm1832_vm14 = vmor %vm1830_vm0, %vm1831_vm4 }
 0x3fb   : > { %vm1835_vm4 = vcmp.eq.f32.partialorder %v1834_v31, 8.507059e+37 }
 0x3fc   : > { %2294 = vrot.lane.b32.xlu1 %v5690_v0, %s3661_s25  ;;  %2396 = vrot.lane.b32.xlu2 %v5580_v13, %s3662_s9 }
 0x3fd   : > { %2240 = vrot.lane.b32.xlu0 %v5671_v37, %s3669_s11  ;;  %v2033_v37 = vsel %vm1956_vm15, %v6075_v30, 0.0  ;;  %v2591_v30 = vsel %vm1133_vm6, %v2575_v20, %v6073_v48  ;;  %v1829_v48 = vadd.f32 %v3537_v58, %v1828_v55 }
 0x3fe   : > { %v2494_v14 = vpop.permute.xlu1 %2493  ;;  %v6164_v5 = vpop.permute.xlu2 %2404  ;;  %v2333_v43 = vrot.slane %v2033_v37, 2 }
 0x3ff   : > { %v2441_v47 = vpop.permute.xlu0 %2440  ;;  %v1833_v42 = vsel %vm1832_vm14, %v3537_v58, %v1829_v48 }
 0x400   : > { %v2640_v53 = vsel %vm2638_vm9, %v2623_v41, %v2441_v47  ;;  %v2280_v47 = vrot.slane %v2033_v37, 1  ;;  %v1849_v37 = vand.u32 2147483647, %v6148_v40 }
 0x401   : > { %v2656_v0 = vsel %vm6747_vm13, %v2640_v53, %v2494_v14  ;;  %v1843_v14 = vmul.f32 %v3539_v17, %v1842_v9  ;;  %vm1845_vm13 = vweird.f32 %v6148_v40  ;;  %v1885_v9 = vadd.s32 9, %v5132_v38 }
 0x402   : > { %3354 = vmatmul.msk.f32.gmra.mxu1 %vm2674_vm1, %v2656_v0  ;;  %vm1850_vm0 = vcmp.eq.f32.partialorder %v1849_v37, 8.507059e+37 }
 0x403   : > { %v1844_v53 = vadd.f32 %v3539_v17, %v1843_v14 }
 0x404   : > { %2308 = vrot.lane.b32.xlu1 %v5730_v8, %s3661_s25  ;;  %2410 = vrot.lane.b32.xlu2 %v6091_v28, %s3662_s9 }
 0x405   : > { %2347 = vrot.lane.b32.xlu0 %v5780_v23, %s3670_s16  ;;  %v6192_v23 = vsel %vm615_vm3, %v2331_v54, %v2333_v43  ;;  %v1836_v54 = vand.u32 2147483648, %v6144_v16 }
 0x406   : > { %v2389_v4 = vpop.permute.xlu1 %2388  ;;  %v6181_v56 = vpop.permute.xlu2 %2511 }
 0x407   : > { %v2340_v8 = vpop.permute.xlu0 %2339  ;;  %v1837_v16 = vor.u32 1.1754944e-38, %v1836_v54 }
 0x408   : > { %v2608_v59 = vsel %vm2605_vm7, %v2591_v30, %v2340_v8 }
 0x409   : > { %v2624_v10 = vsel %vm6748_vm10, %v2608_v59, %v2389_v4  ;;  %vm1847_vm10 = vmor %vm1845_vm13, %vm1846_vm11  ;;  %vm1895_vm11 = vcmp.ge.s32.totalorder %v1885_v9, 0  ;;  %vm6749_vm13 = vcmask 97280  }
 0x40a   : > { %v2641_v57 = vsel %vm2638_vm9, %v2624_v10, %v6098_v22  ;;  %v6217_v22 = vsel %vm504_vm2, %v2278_v46, %v2280_v47  ;;  %v1848_v20 = vsel %vm1847_vm10, %v3539_v17, %v1844_v53  ;;  %vm6750_vm10 = vmmov %vm6749_vm13 }
 0x40c   : > { %2450 = vrot.lane.b32.xlu1 %v5651_v33, %s3671_s23  ;;  %2517 = vrot.lane.b32.xlu2 %v6192_v23, %s3663_s10 }
 0x40d   : > { %2361 = vrot.lane.b32.xlu0 %v5802_v1, %s3670_s16  ;;  %v1851_v1 = vand.u32 2147483648, %v6148_v40  ;;  %v1838_v40 = vsel %vm1835_vm4, %v1837_v16, %v1833_v42  ;;  %vm6751_vm4 = vcmask 130048  }
 0x40e   : > { %v2289_v3 = vpop.permute.xlu1 %2288  ;;  %v6201_v41 = vpop.permute.xlu2 %2250  ;;  %v1873_v8 = vmul.f32 %v1838_v40, %v6085_v2  ;;  %v2583_v2 = vsel %vm2572_vm8, %v6026_v36, %v6124_v11 }
 0x40f   : > { %v2496_v0 = vpop.permute.xlu0 %2495  ;;  %v1852_v43 = vor.u32 1.1754944e-38, %v1851_v1 }
 0x410   : > { %v2657_v4 = vsel %vm6745_vm12, %v2641_v57, %v2496_v0  ;;  %vm1905_vm12 = vcmp.lt.s32.totalorder %v1885_v9, 16 }
 0x411   : > { %3355 = vmatmul.msk.f32.gmra.mxu1 %vm2674_vm1, %v2657_v4  ;;  %v1853_v58 = vsel %vm1850_vm0, %v1852_v43, %v1848_v20  ;;  %vm1915_vm14 = vmand %vm1895_vm11, %vm1905_vm12 }
 0x412   : > { %v1874_v30 = vmul.f32 %v1853_v58, %v6094_v35  ;;  %vm6752_vm0 = vmmov %vm6751_vm4 }
 0x413   : > { %vm6753_vm11 = vmmov %vm6750_vm10 }
 0x414   : > { %2464 = vrot.lane.b32.xlu1 %v6217_v22, %s3671_s23  ;;  %2256 = vrot.lane.b32.xlu2 %v6080_v18, %s3669_s11  ;;  %v1934_v18 = vsel %vm1915_vm14, %v1873_v8, 0.0  ;;  %v1935_v59 = vsel %vm1915_vm14, %v1874_v30, 0.0  ;;  %vm6754_vm12 = vmmov %vm6750_vm10 }
 0x415   : > { %2503 = vrot.lane.b32.xlu0 %v5809_v63, %s3663_s10  ;;  %v1984_v14 = vrot.slane %v1934_v18, 7  ;;  %v1985_v48 = vrot.slane %v1935_v59, 7  ;;  %vm6755_vm14 = vmmov %vm6752_vm0 }
 0x416   : > { %v2303_v38 = vpop.permute.xlu1 %2302  ;;  %v6225_v46 = vpop.permute.xlu2 %2392 }
 0x417   : > { %v2342_v17 = vpop.permute.xlu0 %2341  ;;  %v2599_v47 = vsel %vm1133_vm6, %v2583_v2, %v2303_v38  ;;  %v2024_v0 = vsel %vm1956_vm15, 0.0, %v1984_v14  ;;  %v6250_v36 = vsel %vm1956_vm15, %v1984_v14, %v1985_v48 }
 0x418   : > { %v2433_v9 = vrot.slane %v2024_v0, 1 }
 0x41c   : > { %2296 = vrot.lane.b32.xlu1 %v5680_v29, %s3661_s25  ;;  %2398 = vrot.lane.b32.xlu2 %v5594_v25, %s3662_s9  ;;  %v2576_v29 = vsel %vm2572_vm8, %v5877_v61, %v6101_v32 }
 0x41d   : > { %2242 = vrot.lane.b32.xlu0 %v5668_v7, %s3669_s11  ;;  %v2592_v54 = vsel %vm1133_vm6, %v2576_v29, %v2289_v3 }
 0x41e   : > { %v2445_v55 = vpop.permute.xlu1 %2444  ;;  %v2407_v35 = vpop.permute.xlu2 %2406  ;;  %v2609_v7 = vsel %vm2605_vm7, %v2592_v54, %v2342_v17  ;;  %v2584_v17 = vsel %vm2572_vm8, %v6014_v15, %v6201_v41 }
 0x41f   : > { %v2356_v10 = vpop.permute.xlu0 %2355  ;;  %v2625_v11 = vsel %vm6750_vm10, %v2609_v7, %v6150_v34 }
 0x420   : > { %v2616_v53 = vsel %vm2605_vm7, %v2599_v47, %v2356_v10  ;;  %v2642_v57 = vsel %vm2638_vm9, %v2625_v11, %v2445_v55 }
 0x421   : > { %v2632_v32 = vsel %vm6749_vm13, %v2616_v53, %v6164_v5  ;;  %vm6760_vm13 = vmmov %vm6752_vm0 }
 0x424   : > { %2310 = vrot.lane.b32.xlu1 %v6137_v44, %s3661_s25  ;;  %2412 = vrot.lane.b32.xlu2 %v2024_v0, %s3662_s9  ;;  %v2487_v44 = vrot.slane %v6250_v36, 2 }
 0x425   : > { %2349 = vrot.lane.b32.xlu0 %v5767_v26, %s3670_s16  ;;  %v2486_v26 = vrot.slane %v2024_v0, 2  ;;  %v6757_v0 = vld [vmem:[#allocation4_spill] sm:$0xff] }
 0x426   : > { %v2459_v61 = vpop.permute.xlu1 %2458  ;;  %v2514_v5 = vpop.permute.xlu2 %2513 }
 0x427   : > { %v2649_v3 = vsel %vm2638_vm9, %v2632_v32, %v2459_v61  ;;  %v2498_v31 = vpop.permute.xlu0 %2497  ;;  %v2488_v34 = vsel %vm615_vm3, %v2486_v26, %v2487_v44 }
 0x428   : > { %v2665_v1 = vsel %vm6751_vm4, %v2649_v3, %v6181_v56  ;;  %v2658_v4 = vsel %vm6752_vm0, %v2642_v57, %v2498_v31  ;;  %v2434_v56 = vrot.slane %v6250_v36, 1 }
 0x429   : > { %3363 = vmatmul.msk.f32.vlgmr.msrb.gmra.mxu3 %vm2674_vm1, %v2665_v1  ;;  %3356 = vmatmul.msk.f32.gmra.mxu1 %vm2674_vm1, %v2658_v4  ;;  %v6356_v4 = vld [vmem:[%s6551_s6] ss:$0 sm:$0xff] }
 0x42a   : > { %v2435_v16 = vsel %vm504_vm2, %v2433_v9, %v2434_v56 }
 0x42c   : > { %2452 = vrot.lane.b32.xlu1 %v5719_v49, %s3671_s23  ;;  %2519 = vrot.lane.b32.xlu2 %v2488_v34, %s3663_s10 }
 0x42d   : > { %2363 = vrot.lane.b32.xlu0 %v6115_v51, %s3670_s16 }
 0x42e   : > { %v2291_v37 = vpop.permute.xlu1 %2290  ;;  %v2253_v20 = vpop.permute.xlu2 %2252 }
 0x42f   : > { %v2237_v42 = vpop.permute.xlu0 %2236 }
 0x430   : > { %v2577_v58 = vsel %vm2572_vm8, %v5979_v62, %v2237_v42 }
 0x434   : > { %2466 = vrot.lane.b32.xlu1 %v2435_v16, %s3671_s23  ;;  %2258 = vrot.lane.b32.xlu2 %v6091_v28, %s3669_s11 }
 0x435   : > { %2505 = vrot.lane.b32.xlu0 %v5798_v60, %s3663_s10 }
 0x436   : > { %v2305_v43 = vpop.permute.xlu1 %2304  ;;  %v2395_v38 = vpop.permute.xlu2 %2394 }
 0x437   : > { %v2344_v40 = vpop.permute.xlu0 %2343  ;;  %v2600_v8 = vsel %vm1133_vm6, %v2584_v17, %v2305_v43 }
 0x43c   : > { %2298 = vrot.lane.b32.xlu1 %v5651_v33, %s3661_s25  ;;  %2400 = vrot.lane.b32.xlu2 %v5697_v6, %s3662_s9  ;;  %v2593_v33 = vsel %vm1133_vm6, %v2577_v58, %v2291_v37 }
 0x43d   : > { %2244 = vrot.lane.b32.xlu0 %v5580_v13, %s3669_s11  ;;  %v2610_v6 = vsel %vm2605_vm7, %v2593_v33, %v2344_v40  ;;  %v2034_v13 = vsel %vm1956_vm15, %v1985_v48, 0.0  ;;  %vm6756_vm15 = vmmov %vm6752_vm0  ;;  %v6762_v33 = vld [vmem:[#allocation46_spill] sm:$0xff] }
 0x43e   : > { %v2447_v51 = vpop.permute.xlu1 %2446  ;;  %v2626_v41 = vsel %vm6754_vm12, %v2610_v6, %v6225_v46  ;;  %v2489_v55 = vrot.slane %v2034_v13, 2  ;;  %v2409_v10 = vpop.permute.xlu2 %2408  ;;  %v2436_v2 = vrot.slane %v2034_v13, 1 }
 0x43f   : > { %v2358_v28 = vpop.permute.xlu0 %2357  ;;  %v2643_v59 = vsel %vm2638_vm9, %v2626_v41, %v2447_v51 }
 0x440   : > { %v2617_v30 = vsel %vm2605_vm7, %v2600_v8, %v2358_v28  ;;  %v2437_v47 = vsel %vm504_vm2, %v2434_v56, %v2436_v2  ;;  %vm6758_vm2 = vmmov %vm6750_vm10 }
 0x441   : > { %v2633_v15 = vsel %vm6753_vm11, %v2617_v30, %v2407_v35  ;;  %vm6761_vm10 = vmmov %vm6752_vm0 }
 0x442   : > { %vm6763_vm4 = vmmov %vm6758_vm2 }
 0x443   : > { %vm6764_vm12 = vmmov %vm6758_vm2 }
 0x444   : > { %2312 = vrot.lane.b32.xlu1 %v6217_v22, %s3661_s25  ;;  %2414 = vrot.lane.b32.xlu2 %v6250_v36, %s3662_s9 }
 0x445   : > { %2351 = vrot.lane.b32.xlu0 %v5809_v63, %s3670_s16  ;;  %v2490_v63 = vsel %vm615_vm3, %v2487_v44, %v2489_v55  ;;  %vm6759_vm3 = vmmov %vm6758_vm2 }
 0x446   : > { %v2461_v62 = vpop.permute.xlu1 %2460  ;;  %v2516_v29 = vpop.permute.xlu2 %2515 }
 0x447   : > { %v2650_v18 = vsel %vm2638_vm9, %v2633_v15, %v2461_v62  ;;  %v2500_v22 = vpop.permute.xlu0 %2499 }
 0x448   : > { %v2666_v14 = vsel %vm6755_vm14, %v2650_v18, %v2514_v5  ;;  %v2659_v48 = vsel %vm6756_vm15, %v2643_v59, %v2500_v22 }
 0x449   : > { %3364 = vmatmul.msk.f32.gmra.mxu3 %vm2674_vm1, %v2666_v14  ;;  %3357 = vmatmul.msk.f32.gmra.mxu1 %vm2674_vm1, %v2659_v48 }
 0x44c   : > { %2454 = vrot.lane.b32.xlu1 %v5706_v52, %s3671_s23  ;;  %2521 = vrot.lane.b32.xlu2 %v2490_v63, %s3663_s10 }
 0x44d   : > { %2365 = vrot.lane.b32.xlu0 %v6192_v23, %s3670_s16 }
 0x44e   : > { %v2293_v46 = vpop.permute.xlu1 %2292  ;;  %v2255_v23 = vpop.permute.xlu2 %2254 }
 0x44f   : > { %v2239_v35 = vpop.permute.xlu0 %2238  ;;  %v2586_v17 = vsel %vm2572_vm8, %v6064_v50, %v2255_v23 }
 0x450   : > { %v2578_v7 = vsel %vm2572_vm8, %v5973_v45, %v2239_v35 }
 0x451   : > { %v2594_v61 = vsel %vm1133_vm6, %v2578_v7, %v2293_v46 }
 0x454   : > { %2468 = vrot.lane.b32.xlu1 %v2437_v47, %s3671_s23  ;;  %2353 = vrot.lane.b32.xlu2 %v5798_v60, %s3670_s16  ;;  %s3389_s16 = sshll.u32 %s3641_s24, 7 }
 0x455   : > { %2507 = vrot.lane.b32.xlu0 %v5783_v21, %s3663_s10  ;;  %v2585_v21 = vsel %vm2572_vm8, %v6757_v0, %v2253_v20 }
 0x456   : > { %v2307_v52 = vpop.permute.xlu1 %2306  ;;  %v2397_v45 = vpop.permute.xlu2 %2396 }
 0x457   : > { %v2346_v54 = vpop.permute.xlu0 %2345  ;;  %v2601_v36 = vsel %vm1133_vm6, %v2585_v21, %v2307_v52 }
 0x458   : > { %v2611_v32 = vsel %vm2605_vm7, %v2594_v61, %v2346_v54 }
 0x459   : > { %v2627_v11 = vsel %vm6759_vm3, %v2611_v32, %v2395_v38 }
 0x45c   : > { %2300 = vrot.lane.b32.xlu1 %v5719_v49, %s3661_s25  ;;  %2509 = vrot.lane.b32.xlu2 %v5823_v12, %s3663_s10 }
 0x45d   : > { %2246 = vrot.lane.b32.xlu0 %v5594_v25, %s3669_s11 }
 0x45e   : > { %v2449_v53 = vpop.permute.xlu1 %2448  ;;  %v2411_v26 = vpop.permute.xlu2 %2410 }
 0x45f   : > { %v2360_v60 = vpop.permute.xlu0 %2359  ;;  %v2644_v57 = vsel %vm2638_vm9, %v2627_v11, %v2449_v53 }
 0x460   : > { %v2618_v49 = vsel %vm2605_vm7, %v2601_v36, %v2360_v60 }
 0x461   : > { %v2634_v12 = vsel %vm6758_vm2, %v2618_v49, %v2409_v10  ;;  %vm6765_vm2 = vmmov %vm6752_vm0 }
 0x464   : > { %2456 = vrot.lane.b32.xlu1 %v5683_v24, %s3671_s23  ;;  %v6351_v24 = vld [vmem:[%s6550_s5] ss:$0 sm:$0xff]  ;;  %s6382_s23 = scalar_lea.vmem %s3752_s14, %s3389_s16 }
 0x465   : > { %2402 = vrot.lane.b32.xlu0 %v5640_v19, %s3662_s9  ;;  %v3154_v49 = vld [vmem:[%s6382_s23] sm:$0xff] }
 0x466   : > { %v2463_v25 = vpop.permute.xlu1 %2462  ;;  %v2518_v16 = vpop.permute.xlu2 %2517 }
 0x467   : > { %v2651_v3 = vsel %vm2638_vm9, %v2634_v12, %v2463_v25  ;;  %v2502_v44 = vpop.permute.xlu0 %2501 }
 0x468   : > { %v2667_v31 = vsel %vm6760_vm13, %v2651_v3, %v2516_v29  ;;  %v2660_v1 = vsel %vm6761_vm10, %v2644_v57, %v2502_v44 }
 0x469   : > { %3365 = vmatmul.msk.f32.gmra.mxu3 %vm2674_vm1, %v2667_v31  ;;  %3358 = vmatmul.msk.f32.gmra.mxu1 %vm2674_vm1, %v2660_v1 }
 0x46e   : > { %v2295_v19 = vpop.permute.xlu1 %2294  ;;  %v6366_v8 = vpop.permute.xlu2 %2256 }
 0x46f   : > { %v2241_v34 = vpop.permute.xlu0 %2240 }
 0x470   : > { %v2744_v5 = vpop.f32.mrf.mxu1  ;;  %v2579_v30 = vsel %vm2572_vm8, %v6762_v33, %v2241_v34 }
 0x471   : > { %v2796_v37 = vmul.f32 %v6351_v24, %v2744_v5  ;;  %v2595_v50 = vsel %vm1133_vm6, %v2579_v30, %v2295_v19 }
 0x473   : > { %v2816_v56 = vadd.f32 %v6356_v4, %v2796_v37 }
 0x475   : > { %v3369_v42 = vmul.f32 -1.442695, %v2816_v56 }
 0x476   : > { %v2309_v9 = vpop.permute.xlu1 %2308  ;;  %v6385_v23 = vpop.permute.xlu2 %2398 }
 0x477   : > { %3540 = vpow2.f32 %v3369_v42  ;;  %v2348_v20 = vpop.permute.xlu0 %2347  ;;  %v2602_v6 = vsel %vm1133_vm6, %v2586_v17, %v2309_v9 }
 0x478   : > { %v2612_v10 = vsel %vm2605_vm7, %v2595_v50, %v2348_v20 }
 0x479   : > { %v2628_v35 = vsel %vm6764_vm12, %v2612_v10, %v2397_v45 }
 0x47d   : > { %v3541_v43 = vpop.eup %3540 }
 0x47e   : > { %v2451_v40 = vpop.permute.xlu1 %2450  ;;  %v2880_v51 = vadd.f32 1.0, %v3541_v43  ;;  %v2413_v31 = vpop.permute.xlu2 %2412 }
 0x47f   : > { %v2747_v38 = vpop.f32.mrf.mxu1  ;;  %v2362_v62 = vpop.permute.xlu0 %2361  ;;  %v2645_v52 = vsel %vm2638_vm9, %v2628_v35, %v2451_v40  ;;  %v3155_v40 = vld [vmem:[%s6382_s23 + $0x8] sm:$0xff] }
 0x480   : > { %3542 = vrcp.f32 %v2880_v51  ;;  %v2797_v58 = vmul.f32 %v6351_v24, %v2747_v38  ;;  %v2619_v18 = vsel %vm2605_vm7, %v2602_v6, %v2362_v62  ;;  %v2907_v63 = vand.u32 2147483648, %v2880_v51 }
 0x481   : > { %v2635_v55 = vsel %vm6763_vm4, %v2619_v18, %v2411_v26  ;;  %v2905_v2 = vand.u32 2147483647, %v2880_v51  ;;  %vm2901_vm14 = vweird.f32 %v2880_v51  ;;  %v2587_v62 = vsel %vm2572_vm8, %v6054_v27, %v6366_v8 }
 0x482   : > { %v6362_v28 = vadd.f32 %v6356_v4, %v2797_v58  ;;  %v2908_v53 = vor.u32 1.1754944e-38, %v2907_v63 }
 0x483   : > { %vm2906_vm3 = vcmp.eq.f32.partialorder %v2905_v2, 8.507059e+37 }
 0x484   : > { %v3370_v13 = vmul.f32 -1.442695, %v6362_v28 }
 0x486   : > { %v2465_v15 = vpop.permute.xlu1 %2464  ;;  %v3543_v41 = vpop.eup %3542  ;;  %3544 = vpow2.f32 %v3370_v13 }
 0x487   : > { %v2897_v59 = vmul.f32 %v3543_v41, %v2880_v51  ;;  %v2652_v22 = vsel %vm2638_vm9, %v2635_v55, %v2465_v15  ;;  %vm2902_vm11 = vweird.f32 %v3543_v41  ;;  %v2504_v54 = vpop.permute.xlu0 %2503  ;;  %v2520_v38 = vpop.permute.xlu2 %2519 }
 0x488   : > { %v2668_v48 = vsel %vm6752_vm0, %v2652_v22, %v2518_v16  ;;  %vm2903_vm15 = vmor %vm2901_vm14, %vm2902_vm11  ;;  %v2661_v60 = vsel %vm6765_vm2, %v2645_v52, %v2504_v54 }
 0x489   : > { %v2898_v14 = vsub.f32 1.0, %v2897_v59  ;;  %3366 = vmatmul.msk.f32.gmra.mxu3 %vm2674_vm1, %v2668_v48  ;;  %3359 = vmatmul.msk.f32.gmra.mxu1 %vm2674_vm1, %v2661_v60 }
 0x48b   : > { %v2899_v46 = vmul.f32 %v3543_v41, %v2898_v14 }
 0x48c   : > { %v3545_v29 = vpop.eup %3544 }
 0x48d   : > { %v2900_v47 = vadd.f32 %v3543_v41, %v2899_v46  ;;  %v2881_v7 = vadd.f32 1.0, %v3545_v29 }
 0x48e   : > { %v2750_v0 = vpop.f32.mrf.mxu1  ;;  %v2297_v11 = vpop.permute.xlu1 %2296 }
 0x48f   : > { %v2904_v21 = vsel %vm2903_vm15, %v3543_v41, %v2900_v47  ;;  %v2798_v36 = vmul.f32 %v6351_v24, %v2750_v0  ;;  %3546 = vrcp.f32 %v2881_v7  ;;  %v2243_v3 = vpop.permute.xlu0 %2242  ;;  %v2922_v19 = vand.u32 2147483648, %v2881_v7  ;;  %v2259_v35 = vpop.permute.xlu2 %2258 }
 0x490   : > { %v2909_v61 = vsel %vm2906_vm3, %v2908_v53, %v2904_v21  ;;  %v2920_v34 = vand.u32 2147483647, %v2881_v7  ;;  %vm2916_vm10 = vweird.f32 %v2881_v7  ;;  %v2580_v6 = vsel %vm2572_vm8, %v6000_v39, %v2243_v3 }
 0x491   : > { %v3136_v32 = vmul.f32 %v2909_v61, %v2816_v56  ;;  %v6392_v25 = vadd.f32 %v6356_v4, %v2798_v36  ;;  %v2923_v16 = vor.u32 1.1754944e-38, %v2922_v19  ;;  %v2596_v50 = vsel %vm1133_vm6, %v2580_v6, %v2297_v11  ;;  %v3156_v36 = vld [vmem:[%s6382_s23 + $0x10] sm:$0xff]  ;;  %v6773_v6 = vld [vmem:[#allocation36_spill] sm:$0xff] }
 0x492   : > { %vm2921_vm0 = vcmp.eq.f32.partialorder %v2920_v34, 8.507059e+37  ;;  %vm6768_vm15 = vcmask 97280  }
 0x493   : > { %v3170_v12 = vadd.f32 %v3154_v49, %v3136_v32  ;;  %v3371_v45 = vmul.f32 -1.442695, %v6392_v25  ;;  %vm6769_vm3 = vmmov %vm6768_vm15 }
 0x495   : > { %3186 = vst.msk [vmem:[%s3757_s20] sm:$0xff] %vm1112_vm5, %v3170_v12  ;;  %3548 = vpow2.f32 %v3371_v45  ;;  %v3547_v57 = vpop.eup %3546 }
 0x496   : > { %v2912_v44 = vmul.f32 %v3547_v57, %v2881_v7  ;;  %vm2917_vm13 = vweird.f32 %v3547_v57  ;;  %v2311_v37 = vpop.permute.xlu1 %2310 }
 0x497   : > { %v2350_v9 = vpop.permute.xlu0 %2349  ;;  %vm2918_vm4 = vmor %vm2916_vm10, %vm2917_vm13  ;;  %vm6770_vm13 = vcmask 130048  }
 0x498   : > { %v2913_v1 = vsub.f32 1.0, %v2912_v44  ;;  %v2613_v39 = vsel %vm2605_vm7, %v2596_v50, %v2350_v9  ;;  %vm6771_vm10 = vmmov %vm6770_vm13  ;;  %v2401_v44 = vpop.permute.xlu2 %2400 }
 0x499   : > { %v2629_v47 = vsel %vm6769_vm3, %v2613_v39, %v6385_v23 }
 0x49a   : > { %v2914_v5 = vmul.f32 %v3547_v57, %v2913_v1 }
 0x49b   : > { %v3549_v26 = vpop.eup %3548 }
 0x49c   : > { %v2882_v56 = vadd.f32 1.0, %v3549_v26  ;;  %v2915_v42 = vadd.f32 %v3547_v57, %v2914_v5 }
 0x49e   : > { %3550 = vrcp.f32 %v2882_v56  ;;  %v2919_v20 = vsel %vm2918_vm4, %v3547_v57, %v2915_v42  ;;  %v2453_v17 = vpop.permute.xlu1 %2452  ;;  %v2935_v18 = vand.u32 2147483647, %v2882_v56  ;;  %v2937_v55 = vand.u32 2147483648, %v2882_v56 }
 0x49f   : > { %v2924_v43 = vsel %vm2921_vm0, %v2923_v16, %v2919_v20  ;;  %v2364_v13 = vpop.permute.xlu0 %2363  ;;  %vm2931_vm12 = vweird.f32 %v2882_v56  ;;  %v2646_v7 = vsel %vm2638_vm9, %v2629_v47, %v2453_v17 }
 0x4a0   : > { %v3137_v51 = vmul.f32 %v2924_v43, %v6362_v28  ;;  %v2603_v28 = vsel %vm1133_vm6, %v2587_v62, %v2311_v37  ;;  %vm6414_vm14 = vcmp.eq.f32.partialorder %v2935_v18, 8.507059e+37  ;;  %v2938_v29 = vor.u32 1.1754944e-38, %v2937_v55  ;;  %v2415_v37 = vpop.permute.xlu2 %2414 }
 0x4a1   : > { %v2620_v22 = vsel %vm2605_vm7, %v2603_v28, %v2364_v13 }
 0x4a2   : > { %v3171_v58 = vadd.f32 %v3155_v40, %v3137_v51  ;;  %v2636_v46 = vsel %vm6768_vm15, %v2620_v22, %v2413_v31  ;;  %v6772_v51 = vld [vmem:[#allocation29_spill] sm:$0xff] }
 0x4a4   : > { %v3551_v33 = vpop.eup %3550  ;;  %3187 = vst.msk [vmem:[%s3757_s20 + $0x8] sm:$0xff] %vm1112_vm5, %v3171_v58 }
 0x4a5   : > { %v2927_v30 = vmul.f32 %v3551_v33, %v2882_v56  ;;  %vm2932_vm11 = vweird.f32 %v3551_v33 }
 0x4a6   : > { %v2753_v15 = vpop.f32.mrf.mxu1  ;;  %v2467_v63 = vpop.permute.xlu1 %2466  ;;  %vm2933_vm2 = vmor %vm2931_vm12, %vm2932_vm11 }
 0x4a7   : > { %v2928_v41 = vsub.f32 1.0, %v2927_v30  ;;  %v2799_v59 = vmul.f32 %v6351_v24, %v2753_v15  ;;  %v2653_v52 = vsel %vm2638_vm9, %v2636_v46, %v2467_v63  ;;  %v2506_v60 = vpop.permute.xlu0 %2505 }
 0x4a8   : > { %v2669_v0 = vsel %vm6770_vm13, %v2653_v52, %v2520_v38  ;;  %v2662_v61 = vsel %vm6771_vm10, %v2646_v7, %v2506_v60  ;;  %v2588_v38 = vsel %vm2572_vm8, %v6772_v51, %v2259_v35  ;;  %vm6774_vm13 = vcmask 97280  }
 0x4a9   : > { %v2929_v14 = vmul.f32 %v3551_v33, %v2928_v41  ;;  %v6412_v10 = vadd.f32 %v6356_v4, %v2799_v59  ;;  %3367 = vmatmul.msk.f32.gmra.mxu3 %vm2674_vm1, %v2669_v0  ;;  %3360 = vmatmul.msk.f32.gmra.mxu1 %vm2674_vm1, %v2662_v61  ;;  %v3157_v41 = vld [vmem:[%s6382_s23 + $0x18] sm:$0xff]  ;;  %vm6775_vm10 = vmmov %vm6774_vm13 }
 0x4ab   : > { %v2930_v27 = vadd.f32 %v3551_v33, %v2929_v14  ;;  %v3372_v48 = vmul.f32 -1.442695, %v6412_v10 }
 0x4ac   : > { %v2774_v2 = vpop.f32.mrf.mxu3 }
 0x4ad   : > { %v2806_v54 = vmul.f32 %v6351_v24, %v2774_v2  ;;  %v2934_v53 = vsel %vm2933_vm2, %v3551_v33, %v2930_v27  ;;  %3552 = vpow2.f32 %v3372_v48 }
 0x4ae   : > { %v2939_v21 = vsel %vm6414_vm14, %v2938_v29, %v2934_v53  ;;  %v2299_v11 = vpop.permute.xlu1 %2298  ;;  %v3164_v29 = vld [vmem:[%s6382_s23 + $0x50] sm:$0xff] }
 0x4af   : > { %v6432_v23 = vadd.f32 %v6356_v4, %v2806_v54  ;;  %v3138_v49 = vmul.f32 %v2939_v21, %v6392_v25  ;;  %v2245_v57 = vpop.permute.xlu0 %2244 }
 0x4b0   : > { %v2581_v13 = vsel %vm2572_vm8, %v6773_v6, %v2245_v57 }
 0x4b1   : > { %v3379_v32 = vmul.f32 -1.442695, %v6432_v23  ;;  %v3172_v12 = vadd.f32 %v3156_v36, %v3138_v49  ;;  %v2597_v39 = vsel %vm1133_vm6, %v2581_v13, %v2299_v11 }
 0x4b3   : > { %3554 = vpow2.f32 %v3379_v32  ;;  %v3553_v45 = vpop.eup %3552  ;;  %3188 = vst.msk [vmem:[%s3757_s20 + $0x10] sm:$0xff] %vm1112_vm5, %v3172_v12 }
 0x4b4   : > { %v2883_v3 = vadd.f32 1.0, %v3553_v45 }
 0x4b6   : > { %3556 = vrcp.f32 %v2883_v3  ;;  %v2313_v19 = vpop.permute.xlu1 %2312  ;;  %v2952_v56 = vand.u32 2147483648, %v2883_v3  ;;  %v2950_v16 = vand.u32 2147483647, %v2883_v3  ;;  %vm2946_vm0 = vweird.f32 %v2883_v3 }
 0x4b7   : > { %v2352_v5 = vpop.permute.xlu0 %2351  ;;  %v2604_v50 = vsel %vm1133_vm6, %v2588_v38, %v2313_v19 }
 0x4b8   : > { %v2953_v58 = vor.u32 1.1754944e-38, %v2952_v56  ;;  %vm2951_vm12 = vcmp.eq.f32.partialorder %v2950_v16, 8.507059e+37  ;;  %v2614_v63 = vsel %vm2605_vm7, %v2597_v39, %v2352_v5 }
 0x4b9   : > { %v3555_v31 = vpop.eup %3554  ;;  %v2630_v60 = vsel %vm6775_vm10, %v2614_v63, %v2401_v44 }
 0x4ba   : > { %v2890_v1 = vadd.f32 1.0, %v3555_v31 }
 0x4bc   : > { %3558 = vrcp.f32 %v2890_v1  ;;  %v3557_v26 = vpop.eup %3556  ;;  %v3057_v30 = vand.u32 2147483648, %v2890_v1  ;;  %v3055_v28 = vand.u32 2147483647, %v2890_v1  ;;  %vm3051_vm15 = vweird.f32 %v2890_v1 }
 0x4bd   : > { %v2942_v25 = vmul.f32 %v3557_v26, %v2883_v3  ;;  %vm2947_vm4 = vweird.f32 %v3557_v26 }
 0x4be   : > { %v2455_v40 = vpop.permute.xlu1 %2454  ;;  %vm2948_vm11 = vmor %vm2946_vm0, %vm2947_vm4  ;;  %v3058_v48 = vor.u32 1.1754944e-38, %v3057_v30  ;;  %vm3056_vm3 = vcmp.eq.f32.partialorder %v3055_v28, 8.507059e+37  ;;  %vm6776_vm4 = vcmask 130048   ;;  %v3158_v28 = vld [vmem:[%s6382_s23 + $0x20] sm:$0xff] }
 0x4bf   : > { %v2943_v34 = vsub.f32 1.0, %v2942_v25  ;;  %v2366_v62 = vpop.permute.xlu0 %2365  ;;  %v2647_v36 = vsel %vm2638_vm9, %v2630_v60, %v2455_v40  ;;  %vm6777_vm0 = vmmov %vm6776_vm4 }
 0x4c0   : > { %v2621_v27 = vsel %vm2605_vm7, %v2604_v50, %v2366_v62 }
 0x4c1   : > { %v2944_v9 = vmul.f32 %v3557_v26, %v2943_v34  ;;  %v2637_v54 = vsel %vm6774_vm13, %v2621_v27, %v2415_v37 }
 0x4c2   : > { %v3559_v42 = vpop.eup %3558 }
 0x4c3   : > { %v3047_v20 = vmul.f32 %v3559_v42, %v2890_v1  ;;  %v2945_v43 = vadd.f32 %v3557_v26, %v2944_v9  ;;  %vm3052_vm14 = vweird.f32 %v3559_v42  ;;  %v6778_v1 = vld [vmem:[#allocation12_spill] sm:$0xff] }
 0x4c4   : > { %vm3053_vm2 = vmor %vm3051_vm15, %vm3052_vm14 }
 0x4c5   : > { %v3048_v17 = vsub.f32 1.0, %v3047_v20  ;;  %v2949_v33 = vsel %vm2948_vm11, %v3557_v26, %v2945_v43  ;;  %vm6779_vm11 = vmmov %vm6775_vm10 }
 0x4c6   : > { %v2954_v15 = vsel %vm2951_vm12, %v2953_v58, %v2949_v33  ;;  %v2756_v59 = vpop.f32.mrf.mxu1  ;;  %v2469_v52 = vpop.permute.xlu1 %2468  ;;  %vm6780_vm12 = vmmov %vm6777_vm0 }
 0x4c7   : > { %v3049_v18 = vmul.f32 %v3559_v42, %v3048_v17  ;;  %v3139_v55 = vmul.f32 %v2954_v15, %v6412_v10  ;;  %v2800_v22 = vmul.f32 %v6351_v24, %v2756_v59  ;;  %v2522_v10 = vpop.permute.xlu2 %2521  ;;  %v2654_v0 = vsel %vm2638_vm9, %v2637_v54, %v2469_v52  ;;  %v2508_v61 = vpop.permute.xlu0 %2507 }
 0x4c8   : > { %v2670_v49 = vsel %vm6776_vm4, %v2654_v0, %v2522_v10  ;;  %v2663_v12 = vsel %vm6777_vm0, %v2647_v36, %v2508_v61 }
 0x4c9   : > { %v3050_v14 = vadd.f32 %v3559_v42, %v3049_v18  ;;  %v3173_v8 = vadd.f32 %v3157_v41, %v3139_v55  ;;  %v6451_v46 = vadd.f32 %v6356_v4, %v2800_v22  ;;  %3368 = vmatmul.msk.f32.gmra.mxu3 %vm2674_vm1, %v2670_v49  ;;  %3361 = vmatmul.msk.f32.gmra.mxu1 %vm2674_vm1, %v2663_v12 }
 0x4cb   : > { %v3054_v2 = vsel %vm3053_vm2, %v3559_v42, %v3050_v14  ;;  %3189 = vst.msk [vmem:[%s3757_s20 + $0x18] sm:$0xff] %vm1112_vm5, %v3173_v8  ;;  %v3373_v47 = vmul.f32 -1.442695, %v6451_v46 }
 0x4cc   : > { %v3059_v35 = vsel %vm3056_vm3, %v3058_v48, %v3054_v2  ;;  %v2777_v53 = vpop.f32.mrf.mxu3  ;;  %v3165_v2 = vld [vmem:[%s6382_s23 + $0x58] sm:$0xff] }
 0x4cd   : > { %v3146_v7 = vmul.f32 %v3059_v35, %v6432_v23  ;;  %v2807_v21 = vmul.f32 %v6351_v24, %v2777_v53  ;;  %3560 = vpow2.f32 %v3373_v47 }
 0x4ce   : > { %v2301_v3 = vpop.permute.xlu1 %2300 }
 0x4cf   : > { %v3180_v32 = vadd.f32 %v3164_v29, %v3146_v7  ;;  %v2827_v45 = vadd.f32 %v6356_v4, %v2807_v21  ;;  %v2354_v44 = vpop.permute.xlu2 %2353  ;;  %v2247_v31 = vpop.permute.xlu0 %2246 }
 0x4d0   : > { %v2582_v19 = vsel %vm2572_vm8, %v6778_v1, %v2247_v31 }
 0x4d1   : > { %3196 = vst.msk [vmem:[%s3757_s20 + $0x50] sm:$0xff] %vm1112_vm5, %v3180_v32  ;;  %v3380_v23 = vmul.f32 -1.442695, %v2827_v45  ;;  %v2598_v5 = vsel %vm1133_vm6, %v2582_v19, %v2301_v3 }
 0x4d2   : > { %v2615_v42 = vsel %vm2605_vm7, %v2598_v5, %v2354_v44 }
 0x4d3   : > { %3562 = vpow2.f32 %v3380_v23  ;;  %v3561_v11 = vpop.eup %3560 }
 0x4d4   : > { %v2884_v57 = vadd.f32 1.0, %v3561_v11 }
 0x4d6   : > { %3564 = vrcp.f32 %v2884_v57  ;;  %v2457_v37 = vpop.permute.xlu1 %2456  ;;  %v2967_v51 = vand.u32 2147483648, %v2884_v57  ;;  %v2965_v33 = vand.u32 2147483647, %v2884_v57  ;;  %vm2961_vm8 = vweird.f32 %v2884_v57 }
 0x4d7   : > { %v2403_v9 = vpop.permute.xlu0 %2402  ;;  %v2510_v20 = vpop.permute.xlu2 %2509 }
 0x4d8   : > { %v2631_v16 = vsel %vm6779_vm11, %v2615_v42, %v2403_v9  ;;  %v2968_v13 = vor.u32 1.1754944e-38, %v2967_v51  ;;  %vm2966_vm14 = vcmp.eq.f32.partialorder %v2965_v33, 8.507059e+37 }
 0x4d9   : > { %v3563_v26 = vpop.eup %3562  ;;  %v2648_v40 = vsel %vm2638_vm9, %v2631_v16, %v2457_v37 }
 0x4da   : > { %v2891_v25 = vadd.f32 1.0, %v3563_v26  ;;  %v2664_v38 = vsel %vm6780_vm12, %v2648_v40, %v2510_v20  ;;  %v3159_v26 = vld [vmem:[%s6382_s23 + $0x28] sm:$0xff]  ;;  %v3166_v20 = vld [vmem:[%s6382_s23 + $0x60] sm:$0xff] }
 0x4db   : > { %3362 = vmatmul.msk.f32.gmra.mxu1 %vm2674_vm1, %v2664_v38 }
 0x4dc   : > { %3566 = vrcp.f32 %v2891_v25  ;;  %v3565_v34 = vpop.eup %3564  ;;  %v3072_v41 = vand.u32 2147483648, %v2891_v25  ;;  %v3070_v55 = vand.u32 2147483647, %v2891_v25  ;;  %vm3066_vm1 = vweird.f32 %v2891_v25 }
 0x4dd   : > { %v2957_v56 = vmul.f32 %v3565_v34, %v2884_v57  ;;  %vm2962_vm6 = vweird.f32 %v3565_v34 }
 0x4de   : > { %vm2963_vm7 = vmor %vm2961_vm8, %vm2962_vm6  ;;  %v3073_v8 = vor.u32 1.1754944e-38, %v3072_v41  ;;  %vm3071_vm2 = vcmp.eq.f32.partialorder %v3070_v55, 8.507059e+37 }
 0x4df   : > { %v2958_v43 = vsub.f32 1.0, %v2957_v56 }
 0x4e1   : > { %v2959_v17 = vmul.f32 %v3565_v34, %v2958_v43 }
 0x4e2   : > { %v3567_v58 = vpop.eup %3566 }
 0x4e3   : > { %v3062_v30 = vmul.f32 %v3567_v58, %v2891_v25  ;;  %v2960_v6 = vadd.f32 %v3565_v34, %v2959_v17  ;;  %vm3067_vm9 = vweird.f32 %v3567_v58 }
 0x4e4   : > { %vm3068_vm15 = vmor %vm3066_vm1, %vm3067_vm9 }
 0x4e5   : > { %v3063_v62 = vsub.f32 1.0, %v3062_v30  ;;  %v2964_v15 = vsel %vm2963_vm7, %v3565_v34, %v2960_v6 }
 0x4e6   : > { %v2969_v18 = vsel %vm2966_vm14, %v2968_v13, %v2964_v15  ;;  %v2759_v50 = vpop.f32.mrf.mxu1 }
 0x4e7   : > { %v3064_v59 = vmul.f32 %v3567_v58, %v3063_v62  ;;  %v3140_v22 = vmul.f32 %v2969_v18, %v6451_v46  ;;  %v2801_v14 = vmul.f32 %v6351_v24, %v2759_v50 }
 0x4e9   : > { %v3065_v39 = vadd.f32 %v3567_v58, %v3064_v59  ;;  %v3174_v27 = vadd.f32 %v3158_v28, %v3140_v22  ;;  %v2821_v48 = vadd.f32 %v6356_v4, %v2801_v14 }
 0x4eb   : > { %v3069_v63 = vsel %vm3068_vm15, %v3567_v58, %v3065_v39  ;;  %3190 = vst.msk [vmem:[%s3757_s20 + $0x20] sm:$0xff] %vm1112_vm5, %v3174_v27  ;;  %v3374_v35 = vmul.f32 -1.442695, %v2821_v48 }
 0x4ec   : > { %v3074_v10 = vsel %vm3071_vm2, %v3073_v8, %v3069_v63  ;;  %v2780_v29 = vpop.f32.mrf.mxu3 }
 0x4ed   : > { %v3147_v47 = vmul.f32 %v3074_v10, %v2827_v45  ;;  %v2808_v46 = vmul.f32 %v6351_v24, %v2780_v29  ;;  %3568 = vpow2.f32 %v3374_v35  ;;  %v3160_v29 = vld [vmem:[%s6382_s23 + $0x30] sm:$0xff] }
 0x4ef   : > { %v3181_v52 = vadd.f32 %v3165_v2, %v3147_v47  ;;  %v2828_v54 = vadd.f32 %v6356_v4, %v2808_v46 }
 0x4f1   : > { %3197 = vst.msk [vmem:[%s3757_s20 + $0x58] sm:$0xff] %vm1112_vm5, %v3181_v52  ;;  %v3381_v53 = vmul.f32 -1.442695, %v2828_v54 }
 0x4f3   : > { %3570 = vpow2.f32 %v3381_v53  ;;  %v3569_v7 = vpop.eup %3568 }
 0x4f4   : > { %v2885_v60 = vadd.f32 1.0, %v3569_v7 }
 0x4f6   : > { %3572 = vrcp.f32 %v2885_v60  ;;  %v2982_v32 = vand.u32 2147483648, %v2885_v60  ;;  %v2980_v23 = vand.u32 2147483647, %v2885_v60  ;;  %vm2976_vm13 = vweird.f32 %v2885_v60 }
 0x4f8   : > { %v2983_v57 = vor.u32 1.1754944e-38, %v2982_v32  ;;  %vm2981_vm4 = vcmp.eq.f32.partialorder %v2980_v23, 8.507059e+37 }
 0x4f9   : > { %v3571_v0 = vpop.eup %3570 }
 0x4fa   : > { %v2892_v21 = vadd.f32 1.0, %v3571_v0 }
 0x4fc   : > { %3574 = vrcp.f32 %v2892_v21  ;;  %v3573_v36 = vpop.eup %3572  ;;  %v3087_v1 = vand.u32 2147483648, %v2892_v21  ;;  %v3085_v5 = vand.u32 2147483647, %v2892_v21  ;;  %vm3081_vm11 = vweird.f32 %v2892_v21 }
 0x4fd   : > { %v2972_v61 = vmul.f32 %v3573_v36, %v2885_v60  ;;  %vm2977_vm3 = vweird.f32 %v3573_v36 }
 0x4fe   : > { %vm2978_vm10 = vmor %vm2976_vm13, %vm2977_vm3  ;;  %v3088_v42 = vor.u32 1.1754944e-38, %v3087_v1  ;;  %vm3086_vm6 = vcmp.eq.f32.partialorder %v3085_v5, 8.507059e+37 }
 0x4ff   : > { %v2973_v49 = vsub.f32 1.0, %v2972_v61 }
 0x501   : > { %v2974_v45 = vmul.f32 %v3573_v36, %v2973_v49  ;;  %v3167_v49 = vld [vmem:[%s6382_s23 + $0x68] sm:$0xff] }
 0x502   : > { %v3575_v12 = vpop.eup %3574 }
 0x503   : > { %v3077_v11 = vmul.f32 %v3575_v12, %v2892_v21  ;;  %v2975_v3 = vadd.f32 %v3573_v36, %v2974_v45  ;;  %vm3082_vm0 = vweird.f32 %v3575_v12 }
 0x504   : > { %vm3083_vm12 = vmor %vm3081_vm11, %vm3082_vm0 }
 0x505   : > { %v3078_v44 = vsub.f32 1.0, %v3077_v11  ;;  %v2979_v31 = vsel %vm2978_vm10, %v3573_v36, %v2975_v3 }
 0x506   : > { %v2984_v19 = vsel %vm2981_vm4, %v2983_v57, %v2979_v31  ;;  %v2762_v40 = vpop.f32.mrf.mxu1 }
 0x507   : > { %v3079_v25 = vmul.f32 %v3575_v12, %v3078_v44  ;;  %v3141_v34 = vmul.f32 %v2984_v19, %v2821_v48  ;;  %v2802_v51 = vmul.f32 %v6351_v24, %v2762_v40 }
 0x509   : > { %v3080_v37 = vadd.f32 %v3575_v12, %v3079_v25  ;;  %v3175_v56 = vadd.f32 %v3159_v26, %v3141_v34  ;;  %v2822_v58 = vadd.f32 %v6356_v4, %v2802_v51 }
 0x50b   : > { %v3084_v9 = vsel %vm3083_vm12, %v3575_v12, %v3080_v37  ;;  %3191 = vst.msk [vmem:[%s3757_s20 + $0x28] sm:$0xff] %vm1112_vm5, %v3175_v56  ;;  %v3375_v17 = vmul.f32 -1.442695, %v2822_v58 }
 0x50c   : > { %v3089_v16 = vsel %vm3086_vm6, %v3088_v42, %v3084_v9  ;;  %v2783_v33 = vpop.f32.mrf.mxu3 }
 0x50d   : > { %v3148_v43 = vmul.f32 %v3089_v16, %v2828_v54  ;;  %v2809_v30 = vmul.f32 %v6351_v24, %v2783_v33  ;;  %3576 = vpow2.f32 %v3375_v17 }
 0x50f   : > { %v3182_v38 = vadd.f32 %v3166_v20, %v3148_v43  ;;  %v2829_v6 = vadd.f32 %v6356_v4, %v2809_v30 }
 0x511   : > { %3198 = vst.msk [vmem:[%s3757_s20 + $0x60] sm:$0xff] %vm1112_vm5, %v3182_v38  ;;  %v3382_v13 = vmul.f32 -1.442695, %v2829_v6 }
 0x513   : > { %3578 = vpow2.f32 %v3382_v13  ;;  %v3577_v62 = vpop.eup %3576 }
 0x514   : > { %v2886_v15 = vadd.f32 1.0, %v3577_v62 }
 0x516   : > { %3580 = vrcp.f32 %v2886_v15  ;;  %v2997_v50 = vand.u32 2147483648, %v2886_v15  ;;  %v2995_v39 = vand.u32 2147483647, %v2886_v15  ;;  %vm2991_vm7 = vweird.f32 %v2886_v15 }
 0x518   : > { %v2998_v48 = vor.u32 1.1754944e-38, %v2997_v50  ;;  %vm2996_vm9 = vcmp.eq.f32.partialorder %v2995_v39, 8.507059e+37 }
 0x519   : > { %v3579_v41 = vpop.eup %3578 }
 0x51a   : > { %v2893_v18 = vadd.f32 1.0, %v3579_v41 }
 0x51c   : > { %3582 = vrcp.f32 %v2893_v18  ;;  %v3581_v28 = vpop.eup %3580  ;;  %v3102_v2 = vand.u32 2147483648, %v2893_v18  ;;  %v3100_v46 = vand.u32 2147483647, %v2893_v18  ;;  %vm3096_vm15 = vweird.f32 %v2893_v18 }
 0x51d   : > { %v2987_v59 = vmul.f32 %v3581_v28, %v2886_v15  ;;  %vm2992_vm8 = vweird.f32 %v3581_v28 }
 0x51e   : > { %vm2993_vm14 = vmor %vm2991_vm7, %vm2992_vm8  ;;  %v3103_v0 = vor.u32 1.1754944e-38, %v3102_v2  ;;  %vm3101_vm3 = vcmp.eq.f32.partialorder %v3100_v46, 8.507059e+37 }
 0x51f   : > { %v2988_v55 = vsub.f32 1.0, %v2987_v59 }
 0x521   : > { %v2989_v14 = vmul.f32 %v3581_v28, %v2988_v55  ;;  %v3168_v55 = vld [vmem:[%s6382_s23 + $0x70] sm:$0xff] }
 0x522   : > { %v3583_v22 = vpop.eup %3582 }
 0x523   : > { %v3092_v27 = vmul.f32 %v3583_v22, %v2893_v18  ;;  %v2990_v8 = vadd.f32 %v3581_v28, %v2989_v14  ;;  %vm3097_vm1 = vweird.f32 %v3583_v22 }
 0x524   : > { %vm3098_vm2 = vmor %vm3096_vm15, %vm3097_vm1 }
 0x525   : > { %v3093_v63 = vsub.f32 1.0, %v3092_v27  ;;  %v2994_v10 = vsel %vm2993_vm14, %v3581_v28, %v2990_v8 }
 0x526   : > { %v2999_v35 = vsel %vm2996_vm9, %v2998_v48, %v2994_v10  ;;  %v2765_v52 = vpop.f32.mrf.mxu1 }
 0x527   : > { %v3094_v47 = vmul.f32 %v3583_v22, %v3093_v63  ;;  %v3142_v54 = vmul.f32 %v2999_v35, %v2822_v58  ;;  %v2803_v53 = vmul.f32 %v6351_v24, %v2765_v52  ;;  %v3161_v58 = vld [vmem:[%s6382_s23 + $0x38] sm:$0xff] }
 0x529   : > { %v3095_v7 = vadd.f32 %v3583_v22, %v3094_v47  ;;  %v3176_v60 = vadd.f32 %v3160_v29, %v3142_v54  ;;  %v2823_v21 = vadd.f32 %v6356_v4, %v2803_v53 }
 0x52b   : > { %v3099_v36 = vsel %vm3098_vm2, %v3583_v22, %v3095_v7  ;;  %3192 = vst.msk [vmem:[%s3757_s20 + $0x30] sm:$0xff] %vm1112_vm5, %v3176_v60  ;;  %v3376_v32 = vmul.f32 -1.442695, %v2823_v21 }
 0x52c   : > { %v3104_v61 = vsel %vm3101_vm3, %v3103_v0, %v3099_v36  ;;  %v2786_v12 = vpop.f32.mrf.mxu3 }
 0x52d   : > { %v3149_v45 = vmul.f32 %v3104_v61, %v2829_v6  ;;  %v2810_v23 = vmul.f32 %v6351_v24, %v2786_v12  ;;  %3584 = vpow2.f32 %v3376_v32 }
 0x52f   : > { %v3183_v11 = vadd.f32 %v3167_v49, %v3149_v45  ;;  %v2830_v3 = vadd.f32 %v6356_v4, %v2810_v23 }
 0x531   : > { %3199 = vst.msk [vmem:[%s3757_s20 + $0x68] sm:$0xff] %vm1112_vm5, %v3183_v11  ;;  %v3383_v57 = vmul.f32 -1.442695, %v2830_v3  ;;  %v3162_v11 = vld [vmem:[%s6382_s23 + $0x40] sm:$0xff] }
 0x533   : > { %3586 = vpow2.f32 %v3383_v57  ;;  %v3585_v44 = vpop.eup %3584 }
 0x534   : > { %v2887_v31 = vadd.f32 1.0, %v3585_v44 }
 0x536   : > { %3588 = vrcp.f32 %v2887_v31  ;;  %v3012_v34 = vand.u32 2147483648, %v2887_v31  ;;  %v3010_v42 = vand.u32 2147483647, %v2887_v31  ;;  %vm3006_vm10 = vweird.f32 %v2887_v31 }
 0x538   : > { %v3013_v20 = vor.u32 1.1754944e-38, %v3012_v34  ;;  %vm3011_vm0 = vcmp.eq.f32.partialorder %v3010_v42, 8.507059e+37  ;;  %v3169_v34 = vld [vmem:[%s6382_s23 + $0x78] sm:$0xff] }
 0x539   : > { %v3587_v1 = vpop.eup %3586 }
 0x53a   : > { %v2894_v19 = vadd.f32 1.0, %v3587_v1 }
 0x53c   : > { %3590 = vrcp.f32 %v2894_v19  ;;  %v3589_v26 = vpop.eup %3588  ;;  %v3117_v51 = vand.u32 2147483648, %v2894_v19  ;;  %v3115_v33 = vand.u32 2147483647, %v2894_v19  ;;  %vm3111_vm12 = vweird.f32 %v2894_v19 }
 0x53d   : > { %v3002_v25 = vmul.f32 %v3589_v26, %v2887_v31  ;;  %vm3007_vm13 = vweird.f32 %v3589_v26 }
 0x53e   : > { %vm3008_vm4 = vmor %vm3006_vm10, %vm3007_vm13  ;;  %v3118_v41 = vor.u32 1.1754944e-38, %v3117_v51  ;;  %vm3116_vm8 = vcmp.eq.f32.partialorder %v3115_v33, 8.507059e+37  ;;  %v3163_v33 = vld [vmem:[%s6382_s23 + $0x48] sm:$0xff] }
 0x53f   : > { %v3003_v5 = vsub.f32 1.0, %v3002_v25 }
 0x541   : > { %v3004_v56 = vmul.f32 %v3589_v26, %v3003_v5 }
 0x542   : > { %v3591_v37 = vpop.eup %3590 }
 0x543   : > { %v3107_v9 = vmul.f32 %v3591_v37, %v2894_v19  ;;  %v3005_v16 = vadd.f32 %v3589_v26, %v3004_v56  ;;  %vm3112_vm11 = vweird.f32 %v3591_v37 }
 0x544   : > { %vm3113_vm6 = vmor %vm3111_vm12, %vm3112_vm11 }
 0x545   : > { %v3108_v43 = vsub.f32 1.0, %v3107_v9  ;;  %v3009_v40 = vsel %vm3008_vm4, %v3589_v26, %v3005_v16 }
 0x546   : > { %v3014_v38 = vsel %vm3011_vm0, %v3013_v20, %v3009_v40  ;;  %v2768_v30 = vpop.f32.mrf.mxu1 }
 0x547   : > { %v3109_v17 = vmul.f32 %v3591_v37, %v3108_v43  ;;  %v3143_v6 = vmul.f32 %v3014_v38, %v2823_v21  ;;  %v2804_v13 = vmul.f32 %v6351_v24, %v2768_v30 }
 0x549   : > { %v3110_v62 = vadd.f32 %v3591_v37, %v3109_v17  ;;  %v3177_v15 = vadd.f32 %v3161_v58, %v3143_v6  ;;  %v2824_v18 = vadd.f32 %v6356_v4, %v2804_v13 }
 0x54b   : > { %v3114_v28 = vsel %vm3113_vm6, %v3591_v37, %v3110_v62  ;;  %3193 = vst.msk [vmem:[%s3757_s20 + $0x38] sm:$0xff] %vm1112_vm5, %v3177_v15  ;;  %v3377_v50 = vmul.f32 -1.442695, %v2824_v18 }
 0x54c   : > { %v3119_v59 = vsel %vm3116_vm8, %v3118_v41, %v3114_v28  ;;  %v2789_v22 = vpop.f32.mrf.mxu3 }
 0x54d   : > { %v3150_v14 = vmul.f32 %v3119_v59, %v2830_v3  ;;  %v2811_v39 = vmul.f32 %v6351_v24, %v2789_v22  ;;  %3592 = vpow2.f32 %v3377_v50 }
 0x54f   : > { %v3184_v27 = vadd.f32 %v3168_v55, %v3150_v14  ;;  %v2831_v8 = vadd.f32 %v6356_v4, %v2811_v39 }
 0x551   : > { %3200 = vst.msk [vmem:[%s3757_s20 + $0x70] sm:$0xff] %vm1112_vm5, %v3184_v27  ;;  %v3384_v48 = vmul.f32 -1.442695, %v2831_v8 }
 0x553   : > { %3594 = vpow2.f32 %v3384_v48  ;;  %v3593_v63 = vpop.eup %3592 }
 0x554   : > { %v2888_v10 = vadd.f32 1.0, %v3593_v63 }
 0x556   : > { %3596 = vrcp.f32 %v2888_v10  ;;  %v3027_v60 = vand.u32 2147483648, %v2888_v10  ;;  %v3025_v36 = vand.u32 2147483647, %v2888_v10  ;;  %vm3021_vm14 = vweird.f32 %v2888_v10 }
 0x558   : > { %v2771_v35 = vpop.f32.mrf.mxu1  ;;  %v3028_v32 = vor.u32 1.1754944e-38, %v3027_v60  ;;  %vm3026_vm1 = vcmp.eq.f32.partialorder %v3025_v36, 8.507059e+37 }
 0x559   : > { %v3595_v2 = vpop.eup %3594  ;;  %v2805_v47 = vmul.f32 %v6351_v24, %v2771_v35 }
 0x55a   : > { %v2895_v29 = vadd.f32 1.0, %v3595_v2 }
 0x55b   : > { %v2825_v52 = vadd.f32 %v6356_v4, %v2805_v47 }
 0x55c   : > { %3598 = vrcp.f32 %v2895_v29  ;;  %v3597_v46 = vpop.eup %3596  ;;  %v3132_v45 = vand.u32 2147483648, %v2895_v29  ;;  %v3130_v57 = vand.u32 2147483647, %v2895_v29  ;;  %vm3126_vm2 = vweird.f32 %v2895_v29 }
 0x55d   : > { %v3017_v54 = vmul.f32 %v3597_v46, %v2888_v10  ;;  %v3378_v53 = vmul.f32 -1.442695, %v2825_v52  ;;  %vm3022_vm7 = vweird.f32 %v3597_v46 }
 0x55e   : > { %vm3023_vm9 = vmor %vm3021_vm14, %vm3022_vm7  ;;  %v3133_v26 = vor.u32 1.1754944e-38, %v3132_v45  ;;  %vm3131_vm13 = vcmp.eq.f32.partialorder %v3130_v57, 8.507059e+37 }
 0x55f   : > { %v3018_v7 = vsub.f32 1.0, %v3017_v54  ;;  %3600 = vpow2.f32 %v3378_v53 }
 0x561   : > { %v3019_v21 = vmul.f32 %v3597_v46, %v3018_v7 }
 0x562   : > { %v3599_v0 = vpop.eup %3598 }
 0x563   : > { %v3122_v61 = vmul.f32 %v3599_v0, %v2895_v29  ;;  %v3020_v49 = vadd.f32 %v3597_v46, %v3019_v21  ;;  %vm3127_vm15 = vweird.f32 %v3599_v0 }
 0x564   : > { %vm3128_vm3 = vmor %vm3126_vm2, %vm3127_vm15 }
 0x565   : > { %v3123_v24 = vsub.f32 1.0, %v3122_v61  ;;  %v3024_v12 = vsel %vm3023_vm9, %v3597_v46, %v3020_v49  ;;  %v3601_v4 = vpop.eup %3600 }
 0x566   : > { %v3029_v23 = vsel %vm3026_vm1, %v3028_v32, %v3024_v12  ;;  %v2889_v31 = vadd.f32 1.0, %v3601_v4 }
 0x567   : > { %v3124_v3 = vmul.f32 %v3599_v0, %v3123_v24  ;;  %v3144_v44 = vmul.f32 %v3029_v23, %v2824_v18 }
 0x568   : > { %3602 = vrcp.f32 %v2889_v31  ;;  %v3042_v20 = vand.u32 2147483648, %v2889_v31  ;;  %v3040_v40 = vand.u32 2147483647, %v2889_v31  ;;  %vm3036_vm4 = vweird.f32 %v2889_v31 }
 0x569   : > { %v3125_v1 = vadd.f32 %v3599_v0, %v3124_v3  ;;  %v3178_v19 = vadd.f32 %v3162_v11, %v3144_v44 }
 0x56a   : > { %v3043_v38 = vor.u32 1.1754944e-38, %v3042_v20  ;;  %vm3041_vm11 = vcmp.eq.f32.partialorder %v3040_v40, 8.507059e+37 }
 0x56b   : > { %v3129_v25 = vsel %vm3128_vm3, %v3599_v0, %v3125_v1  ;;  %3194 = vst.msk [vmem:[%s3757_s20 + $0x40] sm:$0xff] %vm1112_vm5, %v3178_v19 }
 0x56c   : > { %v3134_v5 = vsel %vm3131_vm13, %v3133_v26, %v3129_v25 }
 0x56d   : > { %v3151_v37 = vmul.f32 %v3134_v5, %v2831_v8 }
 0x56e   : > { %v3603_v42 = vpop.eup %3602 }
 0x56f   : > { %v3185_v56 = vadd.f32 %v3169_v34, %v3151_v37  ;;  %v3032_v9 = vmul.f32 %v3603_v42, %v2889_v31  ;;  %vm3037_vm10 = vweird.f32 %v3603_v42 }
 0x570   : > { %vm3038_vm0 = vmor %vm3036_vm4, %vm3037_vm10 }
 0x571   : > { %3201 = vst.msk [vmem:[%s3757_s20 + $0x78] sm:$0xff] %vm1112_vm5, %v3185_v56  ;;  %v3033_v16 = vsub.f32 1.0, %v3032_v9 }
 0x573   : > { %v3034_v43 = vmul.f32 %v3603_v42, %v3033_v16 }
 0x575   : > { %v3035_v51 = vadd.f32 %v3603_v42, %v3034_v43 }
 0x577   : > { %v3039_v58 = vsel %vm3038_vm0, %v3603_v42, %v3035_v51 }
 0x578   : > { %v3044_v17 = vsel %vm3041_vm11, %v3043_v38, %v3039_v58 }
 0x579   : > { %v3145_v30 = vmul.f32 %v3044_v17, %v2825_v52 }
 0x57b   : > { %v3179_v6 = vadd.f32 %v3163_v33, %v3145_v30 }
 0x57d   : > { %3195 = vst.msk [vmem:[%s3757_s20 + $0x48] sm:$0xff] %vm1112_vm5, %v3179_v6 }
 0x57e PF: > { %s17_s28 = sadd.s32 1, %s3657_s28   ;;  %s6781_s24 = smov %s3649_s26 }
 0x57f   : > { %p14_p8 = scmp.ge.s32.totalorder %s17_s28, 6   ;;  %s6782_s25 = smov %s3653_s27 }
 0x580   : > { %s6783_s26 = smov %s6786_s29  ;;  %s6784_s27 = smov %s6790_s30 }
 0x581   :  { %16 = sbr.rel (!%p14_p8) target bundleno = 3 (0x3), region = 85 }

</bundles_post_ra>
